<compile_context>
chip_gen: v5e
topology: v5e:2x2
jax: 0.10.0
libtpu: 0.0.40
codegen_flags: <defaults>
</compile_context>

<pallas_src>
from functools import partial
from math import sqrt

import jax
import jax.numpy as jnp
from jax.experimental import pallas as pl
from jax.experimental.pallas import tpu as pltpu


# ----------------------------- Pallas kernel --------------------------------


def _siren_kernel(n_layers, x_ref, *refs):
    """Full SIREN MLP on one (C, tile_hw) spatial tile of one batch element.

    x_ref : (1, Cin, tile_hw)
    refs  : (W_1, b_1, ..., W_L, b_L, out_ref)
      W_i : (C_out_i, C_in_i)  (pre-transposed; hidden layers pre-scaled by omega_0)
      b_i : (C_out_i, 1)
    out_ref : (1, Cout, tile_hw)
    """
    out_ref = refs[-1]
    wb = refs[:-1]
    assert len(wb) == 2 * n_layers

    h = x_ref[0].astype(jnp.float32)            # (Cin, tile_hw)
    for i in range(n_layers):
        w = wb[2 * i][...]                      # (C_out, C_in), f32
        b = wb[2 * i + 1][...]                  # (C_out, 1)
        # MXU matmul over the (small) channel axis; spatial stays on lanes.
        z = jnp.dot(w, h, preferred_element_type=jnp.float32) + b
        h = jnp.sin(z) if i < n_layers - 1 else z
    out_ref[0] = h.astype(out_ref.dtype)


def siren_forward(x, weights, biases, omega_0, *, tile_hw=1024):
    """Run the SIREN kernel_net on an NCHW input (dim_linear <= 3 branch).

    x       : (B, Cin, H, W) float32
    weights : list of (C_in_i, C_out_i) float32  (torch conv weight, transposed)
    biases  : list of (C_out_i,) float32
    """
    B, Cin, H, W = x.shape
    HW = H * W
    n_layers = len(weights)
    hidden = weights[0].shape[1]
    Cout = weights[-1].shape[1]

    # NCHW -> (B, C, HW): contiguous reshape, no transpose / HBM round-trip.
    x3 = x.reshape(B, Cin, HW)

    # Choose spatial tile: full extent if small, else a multiple-of-128 tile.
    if HW <= tile_hw:
        tile = HW
        HW_pad = HW
    else:
        tile = tile_hw
        HW_pad = ((HW + tile - 1) // tile) * tile
        if HW_pad != HW:
            x3 = jnp.pad(x3, ((0, 0), (0, 0), (0, HW_pad - HW)))

    # Prep weights: transpose to (C_out, C_in); fold omega_0 into hidden layers.
    w_t, b_col = [], []
    for i, (w, b) in enumerate(zip(weights, biases)):
        scale = float(omega_0) if i < n_layers - 1 else 1.0
        w_t.append(jnp.asarray(w.T * scale, jnp.float32))          # (C_out, C_in)
        b_col.append(jnp.asarray(b, jnp.float32).reshape(-1, 1))   # (C_out, 1)

    # ---- BlockSpecs: tile the spatial axis, keep weights/biases whole ----
    in_specs = [pl.BlockSpec((1, Cin, tile), lambda b, t: (b, 0, t))]
    wb_args = []
    for wt, bc in zip(w_t, b_col):
        in_specs.append(pl.BlockSpec(wt.shape, lambda b, t: (0, 0)))
        in_specs.append(pl.BlockSpec(bc.shape, lambda b, t: (0, 0)))
        wb_args.extend([wt, bc])

    out_spec = pl.BlockSpec((1, Cout, tile), lambda b, t: (b, 0, t))

    # Advisory cost estimate for XLA's scheduler.
    npts = int(B * HW_pad)
    flops = int(2 * npts * (Cin * hidden
                            + hidden * hidden * max(n_layers - 2, 0)
                            + hidden * Cout))
    transc = int(npts * hidden * (n_layers - 1))
    bytes_acc = int(4 * (npts * (Cin + Cout)
                         + sum(int(w.size) for w in w_t)
                         + sum(int(b.size) for b in b_col)))
    cost = pl.CostEstimate(flops=flops, transcendentals=transc,
                           bytes_accessed=bytes_acc)

    out3 = pl.pallas_call(
        partial(_siren_kernel, n_layers),
        out_shape=jax.ShapeDtypeStruct((B, Cout, HW_pad), x.dtype),
        grid_spec=pltpu.PrefetchScalarGridSpec(
            num_scalar_prefetch=0,
            grid=(B, HW_pad // tile),
            in_specs=in_specs,
            out_specs=out_spec,
        ),
        compiler_params=pltpu.CompilerParams(
            dimension_semantics=("parallel", "parallel"),
        ),
        cost_estimate=cost,
    )(x3, *wb_args)

    if HW_pad != HW:
        out3 = out3[:, :, :HW]
    return out3.reshape(B, Cout, H, W)


# -------------------------- parameter initialization ------------------------


def init_siren_params(key, dim_input_space, out_channels, hidden_channels,
                      no_layers, omega_0):
    """Deterministic init mirroring SIRENBase.initialize() (biases -> 0)."""
    dims = ([dim_input_space]
            + [hidden_channels] * (no_layers - 1)
            + [out_channels])
    weights, biases = [], []
    for layer_idx in range(no_layers):
        fan_in, fan_out = dims[layer_idx], dims[layer_idx + 1]
        if layer_idx == 0:
            w_std = 1.0 / fan_in
        else:
            w_std = sqrt(6.0 / fan_in) / omega_0
        key, sub = jax.random.split(key)
        w = jax.random.uniform(sub, (fan_in, fan_out), jnp.float32,
                               minval=-w_std, maxval=w_std)
        weights.append(w)
        biases.append(jnp.zeros((fan_out,), jnp.float32))
    return weights, biases


# ------------------------------ reference (JAX) ------------------------------


def siren_reference(x, weights, biases, omega_0):
    B, Cin, H, W = x.shape
    h = jnp.transpose(x, (0, 2, 3, 1)).reshape(B * H * W, Cin)
    n_layers = len(weights)
    for i, (w, b) in enumerate(zip(weights, biases)):
        if i < n_layers - 1:
            h = jnp.sin((omega_0 * h) @ w + b[None, :])
        else:
            h = h @ w + b[None, :]
    Cout = weights[-1].shape[1]
    return jnp.transpose(h.reshape(B, H, W, Cout), (0, 3, 1, 2))


# ----------------------------------- main ------------------------------------

if __name__ == "__main__":
    # SIRENBase hyperparameters (small, consistent with a 2D continuous kernel)
    dim_input_space = 2      # (x, y) relative coordinates
    out_channels = 4
    hidden_channels = 32
    no_layers = 3
    omega_0 = 10.0
    # weight_norm=False, bias=True, learn_omega_0=False
    # TODO(synk): dim_linear > 3 branch is just a view/transpose wrapper around
    # the same pointwise MLP; only the Conv2d (dim_linear <= 3) path is built.

    key = jax.random.PRNGKey(0)
    key, kx = jax.random.split(key)
    # NCHW input, values in [-1, 1] like coordinate grids
    x = jax.random.uniform(kx, (2, dim_input_space, 16, 16), jnp.float32,
                           minval=-1.0, maxval=1.0)

    weights, biases = init_siren_params(
        key, dim_input_space, out_channels, hidden_channels, no_layers, omega_0
    )

    out = siren_forward(x, weights, biases, omega_0)
    out = jax.block_until_ready(out)

    ref = siren_reference(x, weights, biases, omega_0)
    assert out.shape == (2, out_channels, 16, 16), out.shape
    assert jnp.allclose(out, ref, atol=1e-5, rtol=1e-5), float(
        jnp.max(jnp.abs(out - ref))
    )

    print("KERNEL_OK")
</pallas_src>

<mosaic_0001>
module attributes {stable_mosaic.version = 11 : i64} {
  func.func @_siren_kernel(%arg0: i32, %arg1: i32, %arg2: memref<1x2x256xf32, #tpu.memory_space<vmem>>, %arg3: memref<32x2xf32, #tpu.memory_space<vmem>>, %arg4: memref<32x1xf32, #tpu.memory_space<vmem>>, %arg5: memref<32x32xf32, #tpu.memory_space<vmem>>, %arg6: memref<32x1xf32, #tpu.memory_space<vmem>>, %arg7: memref<4x32xf32, #tpu.memory_space<vmem>>, %arg8: memref<4x1xf32, #tpu.memory_space<vmem>>, %arg9: memref<1x4x256xf32, #tpu.memory_space<vmem>>) attributes {dimension_semantics = [#tpu.dimension_semantics<parallel>, #tpu.dimension_semantics<parallel>], iteration_bounds = array<i64: 2, 1>, scalar_prefetch = 0 : i64, scratch_operands = 0 : i64, tpu.core_type = #tpu.core_type<tc>, window_params = [{transform_indices = @transform_0, window_bounds = array<i64: 1, 2, 256>}, {pipeline_mode = #tpu.pipeline_mode<synchronous>, transform_indices = @transform_1, window_bounds = array<i64: 32, 2>}, {pipeline_mode = #tpu.pipeline_mode<synchronous>, transform_indices = @transform_2, window_bounds = array<i64: 32, 1>}, {pipeline_mode = #tpu.pipeline_mode<synchronous>, transform_indices = @transform_3, window_bounds = array<i64: 32, 32>}, {pipeline_mode = #tpu.pipeline_mode<synchronous>, transform_indices = @transform_4, window_bounds = array<i64: 32, 1>}, {pipeline_mode = #tpu.pipeline_mode<synchronous>, transform_indices = @transform_5, window_bounds = array<i64: 4, 32>}, {pipeline_mode = #tpu.pipeline_mode<synchronous>, transform_indices = @transform_6, window_bounds = array<i64: 4, 1>}, {transform_indices = @transform_7, window_bounds = array<i64: 1, 4, 256>}]} {
    %c0 = arith.constant 0 : index
    %c0_0 = arith.constant 0 : index
    %c0_1 = arith.constant 0 : index
    %0 = vector.load %arg2[%c0, %c0_0, %c0_1] : memref<1x2x256xf32, #tpu.memory_space<vmem>>, vector<1x2x256xf32>
    %1 = vector.shape_cast %0 : vector<1x2x256xf32> to vector<2x256xf32>
    %c0_2 = arith.constant 0 : index
    %c0_3 = arith.constant 0 : index
    %2 = vector.load %arg3[%c0_2, %c0_3] : memref<32x2xf32, #tpu.memory_space<vmem>>, vector<32x2xf32>
    %c0_4 = arith.constant 0 : index
    %c0_5 = arith.constant 0 : index
    %3 = vector.load %arg4[%c0_4, %c0_5] : memref<32x1xf32, #tpu.memory_space<vmem>>, vector<32x1xf32>
    %cst = arith.constant dense<0.000000e+00> : vector<32x256xf32>
    %4 = tpu.matmul %2, %1, %cst {dimension_numbers = #tpu.dot_dimension_numbers<[1], [0], [0], [1], [0, 0, 1, 1], [], []>} : vector<32x2xf32>, vector<2x256xf32>, vector<32x256xf32> -> vector<32x256xf32>
    %5 = vector.broadcast %3 : vector<32x1xf32> to vector<32x256xf32>
    %6 = arith.addf %4, %5 : vector<32x256xf32>
    %7 = math.sin %6 : vector<32x256xf32>
    %c0_6 = arith.constant 0 : index
    %c0_7 = arith.constant 0 : index
    %8 = vector.load %arg5[%c0_6, %c0_7] : memref<32x32xf32, #tpu.memory_space<vmem>>, vector<32x32xf32>
    %c0_8 = arith.constant 0 : index
    %c0_9 = arith.constant 0 : index
    %9 = vector.load %arg6[%c0_8, %c0_9] : memref<32x1xf32, #tpu.memory_space<vmem>>, vector<32x1xf32>
    %cst_10 = arith.constant dense<0.000000e+00> : vector<32x256xf32>
    %10 = tpu.matmul %8, %7, %cst_10 {dimension_numbers = #tpu.dot_dimension_numbers<[1], [0], [0], [1], [0, 0, 1, 1], [], []>} : vector<32x32xf32>, vector<32x256xf32>, vector<32x256xf32> -> vector<32x256xf32>
    %11 = vector.broadcast %9 : vector<32x1xf32> to vector<32x256xf32>
    %12 = arith.addf %10, %11 : vector<32x256xf32>
    %13 = math.sin %12 : vector<32x256xf32>
    %c0_11 = arith.constant 0 : index
    %c0_12 = arith.constant 0 : index
    %14 = vector.load %arg7[%c0_11, %c0_12] : memref<4x32xf32, #tpu.memory_space<vmem>>, vector<4x32xf32>
    %c0_13 = arith.constant 0 : index
    %c0_14 = arith.constant 0 : index
    %15 = vector.load %arg8[%c0_13, %c0_14] : memref<4x1xf32, #tpu.memory_space<vmem>>, vector<4x1xf32>
    %cst_15 = arith.constant dense<0.000000e+00> : vector<4x256xf32>
    %16 = tpu.matmul %14, %13, %cst_15 {dimension_numbers = #tpu.dot_dimension_numbers<[1], [0], [0], [1], [0, 0, 1, 1], [], []>} : vector<4x32xf32>, vector<32x256xf32>, vector<4x256xf32> -> vector<4x256xf32>
    %17 = vector.broadcast %15 : vector<4x1xf32> to vector<4x256xf32>
    %18 = arith.addf %16, %17 : vector<4x256xf32>
    %c0_16 = arith.constant 0 : index
    %c0_17 = arith.constant 0 : index
    %c0_18 = arith.constant 0 : index
    %19 = vector.load %arg9[%c0_16, %c0_17, %c0_18] : memref<1x4x256xf32, #tpu.memory_space<vmem>>, vector<1x4x256xf32>
    %20 = vector.shape_cast %19 : vector<1x4x256xf32> to vector<4x256xf32>
    %21 = vector.shape_cast %18 : vector<4x256xf32> to vector<1x4x256xf32>
    tpu.vector_store %arg9[%c0_16, %c0_17, %c0_18], %21 {strides = array<i32>} : memref<1x4x256xf32, #tpu.memory_space<vmem>>, vector<1x4x256xf32>,
    return
  }
  func.func @transform_0(%arg0: i32, %arg1: i32) -> (i32, i32, i32) {
    %c0_i32 = arith.constant 0 : i32
    %c0_i32_0 = arith.constant 0 : i32
    return %arg0, %c0_i32, %arg1 : i32, i32, i32
  }
  func.func @transform_1(%arg0: i32, %arg1: i32) -> (i32, i32) {
    %c0_i32 = arith.constant 0 : i32
    %c0_i32_0 = arith.constant 0 : i32
    %c0_i32_1 = arith.constant 0 : i32
    return %c0_i32, %c0_i32_0 : i32, i32
  }
  func.func @transform_2(%arg0: i32, %arg1: i32) -> (i32, i32) {
    %c0_i32 = arith.constant 0 : i32
    %c0_i32_0 = arith.constant 0 : i32
    %c0_i32_1 = arith.constant 0 : i32
    return %c0_i32, %c0_i32_0 : i32, i32
  }
  func.func @transform_3(%arg0: i32, %arg1: i32) -> (i32, i32) {
    %c0_i32 = arith.constant 0 : i32
    %c0_i32_0 = arith.constant 0 : i32
    %c0_i32_1 = arith.constant 0 : i32
    return %c0_i32, %c0_i32_0 : i32, i32
  }
  func.func @transform_4(%arg0: i32, %arg1: i32) -> (i32, i32) {
    %c0_i32 = arith.constant 0 : i32
    %c0_i32_0 = arith.constant 0 : i32
    %c0_i32_1 = arith.constant 0 : i32
    return %c0_i32, %c0_i32_0 : i32, i32
  }
  func.func @transform_5(%arg0: i32, %arg1: i32) -> (i32, i32) {
    %c0_i32 = arith.constant 0 : i32
    %c0_i32_0 = arith.constant 0 : i32
    %c0_i32_1 = arith.constant 0 : i32
    return %c0_i32, %c0_i32_0 : i32, i32
  }
  func.func @transform_6(%arg0: i32, %arg1: i32) -> (i32, i32) {
    %c0_i32 = arith.constant 0 : i32
    %c0_i32_0 = arith.constant 0 : i32
    %c0_i32_1 = arith.constant 0 : i32
    return %c0_i32, %c0_i32_0 : i32, i32
  }
  func.func @transform_7(%arg0: i32, %arg1: i32) -> (i32, i32, i32) {
    %c0_i32 = arith.constant 0 : i32
    %c0_i32_0 = arith.constant 0 : i32
    return %arg0, %c0_i32, %arg1 : i32, i32, i32
  }
}

</mosaic_0001>

<bundles_post_ra>
// kernel: tpu_custom_call.1
= control target key start
LH: loop header
LB: loop body
LE: loop exit
PB: predicated region body
PF: predicated region fallthrough
CT: control target
= control target key end

     0   :  { %12 = vsyncpa [#allocation3], 0  ;;  %s5780_s0 = inlined_call_operand.vmem [shape: f32[2,2,256], index: 0, kind: input, shape index: {}]   ;;  %s5781_s1 = inlined_call_operand.vmem [shape: f32[32,2], index: 1, kind: input, shape index: {}]   ;;  %s5782_s2 = inlined_call_operand.vmem [shape: f32[32,1], index: 2, kind: input, shape index: {}]   ;;  %s5783_s3 = inlined_call_operand.vmem [shape: f32[32,32], index: 3, kind: input, shape index: {}]   ;;  %s5784_s4 = inlined_call_operand.vmem [shape: f32[32,1], index: 4, kind: input, shape index: {}]   ;;  %s5785_s5 = inlined_call_operand.vmem [shape: f32[4,32], index: 5, kind: input, shape index: {}]   ;;  %s5786_s6 = inlined_call_operand.vmem [shape: f32[4,1], index: 6, kind: input, shape index: {}]   ;;  %s5787_s7 = inlined_call_operand.hbm [shape: f32[2,4,256], index: 7, kind: output, shape index: {}]  }
   0x1   :  { %14 = vsyncpa [#allocation3 + $0x1], 0  ;;  %s3423_s24 = smov 0   ;;  %s3425_s25 = smov 0  }
   0x2   :  { %s3427_s26 = smov 0   ;;  %s3429_s27 = smov 0  }
   0x3   :  { %s3431_s28 = smov 0   ;;  %s3433_s29 = smov 0  }
   0x4 LB: > { %s3148_s30 = sadd.s32 4294967295, %s3374_s29   ;;  %s3149_s8 = sadd.s32 4294967294, %s3374_s29   ;;  %s3374_s29 = sphi %s3433_s29, %s20_s29   ;;  %s3370_s28 = sphi %s3431_s28, %s5994_s28   ;;  %s3366_s27 = sphi %s3429_s27, %s5993_s27   ;;  %s3362_s26 = sphi %s3427_s26, %s5992_s26   ;;  %s3358_s25 = sphi %s3425_s25, %s5991_s25   ;;  %s3354_s24 = sphi %s3423_s24, %s5990_s24  }
   0x5   : > { %s32_s9 = sadd.s32 1, %s3370_s28  ;;  %s195_s10 = sadd.s32 1, %s3362_s26 }
   0x6   : > { %p34_p0 = scmp.ge.s32.totalorder %s32_s9, 2  ;;  %p205_p1 = scmp.ne.s32.totalorder %s3362_s26, %s3358_s25 }
   0x7   : > { %p206_p2 = scmp.eq.s32.totalorder %s3148_s30, 1  ;;  %p211_p3 = scmp.ne.s32.totalorder %s3358_s25, %s3354_s24 }
   0x8   : > { %s5996_s9 = smov (%p34_p0, %s32_s9), 0  ;;  %p212_p5 = scmp.eq.s32.totalorder %s3149_s8, 1 }
   0x9   : > { %p3463_p4 = por %p206_p2, %p205_p1  ;;  %s190_s12 = ssub.s32 %s3370_s28, %s5996_s9 }
   0xa   : > { %p3152_p6 = scmp.ge.s32.totalorder %s3374_s29, 1  ;;  %p193_p7 = scmp.eq.s32.totalorder %s190_s12, 0 }
   0xb   : > { %p3470_p8 = por %p212_p5, %p211_p3  ;;  %p261_p9 = scmp.lt.s32.totalorder %s3374_s29, 3 }
   0xc   : > { %s3476_s14 = scalar_select %p193_p7, %s3362_s26, %s195_s10  }
   0xd   : > { %p262_p10 = pnand %p3152_p6, %p261_p9 }
   0xf   : > { %265 = sbr.rel (%p262_p10) target bundleno = 1116 (0x45c), region = 48 }
  0x14   : > { %p298_p11 = scmp.lt.s32.totalorder %s3366_s27, 1  ;;  %v314_v0 = vld [vmem:[%s5782_s2 + $0x8] sm:$0xff]  ;;  %v5789_v1 = vmov 0   ;;  %v316_v2 = vld [vmem:[%s5782_s2 + $0x18] sm:$0xff]  ;;  %v313_v4 = vld [vmem:[%s5782_s2] sm:$0xff]  ;;  %vm354_vm0 = vcmask 1041408  }
  0x15   : > { %3294 = vset.pattern.permute.xlu1 %v5789_v1  ;;  %3293 = vset.pattern.permute.xlu0 %v5789_v1  ;;  %v315_v5 = vld [vmem:[%s5782_s2 + $0x10] sm:$0xff]  ;;  %v309_v6 = vld [vmem:[%s5781_s1] sm:$0xff]  ;;  %vm341_vm1 = vcmask 15360   ;;  %v1662_v9 = vld [vmem:[%s5784_s4 + $0x8] sm:$0xff]  ;;  %s294_s17 = sand.u32 1, %s3358_s25  }
  0x16   : > { %s299_s19 = scalar_select %p298_p11, %s3366_s27, 1  ;;  %324 = vperm.xlu1 %3294, %v314_v0   ;;  %334 = vperm.xlu0 %3293, %v316_v2   ;;  %v1661_v10 = vld [vmem:[%s5784_s4] sm:$0xff]  ;;  %v310_v11 = vld [vmem:[%s5781_s1 + $0x8] sm:$0xff]  ;;  %v311_v12 = vld [vmem:[%s5781_s1 + $0x10] sm:$0xff] }
  0x17   : > { %3295 = vset.pattern.permute.xlu2 %v5789_v1  ;;  %v312_v13 = vld [vmem:[%s5781_s1 + $0x18] sm:$0xff]  ;;  %s3153_s18 = sshll.u32 %s294_s17, 3 }
  0x18   : > { %s3229_s20 = sshll.u32 %s299_s19, 2  ;;  %s3230_s19 = sshll.u32 %s3366_s27, 3 }
  0x19   : > { %s305_s23 = scalar_lea.vmem %s5780_s0, %s3229_s20  ;;  %s3067_s22 = scalar_lea.hbm %s5787_s7, %s3230_s19 }
  0x1a   : > { %v308_v3 = vld [vmem:[%s305_s23] sm:$0xf]  ;;  %s296_s23 = scalar_lea.vmem [#allocation2], %s3153_s18  ;;  %s3071_s8 = sshll.u32 %s3067_s22, 4  ;;  %s3072_s8 = int_to_ptr.hbm [resolvable:$true] %s3071_s8 }
  0x1b   : > { %338 = vst [vmem:[#allocation1] ss:$4 sm:$0xff] %v308_v3  ;;  %s3069_s30 = sshll.u32 %s296_s23, 4  ;;  %s3054_s27 = scalar_lea.sflag [#allocation3], %s294_s17  ;;  %s3070_s30 = int_to_ptr.vmem [resolvable:$true] %s3069_s30 }
  0x1c   : > { %s3310_s10 = sshra.s32 %s3072_s8, 4  ;;  %s3316_s18 = scalar_lea.hbm %s5787_s7, 16  ;;  %s3311_s10 = int_to_ptr.hbm [resolvable:$true] %s3310_s10 }
  0x1d   : > { %s3312_s12 = scalar_lea.hbm %s3311_s10, 8  ;;  %p3317_p1 = scmp.lt.s32.totalorder %s3311_s10, %s5787_s7 }
  0x1e   : > { %319 = vperm.xlu1 %3294, %v313_v4   ;;  %329 = vperm.xlu0 %3293, %v315_v5   ;;  %p3313_p12 = scmp.ne.s32.totalorder %s3311_s10, %s3312_s12  ;;  %p3318_p2 = scmp.lt.s32.totalorder %s3316_s18, %s3312_s12 }
  0x20   : > { %p3314_p13 = pnand %p3313_p12, %p3463_p4  ;;  %p3319_p3 = por %p3318_p2, %p3317_p1 }
  0x22   : > { %v339_v7 = vld.sshfl [vmem:[#allocation1] sm:$0xff pattern:$0x73625140]  ;;  %v340_v8 = vld.sshfl [vmem:[#allocation1 + $0x8] sm:$0xff pattern:$0x73625140]  ;;  %p3315_p0 = pneg %p3314_p13 }
  0x23   : > { %3156 = vmatpush.msk.msra.mxu0 %vm354_vm0, %v339_v7  ;;  %3161 = vmatpush.msk.msra.mxu1 %vm354_vm0, %v340_v8 }
  0x24   : > { %3157 = vmatmul.msk.f32.vlgmr.msra.gmra.mxu0 %vm341_vm1, %v309_v6  ;;  %3162 = vmatmul.msk.f32.vlgmr.msra.gmra.mxu1 %vm341_vm1, %v309_v6  ;;  %p3320_p5 = pnand %p3319_p3, %p3315_p0 }
  0x26   : > { %1672 = vperm.xlu0 %3293, %v1662_v9   ;;  %1667 = vperm.xlu1 %3294, %v1661_v10   ;;  %v5797_v9 = vmov 2102212464  }
  0x2c   : > { %3158 = vmatmul.msk.f32.gmra.mxu0 %vm341_vm1, %v310_v11  ;;  %3163 = vmatmul.msk.f32.gmra.mxu1 %vm341_vm1, %v310_v11  ;;  %v5813_v11 = vmov 920167782  }
  0x34   : > { %3159 = vmatmul.msk.f32.gmra.mxu0 %vm341_vm1, %v311_v12  ;;  %3164 = vmatmul.msk.f32.gmra.mxu1 %vm341_vm1, %v311_v12 }
  0x3c   : > { %3160 = vmatmul.msk.f32.gmra.mxu0 %vm341_vm1, %v312_v13  ;;  %3165 = vmatmul.msk.f32.gmra.mxu1 %vm341_vm1, %v312_v13 }
  0x88   : > { %v325_v14 = vpop.permute.xlu1 %324  ;;  %v335_v22 = vpop.permute.xlu0 %334 }
  0x90   : > { %v320_v15 = vpop.permute.xlu1 %319  ;;  %v330_v39 = vpop.permute.xlu0 %329 }
  0xa1   : > { %v376_v16 = vpop.f32.mrf.mxu0  ;;  %v405_v17 = vpop.f32.mrf.mxu1 }
  0xa2   : > { %v3524_v18 = vadd.f32 %v376_v16, %v320_v15  ;;  %v3526_v19 = vadd.f32 %v405_v17, %v320_v15 }
  0xa4   : > { %5859 = vst [vmem:[#allocation5_spill] sm:$0xff] %v3524_v18  ;;  %v420_v20 = vand.u32 2139095040, %v3524_v18  ;;  %v575_v21 = vand.u32 2139095040, %v3526_v19 }
  0xa5   : > { %5860 = vst [vmem:[#allocation6_spill] sm:$0xff] %v3526_v19 }
  0xa6   : > { %v421_v25 = vshrl.u32 %v420_v20, 23  ;;  %v576_v28 = vshrl.u32 %v575_v21, 23  ;;  %v5803_v21 = vmov 1326507024  }
  0xa8   : > { %v3166_v31 = vadd.s32 4294967169, %v421_v25  ;;  %v3169_v32 = vadd.s32 4294967169, %v576_v28 }
  0xa9   : > { %v379_v23 = vpop.f32.mrf.mxu0  ;;  %v408_v24 = vpop.f32.mrf.mxu1 }
  0xaa   : > { %v3530_v26 = vadd.f32 %v379_v23, %v325_v14  ;;  %v3532_v27 = vadd.f32 %v408_v24, %v325_v14  ;;  %v427_v37 = vadd.s32 1, %v3166_v31  ;;  %v582_v40 = vadd.s32 1, %v3169_v32 }
  0xac   : > { %5861 = vst [vmem:[#allocation7_spill] sm:$0xff] %v3532_v27  ;;  %v730_v29 = vand.u32 2139095040, %v3530_v26  ;;  %v885_v30 = vand.u32 2139095040, %v3532_v27  ;;  %vm428_vm2 = vcmp.gt.s32.totalorder %v427_v37, 0  ;;  %vm583_vm3 = vcmp.gt.s32.totalorder %v582_v40, 0 }
  0xad   : > { %v429_v48 = vsel %vm428_vm2, %v427_v37, 0  ;;  %v584_v51 = vsel %vm583_vm3, %v582_v40, 0 }
  0xae   : > { %v731_v33 = vshrl.u32 %v730_v29, 23  ;;  %v886_v34 = vshrl.u32 %v885_v30, 23  ;;  %v3542_v55 = vand.u32 31, %v429_v48  ;;  %v3544_v58 = vand.u32 31, %v584_v51 }
  0xaf   : > { %v3557_v5 = vshrl.u32 %v429_v48, 5  ;;  %v3559_v6 = vshrl.u32 %v584_v51, 5 }
  0xb0   : > { %v3172_v38 = vadd.s32 4294967169, %v731_v33  ;;  %v3175_v41 = vadd.s32 4294967169, %v886_v34  ;;  %5862 = vst [vmem:[#allocation8_spill] sm:$0xff] %v3542_v55  ;;  %v3555_v3 = vsub.s32 32, %v3542_v55  ;;  %v3562_v7 = vsub.s32 32, %v3544_v58 }
  0xb1   : > { %v382_v35 = vpop.f32.mrf.mxu0  ;;  %v411_v36 = vpop.f32.mrf.mxu1  ;;  %5863 = vst [vmem:[#allocation9_spill] sm:$0xff] %v3544_v58  ;;  %v3568_v10 = vshll.u32 %v5797_v9, %v3542_v55  ;;  %v3572_v12 = vshll.u32 %v5813_v11, %v3542_v55  ;;  %v3576_v13 = vshll.u32 %v5797_v9, %v3544_v58  ;;  %v3592_v23 = vshll.u32 %v5813_v11, %v3544_v58 }
  0xb2   : > { %v3536_v42 = vadd.f32 %v382_v35, %v330_v39  ;;  %v3538_v43 = vadd.f32 %v411_v36, %v330_v39  ;;  %v737_v44 = vadd.s32 1, %v3172_v38  ;;  %v892_v47 = vadd.s32 1, %v3175_v41  ;;  %5864 = vst [vmem:[#allocation10_spill] sm:$0xff] %v3555_v3 }
  0xb3   : > { %5865 = vst [vmem:[#allocation11_spill] sm:$0xff] %v3557_v5  ;;  %v3584_v20 = vshrl.u32 %v5813_v11, %v3555_v3  ;;  %v3596_v24 = vshrl.u32 %v5813_v11, %v3562_v7 }
  0xb4   : > { %v1040_v45 = vand.u32 2139095040, %v3536_v42  ;;  %v1195_v46 = vand.u32 2139095040, %v3538_v43  ;;  %vm738_vm4 = vcmp.gt.s32.totalorder %v737_v44, 0  ;;  %vm893_vm5 = vcmp.gt.s32.totalorder %v892_v47, 0  ;;  %5866 = vst [vmem:[#allocation12_spill] sm:$0xff] %v3559_v6 }
  0xb5   : > { %v739_v54 = vsel %vm738_vm4, %v737_v44, 0  ;;  %v894_v62 = vsel %vm893_vm5, %v892_v47, 0  ;;  %5867 = vst [vmem:[#allocation13_spill] sm:$0xff] %v3562_v7  ;;  %v5811_v6 = vmov 2131351028  }
  0xb6   : > { %v1041_v49 = vshrl.u32 %v1040_v45, 23  ;;  %v1196_v50 = vshrl.u32 %v1195_v46, 23  ;;  %v3550_v61 = vand.u32 31, %v739_v54  ;;  %v3564_v8 = vand.u32 31, %v894_v62  ;;  %5869 = vst [vmem:[#allocation15_spill] sm:$0xff] %v3568_v10 }
  0xb7   : > { %5870 = vst [vmem:[#allocation16_spill] sm:$0xff] %v3572_v12  ;;  %v3598_v25 = vshrl.u32 %v739_v54, 5  ;;  %v3617_v38 = vshrl.u32 %v894_v62, 5 }
  0xb8   : > { %v3178_v56 = vadd.s32 4294967169, %v1041_v49  ;;  %v3181_v57 = vadd.s32 4294967169, %v1196_v50  ;;  %5868 = vst [vmem:[#allocation14_spill] sm:$0xff] %v3564_v8  ;;  %v3579_v14 = vsub.s32 32, %v3550_v61  ;;  %v753_v28 = vshll.u32 %v5797_v9, %v3550_v61 }
  0xb9   : > { %v385_v52 = vpop.f32.mrf.mxu0  ;;  %v414_v53 = vpop.f32.mrf.mxu1  ;;  %5871 = vst [vmem:[#allocation17_spill] sm:$0xff] %v3576_v13  ;;  %v3603_v29 = vsub.s32 32, %v3564_v8  ;;  %v3607_v30 = vshll.u32 %v5813_v11, %v3550_v61  ;;  %v3621_v39 = vshll.u32 %v5797_v9, %v3564_v8  ;;  %v3629_v45 = vshll.u32 %v5813_v11, %v3564_v8 }
  0xba   : > { %v3546_v59 = vadd.f32 %v385_v52, %v335_v22  ;;  %v3548_v60 = vadd.f32 %v414_v53, %v335_v22  ;;  %v1047_v63 = vadd.s32 1, %v3178_v56  ;;  %v1202_v4 = vadd.s32 1, %v3181_v57  ;;  %5872 = vst [vmem:[#allocation18_spill] sm:$0xff] %v3584_v20 }
  0xbb   : > { %v3588_v22 = vshrl.u32 %v5803_v21, %v3555_v3  ;;  %5874 = vst [vmem:[#allocation20_spill] sm:$0xff] %v3592_v23  ;;  %v754_v34 = vshrl.u32 %v5813_v11, %v3579_v14  ;;  %v3613_v35 = vshrl.u32 %v5803_v21, %v3579_v14  ;;  %v3625_v44 = vshrl.u32 %v5813_v11, %v3603_v29 }
  0xbc   : > { %v1350_v0 = vand.u32 2139095040, %v3546_v59  ;;  %v1505_v2 = vand.u32 2139095040, %v3548_v60  ;;  %vm1048_vm6 = vcmp.gt.s32.totalorder %v1047_v63, 0  ;;  %v5788_v17 = vand.u32 2147483647, %v3546_v59  ;;  %5875 = vst [vmem:[#allocation21_spill] sm:$0xff] %v3596_v24 }
  0xbd   : > { %5873 = vst [vmem:[#allocation19_spill] sm:$0xff] %v3588_v22  ;;  %vm1203_vm7 = vcmp.gt.s32.totalorder %v1202_v4, 0  ;;  %v1049_v31 = vsel %vm1048_vm6, %v1047_v63, 0  ;;  %v3633_v46 = vshrl.u32 %v5803_v21, %v3603_v29  ;;  %v3639_v50 = vor.u32 %v754_v34, %v753_v28 }
  0xbe   : > { %v1351_v15 = vshrl.u32 %v1350_v0, 23  ;;  %v1506_v16 = vshrl.u32 %v1505_v2, 23  ;;  %5876 = vst [vmem:[#allocation22_spill] sm:$0xff] %v3603_v29  ;;  %v1204_v36 = vsel %vm1203_vm7, %v1202_v4, 0  ;;  %v1354_v37 = vand.u32 8388607, %v5788_v17 }
  0xbf   : > { %5877 = vst [vmem:[#allocation23_spill] sm:$0xff] %v3617_v38  ;;  %v3635_v47 = vand.u32 31, %v1049_v31  ;;  %v3637_v48 = vand.u32 31, %v1204_v36  ;;  %v3643_v54 = vshrl.u32 %v1049_v31, 5  ;;  %v3660_v4 = vshrl.u32 %v1204_v36, 5 }
  0xc0   : > { %v3184_v32 = vadd.s32 4294967169, %v1351_v15  ;;  %v3187_v33 = vadd.s32 4294967169, %v1506_v16  ;;  %5878 = vst [vmem:[#allocation24_spill] sm:$0xff] %v3629_v45  ;;  %v1355_v49 = vor.u32 8388608, %v1354_v37  ;;  %v5809_v17 = vmov 2475754826  }
  0xc1   : > { %5879 = vst [vmem:[#allocation25_spill] sm:$0xff] %v3633_v46  ;;  %v3650_v63 = vsub.s32 32, %v3635_v47  ;;  %v3654_v0 = vshll.u32 %v5797_v9, %v3635_v47  ;;  %v3658_v2 = vshll.u32 %v5813_v11, %v3635_v47  ;;  %v3663_v15 = vsub.s32 32, %v3637_v48 }
  0xc2   : > { %v1357_v40 = vadd.s32 1, %v3184_v32  ;;  %v1512_v41 = vadd.s32 1, %v3187_v33  ;;  %v3667_v31 = vshll.u32 %v1355_v49, 8 }
  0xc4   : > { %vm1358_vm8 = vcmp.gt.s32.totalorder %v1357_v40, 0  ;;  %vm1513_vm9 = vcmp.gt.s32.totalorder %v1512_v41, 0 }
  0xc5   : > { %v1359_v52 = vsel %vm1358_vm8, %v1357_v40, 0  ;;  %v1514_v53 = vsel %vm1513_vm9, %v1512_v41, 0  ;;  %vm1072_vm8 = vcmp.lt.s32.totalorder %v3643_v54, 4 }
  0xc6   : > { %v3645_v56 = vshrl.u32 %v1359_v52, 5  ;;  %v1361_v57 = vand.u32 31, %v1359_v52  ;;  %v3647_v62 = vand.u32 31, %v1514_v53  ;;  %v3665_v28 = vshrl.u32 %v1514_v53, 5 }
  0xc7   : > { %v5807_v53 = vmov 683565275  }
  0xc8   : > { %v1362_v16 = vsub.s32 32, %v1361_v57  ;;  %v1373_v32 = vshll.u32 %v5797_v9, %v1361_v57  ;;  %v1376_v33 = vshll.u32 %v5813_v11, %v1361_v57  ;;  %v3672_v34 = vsub.s32 32, %v3647_v62 }
  0xc9   : > { %vm1382_vm10 = vcmp.lt.s32.totalorder %v3645_v56, 4  ;;  %v1528_v41 = vshll.u32 %v5797_v9, %v3647_v62  ;;  %v1364_v51 = vshll.u32 %v5807_v53, %v1361_v57  ;;  %v1367_v19 = vshll.u32 %v5809_v17, %v1361_v57 }
  0xca   : > { %v1374_v36 = vshrl.u32 %v5813_v11, %v1362_v16  ;;  %v1377_v40 = vshrl.u32 %v5803_v21, %v1362_v16  ;;  %v1529_v49 = vshrl.u32 %v5813_v11, %v3672_v34  ;;  %v1532_v52 = vshrl.u32 %v5803_v21, %v3672_v34 }
  0xcb   : > { %v1365_v1 = vshrl.u32 %v5809_v17, %v1362_v16  ;;  %v1368_v23 = vshrl.u32 %v5811_v6, %v1362_v16  ;;  %v1531_v9 = vshll.u32 %v5813_v11, %v3647_v62  ;;  %v1370_v55 = vshll.u32 %v5811_v6, %v1361_v57 }
  0xcc   : > { %v1375_v37 = vor.u32 %v1374_v36, %v1373_v32  ;;  %v1378_v58 = vor.u32 %v1377_v40, %v1376_v33  ;;  %v5880_v21 = vmov 2102212464   ;;  %v5881_v33 = vmov 683565275  }
  0xcd   : > { %v1366_v3 = vor.u32 %v1365_v1, %v1364_v51  ;;  %v1371_v18 = vshrl.u32 %v5880_v21, %v1362_v16  ;;  %v1363_v36 = vshrl.u32 %v5881_v33, %v1362_v16  ;;  %v1369_v40 = vor.u32 %v1368_v23, %v1367_v19 }
  0xce   : > { %v1388_v53 = vsel %vm1382_vm10, %v1375_v37, 920167782  ;;  %v1392_v32 = vsel %vm1382_vm10, %v1378_v58, 1326507024  ;;  %v3697_v17 = vor.u32 %v1529_v49, %v1528_v41  ;;  %v1533_v24 = vor.u32 %v1532_v52, %v1531_v9 }
  0xcf   : > { %v1372_v13 = vor.u32 %v1371_v18, %v1370_v55  ;;  %vm1379_vm11 = vcmp.lt.s32.totalorder %v3645_v56, 1  ;;  %vm1380_vm12 = vcmp.lt.s32.totalorder %v3645_v56, 2  ;;  %vm1381_vm13 = vcmp.lt.s32.totalorder %v3645_v56, 3 }
  0xd0   : > { %v1383_v1 = vsel %vm1379_vm11, %v1363_v36, %v1366_v3  ;;  %v1387_v51 = vsel %vm1379_vm11, %v1366_v3, %v1369_v40  ;;  %v1393_v11 = vsel %vm1381_vm13, %v1375_v37, %v1392_v32  ;;  %v1396_v55 = vand.u32 65535, %v3667_v31 }
  0xd1   : > { %v1384_v57 = vsel %vm1382_vm10, %v1372_v13, 2102212464  ;;  %v1389_v6 = vsel %vm1381_vm13, %v1372_v13, %v1388_v53  ;;  %v1391_v58 = vsel %vm1379_vm11, %v1369_v40, %v1372_v13  ;;  %v1397_v9 = vshrl.u32 %v3667_v31, 16 }
  0xd2   : > { %v1385_v16 = vsel %vm1381_vm13, %v1369_v40, %v1384_v57  ;;  %v1390_v19 = vsel %vm1380_vm12, %v1387_v51, %v1389_v6  ;;  %v1394_v18 = vsel %vm1380_vm12, %v1391_v58, %v1393_v11  ;;  %v3712_v49 = vshll.u32 %v5880_v21, %v3637_v48 }
  0xd3   : > { %v1398_v23 = vand.u32 65535, %v1394_v18  ;;  %v1399_v41 = vshrl.u32 %v1394_v18, 16  ;;  %v1420_v3 = vand.u32 65535, %v1390_v19  ;;  %v5882_v13 = vmov 920167782  }
  0xd4   : > { %v3716_v37 = vshll.u32 %v5882_v13, %v3637_v48  ;;  %vm1537_vm14 = vcmp.lt.s32.totalorder %v3665_v28, 4  ;;  %v1421_v6 = vshrl.u32 %v1390_v19, 16  ;;  %v3726_v36 = vsel %vm1380_vm12, %v1383_v1, %v1385_v16 }
  0xd5   : > { %v1543_v11 = vsel %vm1537_vm14, %v3697_v17, 920167782  ;;  %v1547_v52 = vsel %vm1537_vm14, %v1533_v24, 1326507024  ;;  %v1401_v53 = vmul.u32 %v1399_v41, %v1396_v55  ;;  %v1402_v32 = vmul.u32 %v1398_v23, %v1397_v9 }
  0xd6   : > { %v1423_v40 = vmul.u32 %v1421_v6, %v1396_v55  ;;  %v1424_v51 = vmul.u32 %v1420_v3, %v1397_v9  ;;  %v5883_v57 = vand.u32 2147483647, %v3548_v60  ;;  %v1400_v18 = vmul.u32 %v1398_v23, %v1396_v55 }
  0xd7   : > { %v1403_v19 = vmul.u32 %v1399_v41, %v1397_v9  ;;  %v1404_v22 = vshll.u32 %v1401_v53, 16  ;;  %v1422_v12 = vmul.u32 %v1420_v3, %v1396_v55  ;;  %v1405_v5 = vshrl.u32 %v1401_v53, 16 }
  0xd8   : > { %v1509_v58 = vand.u32 8388607, %v5883_v57  ;;  %v1406_v20 = vshll.u32 %v1402_v32, 16  ;;  %v1425_v10 = vmul.u32 %v1421_v6, %v1397_v9  ;;  %v1426_v29 = vshll.u32 %v1423_v40, 16 }
  0xd9   : > { %vm1408_vm15 = vc.u32 %v1400_v18, %v1404_v22  ;;  %v1410_v24 = vadd.s32 %v1404_v22, %v1400_v18  ;;  %v1427_v8 = vshrl.u32 %v1423_v40, 16  ;;  %v1428_v27 = vshll.u32 %v1424_v51, 16 }
  0xda   : > { %v5884_v56 = vmov 0   ;;  %vm1430_vm0 = vc.u32 %v1422_v12, %v1426_v29  ;;  %v1432_v16 = vadd.s32 %v1426_v29, %v1422_v12  ;;  %v1519_v38 = vshll.u32 %v5881_v33, %v3647_v62 }
  0xdb   : > { %v1409_v1 = vsel %vm1408_vm15, 1, %v5884_v56  ;;  %vm1412_vm1 = vc.u32 %v1410_v24, %v1406_v20  ;;  %v1431_v23 = vsel %vm1430_vm0, 1, %v5884_v56  ;;  %v5885_v55 = vmov 2475754826  }
  0xdc   : > { %v1411_v57 = vadd.s32 %v1409_v1, %v1403_v19  ;;  %v1520_v41 = vshrl.u32 %v5885_v55, %v3672_v34  ;;  %v1413_v9 = vsel %vm1412_vm1, 1, %v5884_v56  ;;  %v1433_v3 = vadd.s32 %v1431_v23, %v1425_v10 }
  0xdd   : > { %vm1434_vm2 = vc.u32 %v1432_v16, %v1428_v27  ;;  %v1510_v22 = vor.u32 8388608, %v1509_v58  ;;  %v1522_v12 = vshll.u32 %v5885_v55, %v3647_v62  ;;  %v5886_v20 = vmov 2131351028  }
  0xde   : > { %v1415_v6 = vadd.s32 %v1413_v9, %v1411_v57  ;;  %v1435_v53 = vsel %vm1434_vm2, 1, %v5884_v56  ;;  %v3738_v40 = vor.u32 %v1520_v41, %v1519_v38  ;;  %v1523_v18 = vshrl.u32 %v5886_v20, %v3672_v34 }
  0xdf   : > { %v1437_v29 = vadd.s32 %v1435_v53, %v1433_v3  ;;  %v1525_v19 = vshll.u32 %v5886_v20, %v3647_v62  ;;  %v1526_v10 = vshrl.u32 %v5880_v21, %v3672_v34  ;;  %v1407_v24 = vshrl.u32 %v1402_v32, 16 }
  0xe0   : > { %v1416_v58 = vadd.s32 %v1415_v6, %v1405_v5  ;;  %v1429_v1 = vshrl.u32 %v1424_v51, 16  ;;  %v3748_v57 = vadd.s32 %v1432_v16, %v1428_v27  ;;  %v1524_v23 = vor.u32 %v1523_v18, %v1522_v12 }
  0xe1   : > { %v1438_v38 = vadd.s32 %v1437_v29, %v1427_v8  ;;  %v1527_v41 = vor.u32 %v1526_v10, %v1525_v19  ;;  %vm1534_vm3 = vcmp.lt.s32.totalorder %v3665_v28, 1  ;;  %vm1535_vm4 = vcmp.lt.s32.totalorder %v3665_v28, 2 }
  0xe2   : > { %v3751_v9 = vadd.s32 %v1416_v58, %v1407_v24  ;;  %vm1536_vm5 = vcmp.lt.s32.totalorder %v3665_v28, 3  ;;  %v3755_v62 = vshll.u32 %v1510_v22, 8  ;;  %v1542_v5 = vsel %vm1534_vm3, %v3738_v40, %v1524_v23 }
  0xe3   : > { %v1439_v3 = vadd.s32 %v1438_v38, %v1429_v1  ;;  %v1544_v27 = vsel %vm1536_vm5, %v1527_v41, %v1543_v11  ;;  %v1548_v8 = vsel %vm1536_vm5, %v3697_v17, %v1547_v52  ;;  %v1064_v32 = vshrl.u32 %v5882_v13, %v3650_v63 }
  0xe4   : > { %v5887_v51 = vmov 1326507024   ;;  %vm1442_vm6 = vc.u32 %v3751_v9, %v3748_v57  ;;  %v1545_v22 = vsel %vm1535_vm4, %v1542_v5, %v1544_v27  ;;  %v1440_v11 = vmul.u32 %v3667_v31, %v3726_v36 }
  0xe5   : > { %v3769_v16 = vshrl.u32 %v5887_v51, %v3650_v63  ;;  %v1443_v6 = vadd.s32 1, %v1439_v3  ;;  %v1546_v17 = vsel %vm1534_vm3, %v1524_v23, %v1527_v41  ;;  %v1551_v52 = vand.u32 65535, %v3755_v62 }
  0xe6   : > { %v1549_v53 = vsel %vm1535_vm4, %v1546_v17, %v1548_v8  ;;  %v1552_v12 = vshrl.u32 %v3755_v62, 16  ;;  %v1575_v29 = vand.u32 65535, %v1545_v22  ;;  %v1576_v18 = vshrl.u32 %v1545_v22, 16 }
  0xe7   : > { %v3785_v19 = vshrl.u32 %v5882_v13, %v3663_v15  ;;  %v1444_v10 = vsel %vm1442_vm6, %v1443_v6, %v1439_v3  ;;  %v1553_v24 = vand.u32 65535, %v1549_v53  ;;  %v1554_v31 = vshrl.u32 %v1549_v53, 16 }
  0xe8   : > { %v3789_v36 = vshrl.u32 %v5887_v51, %v3663_v15  ;;  %v1445_v58 = vadd.s32 %v1444_v10, %v1440_v11  ;;  %v1578_v1 = vmul.u32 %v1576_v18, %v1551_v52  ;;  %v1579_v38 = vmul.u32 %v1575_v29, %v1552_v12 }
  0xe9   : > { %v3792_v5 = vor.u32 %v1064_v32, %v3654_v0  ;;  %v1518_v27 = vshrl.u32 %v5881_v33, %v3672_v34  ;;  %v1556_v8 = vmul.u32 %v1554_v31, %v1551_v52  ;;  %v1557_v22 = vmul.u32 %v1553_v24, %v1552_v12 }
  0xea   : > { %v1446_v17 = vadd.s32 536870912, %v1445_v58  ;;  %v1539_v3 = vsel %vm1537_vm14, %v1527_v41, 2102212464  ;;  %v1577_v6 = vmul.u32 %v1575_v29, %v1551_v52  ;;  %v1581_v53 = vshll.u32 %v1578_v1, 16 }
  0xeb   : > { %v1555_v13 = vmul.u32 %v1553_v24, %v1551_v52  ;;  %v1558_v51 = vmul.u32 %v1554_v31, %v1552_v12  ;;  %v1559_v7 = vshll.u32 %v1556_v8, 16  ;;  %v1580_v11 = vmul.u32 %v1576_v18, %v1552_v12 }
  0xec   : > { %v3798_v10 = vshrl.u32 %v1446_v17, 30  ;;  %v1561_v46 = vshll.u32 %v1557_v22, 16  ;;  %v1583_v0 = vshll.u32 %v1579_v38, 16  ;;  %vm1585_vm7 = vc.u32 %v1577_v6, %v1581_v53 }
  0xed   : > { %vm1563_vm9 = vc.u32 %v1555_v13, %v1559_v7  ;;  %v1565_v34 = vadd.s32 %v1559_v7, %v1555_v13  ;;  %v1586_v32 = vsel %vm1585_vm7, 1, %v5884_v56  ;;  %v1587_v45 = vadd.s32 %v1581_v53, %v1577_v6 }
  0xee   : > { %v1448_v41 = vshll.u32 %v3798_v10, 30  ;;  %v1538_v52 = vsel %vm1534_vm3, %v1518_v27, %v3738_v40  ;;  %v1564_v12 = vsel %vm1563_vm9, 1, %v5884_v56  ;;  %v1588_v29 = vadd.s32 %v1586_v32, %v1580_v11 }
  0xef   : > { %v1540_v18 = vsel %vm1536_vm5, %v1524_v23, %v1539_v3  ;;  %v1566_v24 = vadd.s32 %v1564_v12, %v1558_v51  ;;  %vm1567_vm10 = vc.u32 %v1565_v34, %v1561_v46  ;;  %vm1589_vm11 = vc.u32 %v1587_v45, %v1583_v0 }
  0xf0   : > { %v1068_v7 = vor.u32 %v3769_v16, %v3658_v2  ;;  %v1449_v13 = vsub.s32 %v1445_v58, %v1448_v41  ;;  %v1568_v31 = vsel %vm1567_vm10, 1, %v5884_v56  ;;  %v1590_v17 = vsel %vm1589_vm11, 1, %v5884_v56 }
  0xf1   : > { %v1560_v6 = vshrl.u32 %v1556_v8, 16  ;;  %v1570_v53 = vadd.s32 %v1568_v31, %v1566_v24  ;;  %v1582_v40 = vshrl.u32 %v1578_v1, 16  ;;  %v1592_v27 = vadd.s32 %v1590_v17, %v1588_v29 }
  0xf2   : > { %vm1349_vm12 = vcmp.lt.s32.totalorder %v3546_v59, 0  ;;  %vm1450_vm13 = vcmp.lt.s32.totalorder %v1449_v13, 0  ;;  %v1451_v11 = vsub.s32 0, %v1449_v13  ;;  %v1541_v46 = vsel %vm1535_vm4, %v1538_v52, %v1540_v18 }
  0xf3   : > { %v1037_v23 = vand.u32 2147483647, %v3536_v42  ;;  %v1562_v51 = vshrl.u32 %v1557_v22, 16  ;;  %v1571_v2 = vadd.s32 %v1570_v53, %v1560_v6  ;;  %v1584_v16 = vshrl.u32 %v1579_v38, 16 }
  0xf4   : > { %v1593_v58 = vadd.s32 %v1592_v27, %v1582_v40  ;;  %v1223_v3 = vor.u32 %v3789_v36, %v3716_v37  ;;  %v1452_v8 = vsel %vm1450_vm13, %v1451_v11, %v1449_v13  ;;  %v3819_v34 = vadd.s32 %v1587_v45, %v1583_v0 }
  0xf5   : > { %v1054_v1 = vshll.u32 %v5881_v33, %v3635_v47  ;;  %v5888_v32 = vand.u32 2147483647, %v3546_v59  ;;  %v1453_v41 = vclz %v1452_v8  ;;  %v3829_v22 = vadd.s32 %v1571_v2, %v1562_v51 }
  0xf6   : > { %v1594_v38 = vadd.s32 %v1593_v58, %v1584_v16  ;;  %v1055_v52 = vshrl.u32 %v5885_v55, %v3650_v63  ;;  %v1078_v45 = vsel %vm1072_vm8, %v3792_v5, 920167782  ;;  %v1082_v37 = vsel %vm1072_vm8, %v1068_v7, 1326507024 }
  0xf7   : > { %vm3825_vm14 = vcmp.le.f32.partialorder %v5888_v32, 0.7853982  ;;  %v1471_v36 = vsub.s32 4, %v3798_v10  ;;  %v1595_v0 = vmul.u32 %v3755_v62, %v1541_v46  ;;  %v3185_v12 = vadd.s32 4294967294, %v1453_v41 }
  0xf8   : > { %vm1597_vm15 = vc.u32 %v3829_v22, %v3819_v34  ;;  %v1598_v29 = vadd.s32 1, %v1594_v38  ;;  %v1044_v18 = vand.u32 8388607, %v1037_v23  ;;  %v1057_v24 = vshll.u32 %v5885_v55, %v3635_v47 }
  0xf9   : > { %v1058_v31 = vshrl.u32 %v5886_v20, %v3650_v63  ;;  %v1060_v7 = vshll.u32 %v5886_v20, %v3635_v47  ;;  %v1061_v62 = vshrl.u32 %v5880_v21, %v3650_v63  ;;  %v1441_v17 = vadd.s32 %v3748_v57, %v3751_v9 }
  0xfa   : > { %vm3186_vm0 = vcmp.lt.s32.totalorder %v3185_v12, 0  ;;  %v1599_v6 = vsel %vm1597_vm15, %v1598_v29, %v1594_v38  ;;  %v1056_v53 = vor.u32 %v1055_v52, %v1054_v1  ;;  %v1472_v16 = vsel %vm1349_vm12, %v1471_v36, %v3798_v10 }
  0xfb   : > { %v1456_v40 = vsel %vm3186_vm0, 0, %v3185_v12  ;;  %v1600_v27 = vadd.s32 %v1599_v6, %v1595_v0  ;;  %v1059_v11 = vor.u32 %v1058_v31, %v1057_v24  ;;  %v1062_v46 = vor.u32 %v1061_v62, %v1060_v7 }
  0xfc   : > { %v1457_v51 = vsub.s32 32, %v1456_v40  ;;  %v1461_v2 = vsub.s32 4294967266, %v1456_v40  ;;  %v1045_v47 = vor.u32 8388608, %v1044_v18  ;;  %v1458_v58 = vshll.u32 %v1449_v13, %v1456_v40 }
  0xfd   : > { %v1601_v8 = vadd.s32 536870912, %v1600_v27  ;;  %vm1069_vm1 = vcmp.lt.s32.totalorder %v3643_v54, 1  ;;  %vm1071_vm2 = vcmp.lt.s32.totalorder %v3643_v54, 3  ;;  %v1474_v41 = vsel %vm3825_vm14, 0, %v1472_v16 }
  0xfe   : > { %v1459_v57 = vshrl.u32 %v1441_v17, %v1457_v51  ;;  %v1462_v9 = vadd.s32 127, %v1461_v2  ;;  %v1077_v1 = vsel %vm1069_vm1, %v1056_v53, %v1059_v11  ;;  %v1079_v32 = vsel %vm1071_vm2, %v1062_v46, %v1078_v45 }
  0xff   : > { %v3865_v38 = vshrl.u32 %v1601_v8, 30  ;;  %vm1070_vm3 = vcmp.lt.s32.totalorder %v3643_v54, 2  ;;  %v1081_v10 = vsel %vm1069_vm1, %v1059_v11, %v1062_v46  ;;  %v1083_v36 = vsel %vm1071_vm2, %v3792_v5, %v1082_v37 }
 0x100   : > { %v1460_v13 = vor.u32 %v1459_v57, %v1458_v58  ;;  %v1463_v52 = vshll.u32 %v1462_v9, 23  ;;  %v3873_v0 = vshll.u32 %v1045_v47, 8  ;;  %vm1227_vm4 = vcmp.lt.s32.totalorder %v3660_v4, 4 }
 0x101   : > { %v1603_v45 = vshll.u32 %v3865_v38, 30  ;;  %v1080_v12 = vsel %vm1070_vm3, %v1077_v1, %v1079_v32  ;;  %v1084_v29 = vsel %vm1070_vm3, %v1081_v10, %v1083_v36  ;;  %v3883_v18 = vor.u32 %v3785_v19, %v3712_v49 }
 0x102   : > { %v3887_v24 = vsel %vm1227_vm4, %v1223_v3, 1326507024  ;;  %v1464_v5 = vor.u32 4788187, %v1463_v52  ;;  %v1491_v37 = vadd.s32 3, %v1474_v41  ;;  %v1053_v7 = vshrl.u32 %v5881_v33, %v3650_v63 }
 0x103   : > { %v3889_v31 = vsub.s32 %v1600_v27, %v1603_v45  ;;  %v1088_v62 = vand.u32 65535, %v1084_v29  ;;  %v1089_v17 = vshrl.u32 %v1084_v29, 16  ;;  %v1467_v40 = vcvt.s32.f32 %v1460_v13 }
 0x104   : > { %v1465_v6 = vand.u32 2147483647, %v1464_v5  ;;  %v1086_v51 = vand.u32 65535, %v3873_v0  ;;  %v1111_v2 = vshrl.u32 %v1080_v12, 16  ;;  %v1087_v19 = vshrl.u32 %v3873_v0, 16 }
 0x105   : > { %vm1605_vm5 = vcmp.lt.s32.totalorder %v3889_v31, 0  ;;  %v1606_v49 = vsub.s32 0, %v3889_v31  ;;  %v1110_v3 = vand.u32 65535, %v1080_v12  ;;  %v3897_v27 = vand.u32 3, %v1491_v37 }
 0x106   : > { %v1468_v16 = vmul.f32 %v1467_v40, %v1465_v6  ;;  %v1074_v63 = vsel %vm1072_vm8, %v1062_v46, 2102212464  ;;  %v1091_v47 = vmul.u32 %v1089_v17, %v1086_v51  ;;  %v1596_v58 = vadd.s32 %v3819_v34, %v3829_v22 }
 0x107   : > { %v1607_v8 = vsel %vm1605_vm5, %v1606_v49, %v3889_v31  ;;  %v1090_v57 = vmul.u32 %v1088_v62, %v1086_v51  ;;  %v3904_v9 = vmul.u32 %v1088_v62, %v1087_v19  ;;  %v3906_v10 = vmul.u32 %v1111_v2, %v1086_v51 }
 0x108   : > { %v1469_v1 = vxor.u32 2147483648, %v1468_v16  ;;  %v1608_v32 = vclz %v1607_v8  ;;  %v1094_v41 = vshll.u32 %v1091_v47, 16  ;;  %vm1504_vm6 = vcmp.lt.s32.totalorder %v3548_v60, 0 }
 0x109   : > { %v1626_v13 = vsub.s32 4, %v3865_v38  ;;  %v1073_v46 = vsel %vm1069_vm1, %v1053_v7, %v1056_v53  ;;  %v1075_v34 = vsel %vm1071_vm2, %v1059_v11, %v1074_v63  ;;  %v1112_v22 = vmul.u32 %v1110_v3, %v1086_v51 }
 0x10a   : > { %v1470_v52 = vsel %vm1349_vm12, %v1469_v1, %v1468_v16  ;;  %v3188_v36 = vadd.s32 4294967294, %v1608_v32  ;;  %v1093_v45 = vmul.u32 %v1089_v17, %v1087_v19  ;;  %vm1098_vm7 = vc.u32 %v1090_v57, %v1094_v41 }
 0x10b   : > { %v3919_v12 = vsel %vm3825_vm14, %v3546_v59, %v1470_v52  ;;  %v1096_v29 = vshll.u32 %v3904_v9, 16  ;;  %v1099_v5 = vsel %vm1098_vm7, 1, %v5884_v56  ;;  %v1100_v53 = vadd.s32 %v1094_v41, %v1090_v57 }
 0x10c   : > { %v1475_v11 = vmul.f32 %v3919_v12, %v3919_v12  ;;  %vm3189_vm8 = vcmp.lt.s32.totalorder %v3188_v36, 0  ;;  %v1101_v37 = vadd.s32 %v1099_v5, %v1093_v45  ;;  %v1116_v7 = vshll.u32 %v3906_v10, 16 }
 0x10d   : > { %v1611_v62 = vsel %vm3189_vm8, 0, %v3188_v36  ;;  %v1095_v17 = vshrl.u32 %v1091_v47, 16  ;;  %vm1102_vm9 = vc.u32 %v1100_v53, %v1096_v29  ;;  %v1114_v6 = vmul.u32 %v1110_v3, %v1087_v19 }
 0x10e   : > { %v1476_v40 = vmul.f32 -0.001358992, %v1475_v11  ;;  %v1483_v28 = vmul.f32 -0.00019511016, %v1475_v11  ;;  %v1612_v51 = vsub.s32 32, %v1611_v62  ;;  %v1115_v49 = vmul.u32 %v1111_v2, %v1087_v19 }
 0x10f   : > { %v1613_v16 = vshll.u32 %v3889_v31, %v1611_v62  ;;  %v1616_v63 = vsub.s32 4294967266, %v1611_v62  ;;  %v1103_v8 = vsel %vm1102_vm9, 1, %v5884_v56  ;;  %vm1120_vm10 = vc.u32 %v1112_v22, %v1116_v7 }
 0x110   : > { %v1477_v57 = vadd.f32 0.041655596, %v1476_v40  ;;  %v1484_v1 = vadd.f32 0.008332121, %v1483_v28  ;;  %v1614_v32 = vshrl.u32 %v1596_v58, %v1612_v51  ;;  %v1105_v41 = vadd.s32 %v1103_v8, %v1101_v37 }
 0x111   : > { %v1617_v52 = vadd.s32 127, %v1616_v63  ;;  %v1118_v45 = vshll.u32 %v1114_v6, 16  ;;  %v1121_v47 = vsel %vm1120_vm10, 1, %v5884_v56  ;;  %v1122_v36 = vadd.s32 %v1116_v7, %v1112_v22 }
 0x112   : > { %v1478_v3 = vmul.f32 %v1477_v57, %v1475_v11  ;;  %v1485_v29 = vmul.f32 %v1484_v1, %v1475_v11  ;;  %v1615_v5 = vor.u32 %v1614_v32, %v1613_v16  ;;  %v1627_v31 = vsel %vm1504_vm6, %v1626_v13, %v3865_v38 }
 0x113   : > { %v1618_v2 = vshll.u32 %v1617_v52, 23  ;;  %v1106_v19 = vadd.s32 %v1105_v41, %v1095_v17  ;;  %v1123_v53 = vadd.s32 %v1121_v47, %v1115_v49  ;;  %vm1124_vm11 = vc.u32 %v1122_v36, %v1118_v45 }
 0x114   : > { %v1479_v62 = vadd.f32 -0.4999988, %v1478_v3  ;;  %v1486_v40 = vadd.f32 -0.16666654, %v1485_v29  ;;  %v5891_v58 = vand.u32 2147483647, %v3548_v60  ;;  %v1076_v22 = vsel %vm1070_vm3, %v1073_v46, %v1075_v34 }
 0x115   : > { %v1619_v7 = vor.u32 4788187, %v1618_v2  ;;  %v1097_v38 = vshrl.u32 %v3904_v9, 16  ;;  %v1125_v13 = vsel %vm1124_vm11, 1, %v5884_v56  ;;  %vm1493_vm13 = vcmp.lt.s32.totalorder %v3897_v27, 2 }
 0x116   : > { %vm3934_vm12 = vcmp.le.f32.partialorder %v5891_v58, 0.7853982  ;;  %v1480_v17 = vmul.f32 %v1479_v62, %v1475_v11  ;;  %v1487_v51 = vmul.f32 %v1486_v40, %v1475_v11  ;;  %v1117_v49 = vshrl.u32 %v3906_v10, 16 }
 0x117   : > { %v1629_v28 = vsel %vm3934_vm12, 0, %v1627_v31  ;;  %v1127_v16 = vadd.s32 %v1125_v13, %v1123_v53  ;;  %vm1490_vm14 = vweird.f32 %v3546_v59  ;;  %v1620_v63 = vand.u32 2147483647, %v1619_v7 }
 0x118   : > { %v1622_v54 = vcvt.s32.f32 %v1615_v5  ;;  %v3947_v46 = vadd.s32 %v1106_v19, %v1097_v38  ;;  %v1119_v34 = vshrl.u32 %v1114_v6, 16  ;;  %v1481_v8 = vadd.f32 1.0, %v1480_v17 }
 0x119   : > { %v1488_v57 = vadd.f32 1.0, %v1487_v51  ;;  %v1128_v1 = vadd.s32 %v1127_v16, %v1117_v49  ;;  %v1192_v9 = vand.u32 2147483647, %v3538_v43  ;;  %vm762_vm15 = vcmp.lt.s32.totalorder %v3598_v25, 4 }
 0x11a   : > { %vm1494_vm0 = vcmp.eq.s32.totalorder %v3897_v27, 0  ;;  %vm1497_vm1 = vcmp.eq.s32.totalorder %v3897_v27, 2  ;;  %v1623_v10 = vmul.f32 %v1622_v54, %v1620_v63  ;;  %v3953_v11 = vadd.s32 %v1122_v36, %v1118_v45 }
 0x11b   : > { %v1489_v32 = vmul.f32 %v1488_v57, %v3919_v12  ;;  %v1498_v41 = vxor.u32 2147483648, %v1481_v8  ;;  %v1646_v52 = vadd.s32 3, %v1629_v28  ;;  %v1129_v47 = vadd.s32 %v1128_v1, %v1119_v34 }
 0x11c   : > { %v1624_v6 = vxor.u32 2147483648, %v1623_v10  ;;  %v1130_v3 = vmul.u32 %v3873_v0, %v1076_v22  ;;  %vm1132_vm2 = vc.u32 %v3947_v46, %v3953_v11  ;;  %v1213_v29 = vshrl.u32 %v5886_v20, %v3663_v15 }
 0x11d   : > { %v1495_v5 = vxor.u32 2147483648, %v1489_v32  ;;  %v1133_v31 = vadd.s32 1, %v1129_v47  ;;  %v1199_v45 = vand.u32 8388607, %v1192_v9  ;;  %v1212_v12 = vshll.u32 %v5885_v55, %v3637_v48 }
 0x11e   : > { %v1499_v36 = vsel %vm1497_vm1, %v1498_v41, %v1489_v32  ;;  %v1625_v2 = vsel %vm1504_vm6, %v1624_v6, %v1623_v10  ;;  %v1215_v0 = vshll.u32 %v5886_v20, %v3637_v48  ;;  %v1216_v19 = vshrl.u32 %v5880_v21, %v3663_v15 }
 0x11f   : > { %v1496_v53 = vsel %vm1494_vm0, %v1481_v8, %v1495_v5  ;;  %v3976_v62 = vsel %vm3934_vm12, %v3548_v60, %v1625_v2  ;;  %v1134_v40 = vsel %vm1132_vm2, %v1133_v31, %v1129_v47  ;;  %v3978_v58 = vor.u32 %v1213_v29, %v1212_v12 }
 0x120   : > { %v1500_v22 = vsel %vm1493_vm13, %v1496_v53, %v1499_v36  ;;  %v1630_v7 = vmul.f32 %v3976_v62, %v3976_v62  ;;  %v1135_v28 = vadd.s32 %v1134_v40, %v1130_v3  ;;  %v1217_v38 = vor.u32 %v1216_v19, %v1215_v0 }
 0x121   : > { %v1501_v13 = vsel %vm1490_vm14, nan, %v1500_v22  ;;  %v1200_v17 = vor.u32 8388608, %v1199_v45  ;;  %v1210_v37 = vshrl.u32 %v5885_v55, %v3663_v15  ;;  %vm1224_vm3 = vcmp.lt.s32.totalorder %v3660_v4, 1 }
 0x122   : > { %1710 = vmatpush.msra.mxu2 %v1501_v13  ;;  %v1631_v51 = vmul.f32 -0.001358992, %v1630_v7  ;;  %v1638_v49 = vmul.f32 -0.00019511016, %v1630_v7  ;;  %v1136_v16 = vadd.s32 536870912, %v1135_v28  ;;  %vm1226_vm5 = vcmp.lt.s32.totalorder %v3660_v4, 3 }
 0x123   : > { %v3993_v27 = vsel %vm762_vm15, %v3639_v50, 920167782  ;;  %v1209_v59 = vshll.u32 %v5881_v33, %v3637_v48  ;;  %v1236_v63 = vsel %vm1224_vm3, %v3978_v58, %v1217_v38  ;;  %v1238_v54 = vsel %vm1226_vm5, %v3883_v18, %v3887_v24 }
 0x124   : > { %v1632_v34 = vadd.f32 0.041655596, %v1631_v51  ;;  %v1639_v8 = vadd.f32 0.008332121, %v1638_v49  ;;  %v4004_v57 = vshrl.u32 %v1136_v16, 30  ;;  %vm1225_vm6 = vcmp.lt.s32.totalorder %v3660_v4, 2 }
 0x125   : > { %v1647_v1 = vand.u32 3, %v1646_v52  ;;  %v1211_v10 = vor.u32 %v1210_v37, %v1209_v59  ;;  %v1239_v48 = vsel %vm1225_vm6, %v1236_v63, %v1238_v54  ;;  %v4009_v32 = vshll.u32 %v1200_v17, 8 }
 0x126   : > { %v1233_v41 = vsel %vm1227_vm4, %v3883_v18, 920167782  ;;  %v1633_v47 = vmul.f32 %v1632_v34, %v1630_v7  ;;  %v1640_v6 = vmul.f32 %v1639_v8, %v1630_v7  ;;  %v1138_v24 = vshll.u32 %v4004_v57, 30 }
 0x127   : > { %v4016_v3 = vand.u32 65535, %v4009_v32  ;;  %v4019_v29 = vshrl.u32 %v4009_v32, 16  ;;  %v1243_v52 = vand.u32 65535, %v1239_v48  ;;  %v1244_v5 = vshrl.u32 %v1239_v48, 16 }
 0x128   : > { %v5894_v31 = vor.u32 %v3613_v35, %v3607_v30  ;;  %v1634_v18 = vadd.f32 -0.4999988, %v1633_v47  ;;  %v1641_v12 = vadd.f32 -0.16666654, %v1640_v6  ;;  %v4028_v36 = vsub.s32 %v1135_v28, %v1138_v24  ;;  %v5897_v6 = vld [vmem:[#allocation24_spill] sm:$0xff] }
 0x129   : > { %vm1649_vm7 = vcmp.eq.s32.totalorder %v1647_v1, 0  ;;  %v1232_v2 = vsel %vm1224_vm3, %v1211_v10, %v3978_v58  ;;  %v1234_v0 = vsel %vm1226_vm5, %v1217_v38, %v1233_v41  ;;  %v1246_v19 = vmul.u32 %v1244_v5, %v4016_v3 }
 0x12a   : > { %v4026_v45 = vsel %vm762_vm15, %v5894_v31, 1326507024  ;;  %v4037_v30 = vmul.u32 %v1243_v52, %v4019_v29  ;;  %v1635_v35 = vmul.f32 %v1634_v18, %v1630_v7  ;;  %v1642_v53 = vmul.f32 %v1641_v12, %v1630_v7 }
 0x12b   : > { %vm1648_vm8 = vcmp.lt.s32.totalorder %v1647_v1, 2  ;;  %vm1140_vm9 = vcmp.lt.s32.totalorder %v4028_v36, 0  ;;  %v1141_v40 = vsub.s32 0, %v4028_v36  ;;  %vm1645_vm10 = vweird.f32 %v3548_v60 }
 0x12c   : > { %v1208_v22 = vshrl.u32 %v5881_v33, %v3663_v15  ;;  %v1229_v28 = vsel %vm1227_vm4, %v1217_v38, 2102212464  ;;  %v1245_v13 = vmul.u32 %v1243_v52, %v4016_v3  ;;  %v1249_v17 = vshll.u32 %v1246_v19, 16 }
 0x12d   : > { %v1636_v37 = vadd.f32 1.0, %v1635_v35  ;;  %v1643_v51 = vadd.f32 1.0, %v1642_v53  ;;  %v1142_v7 = vsel %vm1140_vm9, %v1141_v40, %v4028_v36  ;;  %v1235_v49 = vsel %vm1225_vm6, %v1232_v2, %v1234_v0 }
 0x12e   : > { %v1143_v16 = vclz %v1142_v7  ;;  %v1248_v59 = vmul.u32 %v1244_v5, %v4019_v29  ;;  %v1251_v63 = vshll.u32 %v4037_v30, 16  ;;  %vm1253_vm11 = vc.u32 %v1245_v13, %v1249_v17 }
 0x12f   : > { %v1644_v15 = vmul.f32 %v1643_v51, %v3976_v62  ;;  %v1653_v54 = vxor.u32 2147483648, %v1636_v37  ;;  %v1254_v38 = vsel %vm1253_vm11, 1, %v5884_v56  ;;  %v1255_v34 = vadd.s32 %v1249_v17, %v1245_v13 }
 0x130   : > { %vm1652_vm4 = vcmp.eq.s32.totalorder %v1647_v1, 2  ;;  %v1131_v8 = vadd.s32 %v3953_v11, %v3947_v46  ;;  %v3179_v48 = vadd.s32 4294967294, %v1143_v16  ;;  %v1228_v41 = vsel %vm1224_vm3, %v1208_v22, %v1211_v10 }
 0x131   : > { %v1650_v47 = vxor.u32 2147483648, %v1644_v15  ;;  %vm4060_vm12 = vcmp.le.f32.partialorder %v1037_v23, 0.7853982  ;;  %v1256_v62 = vadd.s32 %v1254_v38, %v1248_v59  ;;  %vm1257_vm13 = vc.u32 %v1255_v34, %v1251_v63 }
 0x132   : > { %v1265_v24 = vand.u32 65535, %v1235_v49  ;;  %vm3180_vm14 = vcmp.lt.s32.totalorder %v3179_v48, 0  ;;  %v1230_v52 = vsel %vm1226_vm5, %v3978_v58, %v1229_v28  ;;  %v1258_v46 = vsel %vm1257_vm13, 1, %v5884_v56 }
 0x133   : > { %v1266_v11 = vshrl.u32 %v1235_v49, 16  ;;  %v1651_v10 = vsel %vm1649_vm7, %v1636_v37, %v1650_v47  ;;  %v1654_v5 = vsel %vm1652_vm4, %v1653_v54, %v1644_v15  ;;  %v1146_v31 = vsel %vm3180_vm14, 0, %v3179_v48 }
 0x134   : > { %v1161_v23 = vsub.s32 4, %v4004_v57  ;;  %v1655_v18 = vsel %vm1648_vm8, %v1651_v10, %v1654_v5  ;;  %v1147_v12 = vsub.s32 32, %v1146_v31  ;;  %v1151_v2 = vsub.s32 4294967266, %v1146_v31 }
 0x135   : > { %v1260_v0 = vadd.s32 %v1258_v46, %v1256_v62  ;;  %v1656_v35 = vsel %vm1645_vm10, nan, %v1655_v18  ;;  %vm1039_vm0 = vcmp.lt.s32.totalorder %v3536_v42, 0  ;;  %v1268_v58 = vmul.u32 %v1266_v11, %v4016_v3 }
 0x136   : > { %v1269_v53 = vmul.u32 %v1265_v24, %v4019_v29  ;;  %1739 = vmatpush.msra.mxu3 %v1656_v35  ;;  %v1148_v40 = vshll.u32 %v4028_v36, %v1146_v31  ;;  %v1149_v22 = vshrl.u32 %v1131_v8, %v1147_v12  ;;  %v1152_v28 = vadd.s32 127, %v1151_v2 }
 0x137   : > { %v1250_v13 = vshrl.u32 %v1246_v19, 16  ;;  %v1162_v1 = vsel %vm1039_vm0, %v1161_v23, %v4004_v57  ;;  %v1231_v60 = vsel %vm1225_vm6, %v1228_v41, %v1230_v52  ;;  %v1267_v17 = vmul.u32 %v1265_v24, %v4016_v3 }
 0x138   : > { %v1271_v37 = vshll.u32 %v1268_v58, 16  ;;  %v1150_v51 = vor.u32 %v1149_v22, %v1148_v40  ;;  %v1153_v7 = vshll.u32 %v1152_v28, 23  ;;  %v727_v16 = vand.u32 2147483647, %v3530_v26 }
 0x139   : > { %v1261_v49 = vadd.s32 %v1260_v0, %v1250_v13  ;;  %v1270_v36 = vmul.u32 %v1266_v11, %v4019_v29  ;;  %v1273_v59 = vshll.u32 %v1269_v53, 16  ;;  %v1164_v57 = vsel %vm4060_vm12, 0, %v1162_v1 }
 0x13a   : > { %vm1275_vm1 = vc.u32 %v1267_v17, %v1271_v37  ;;  %v1277_v19 = vadd.s32 %v1271_v37, %v1267_v17  ;;  %v1154_v63 = vor.u32 4788187, %v1153_v7  ;;  %v1252_v4 = vshrl.u32 %v4037_v30, 16 }
 0x13b   : > { %v1276_v15 = vsel %vm1275_vm1, 1, %v5884_v56  ;;  %v1157_v3 = vcvt.s32.f32 %v1150_v51  ;;  %v734_v38 = vand.u32 8388607, %v727_v16  ;;  %v744_v8 = vshll.u32 %v5881_v33, %v3550_v61  ;;  %v5898_v51 = vld [vmem:[#allocation25_spill] sm:$0xff] }
 0x13c   : > { %v1278_v54 = vadd.s32 %v1276_v15, %v1270_v36  ;;  %vm1279_vm2 = vc.u32 %v1277_v19, %v1273_v59  ;;  %v1155_v34 = vand.u32 2147483647, %v1154_v63  ;;  %v745_v48 = vshrl.u32 %v5885_v55, %v3579_v14 }
 0x13d   : > { %v1280_v29 = vsel %vm1279_vm2, 1, %v5884_v56  ;;  %v4096_v41 = vadd.s32 %v1261_v49, %v1252_v4  ;;  %v1272_v30 = vshrl.u32 %v1268_v58, 16  ;;  %v1274_v47 = vshrl.u32 %v1269_v53, 16 }
 0x13e   : > { %v1282_v62 = vadd.s32 %v1280_v29, %v1278_v54  ;;  %v1158_v24 = vmul.f32 %v1157_v3, %v1155_v34  ;;  %v4098_v52 = vor.u32 %v745_v48, %v744_v8  ;;  %v747_v46 = vshll.u32 %v5885_v55, %v3550_v61  ;;  %v5899_v54 = vld [vmem:[#allocation13_spill] sm:$0xff] }
 0x13f   : > { %v748_v11 = vshrl.u32 %v5886_v20, %v3579_v14  ;;  %v735_v5 = vor.u32 8388608, %v734_v38  ;;  %v750_v31 = vshll.u32 %v5886_v20, %v3550_v61  ;;  %v751_v23 = vshrl.u32 %v5880_v21, %v3579_v14 }
 0x140   : > { %v1283_v10 = vadd.s32 %v1282_v62, %v1272_v30  ;;  %v1159_v18 = vxor.u32 2147483648, %v1158_v24  ;;  %v1181_v12 = vadd.s32 3, %v1164_v57  ;;  %v4108_v2 = vadd.s32 %v1277_v19, %v1273_v59  ;;  %v5901_v30 = vld [vmem:[#allocation23_spill] sm:$0xff] }
 0x141   : > { %v4110_v0 = vor.u32 %v748_v11, %v747_v46  ;;  %v752_v58 = vor.u32 %v751_v23, %v750_v31  ;;  %vm759_vm3 = vcmp.lt.s32.totalorder %v3598_v25, 1  ;;  %vm761_vm5 = vcmp.lt.s32.totalorder %v3598_v25, 3 }
 0x142   : > { %v1284_v35 = vadd.s32 %v1283_v10, %v1274_v47  ;;  %v1160_v53 = vsel %vm1039_vm0, %v1159_v18, %v1158_v24  ;;  %vm1287_vm6 = vc.u32 %v4096_v41, %v4108_v2  ;;  %v773_v40 = vsel %vm761_vm5, %v3639_v50, %v4026_v45 }
 0x143   : > { %v767_v61 = vsel %vm759_vm3, %v4098_v52, %v4110_v0  ;;  %v4129_v22 = vsel %vm4060_vm12, %v3536_v42, %v1160_v53  ;;  %v769_v13 = vsel %vm761_vm5, %v752_v58, %v3993_v27  ;;  %v4134_v1 = vshll.u32 %v735_v5, 8 }
 0x144   : > { %v1288_v28 = vadd.s32 1, %v1284_v35  ;;  %v1165_v17 = vmul.f32 %v4129_v22, %v4129_v22  ;;  %v1285_v37 = vmul.u32 %v4009_v32, %v1231_v60  ;;  %vm760_vm7 = vcmp.lt.s32.totalorder %v3598_v25, 2 }
 0x145   : > { %v771_v50 = vsel %vm759_vm3, %v4110_v0, %v752_v58  ;;  %v4145_v45 = vor.u32 %v3625_v44, %v3621_v39  ;;  %v913_v27 = vor.u32 %v5898_v51, %v5897_v6  ;;  %v4153_v60 = vsel %vm760_vm7, %v767_v61, %v769_v13 }
 0x146   : > { %v1289_v7 = vsel %vm1287_vm6, %v1288_v28, %v1284_v35  ;;  %v774_v49 = vsel %vm760_vm7, %v771_v50, %v773_v40  ;;  %v1166_v36 = vmul.f32 -0.001358992, %v1165_v17  ;;  %v1173_v59 = vmul.f32 -0.00019511016, %v1165_v17 }
 0x147   : > { %v1290_v32 = vadd.s32 %v1289_v7, %v1285_v37  ;;  %v776_v19 = vand.u32 65535, %v4134_v1  ;;  %v777_v63 = vshrl.u32 %v4134_v1, 16  ;;  %v778_v39 = vand.u32 65535, %v774_v49 }
 0x148   : > { %v779_v44 = vshrl.u32 %v774_v49, 16  ;;  %v1167_v57 = vadd.f32 0.041655596, %v1166_v36  ;;  %v1174_v4 = vadd.f32 0.008332121, %v1173_v59  ;;  %v4157_v15 = vand.u32 3, %v1181_v12 }
 0x149   : > { %v1291_v3 = vadd.s32 536870912, %v1290_v32  ;;  %v5900_v38 = vmov 1326507024   ;;  %v4163_v8 = vmul.u32 %v778_v39, %v777_v63  ;;  %v801_v48 = vshrl.u32 %v4153_v60, 16 }
 0x14a   : > { %v4161_v34 = vshrl.u32 %v5900_v38, %v5899_v54  ;;  %v781_v29 = vmul.u32 %v779_v44, %v776_v19  ;;  %vm917_vm8 = vcmp.lt.s32.totalorder %v5901_v30, 4  ;;  %v1168_v47 = vmul.f32 %v1167_v57, %v1165_v17 }
 0x14b   : > { %v1175_v62 = vmul.f32 %v1174_v4, %v1165_v17  ;;  %v4167_v24 = vshrl.u32 %v1291_v3, 30  ;;  %v4172_v46 = vsel %vm917_vm8, %v4145_v45, 920167782  ;;  %v4176_v11 = vsel %vm917_vm8, %v913_v27, 1326507024 }
 0x14c   : > { %v780_v10 = vmul.u32 %v778_v39, %v776_v19  ;;  %v784_v5 = vshll.u32 %v781_v29, 16  ;;  %v1169_v31 = vadd.f32 -0.4999988, %v1168_v47  ;;  %vm1187_vm9 = vcmp.eq.s32.totalorder %v4157_v15, 2 }
 0x14d   : > { %v1176_v23 = vadd.f32 -0.16666654, %v1175_v62  ;;  %v1293_v18 = vshll.u32 %v4167_v24, 30  ;;  %v800_v12 = vand.u32 65535, %v4153_v60  ;;  %vm1184_vm10 = vcmp.eq.s32.totalorder %v4157_v15, 0 }
 0x14e   : > { %v786_v35 = vshll.u32 %v4163_v8, 16  ;;  %vm788_vm11 = vc.u32 %v780_v10, %v784_v5  ;;  %v790_v53 = vadd.s32 %v784_v5, %v780_v10  ;;  %v4183_v61 = vmul.u32 %v801_v48, %v776_v19 }
 0x14f   : > { %v1170_v40 = vmul.f32 %v1169_v31, %v1165_v17  ;;  %v1177_v28 = vmul.f32 %v1176_v23, %v1165_v17  ;;  %vm1183_vm4 = vcmp.lt.s32.totalorder %v4157_v15, 2  ;;  %v4186_v13 = vsub.s32 %v1290_v32, %v1293_v18 }
 0x150   : > { %v743_v37 = vshrl.u32 %v5881_v33, %v3579_v14  ;;  %vm1180_vm12 = vweird.f32 %v3536_v42  ;;  %v764_v50 = vsel %vm762_vm15, %v752_v58, 2102212464  ;;  %v783_v6 = vmul.u32 %v779_v44, %v777_v63 }
 0x151   : > { %v789_v51 = vsel %vm788_vm11, 1, %v5884_v56  ;;  %vm792_vm13 = vc.u32 %v790_v53, %v786_v35  ;;  %v1171_v27 = vadd.f32 1.0, %v1170_v40  ;;  %v1178_v7 = vadd.f32 1.0, %v1177_v28 }
 0x152   : > { %vm1295_vm14 = vcmp.lt.s32.totalorder %v4186_v13, 0  ;;  %v1296_v17 = vsub.s32 0, %v4186_v13  ;;  %v791_v49 = vadd.s32 %v789_v51, %v783_v6  ;;  %v793_v36 = vsel %vm792_vm13, 1, %v5884_v56 }
 0x153   : > { %v804_v59 = vmul.u32 %v800_v12, %v777_v63  ;;  %v806_v14 = vshll.u32 %v4183_v61, 16  ;;  %v1179_v32 = vmul.f32 %v1178_v7, %v4129_v22  ;;  %v1188_v60 = vxor.u32 2147483648, %v1171_v27 }
 0x154   : > { %v1297_v58 = vsel %vm1295_vm14, %v1296_v17, %v4186_v13  ;;  %v802_v39 = vmul.u32 %v800_v12, %v776_v19  ;;  %vm1194_vm15 = vcmp.lt.s32.totalorder %v3538_v43, 0  ;;  %v763_v57 = vsel %vm759_vm3, %v743_v37, %v4098_v52 }
 0x155   : > { %v1298_v44 = vclz %v1297_v58  ;;  %v765_v4 = vsel %vm761_vm5, %v4110_v0, %v764_v50  ;;  %v795_v3 = vadd.s32 %v793_v36, %v791_v49  ;;  %v1185_v47 = vxor.u32 2147483648, %v1179_v32  ;;  %v5906_v58 = vld [vmem:[#allocation22_spill] sm:$0xff] }
 0x156   : > { %v785_v62 = vshrl.u32 %v781_v29, 16  ;;  %v787_v22 = vshrl.u32 %v4163_v8, 16  ;;  %vm810_vm0 = vc.u32 %v802_v39, %v806_v14  ;;  %v1189_v19 = vsel %vm1187_vm9, %v1188_v60, %v1179_v32  ;;  %v5902_v8 = vld [vmem:[#allocation7_spill] sm:$0xff]  ;;  %v5905_v60 = vld [vmem:[#allocation14_spill] sm:$0xff] }
 0x157   : > { %v3182_v10 = vadd.s32 4294967294, %v1298_v44  ;;  %v805_v5 = vmul.u32 %v801_v48, %v777_v63  ;;  %v808_v31 = vshll.u32 %v804_v59, 16  ;;  %v1186_v23 = vsel %vm1184_vm10, %v1171_v27, %v1185_v47 }
 0x158   : > { %v796_v52 = vadd.s32 %v795_v3, %v785_v62  ;;  %v811_v18 = vsel %vm810_vm0, 1, %v5884_v56  ;;  %v812_v12 = vadd.s32 %v806_v14, %v802_v39  ;;  %v1190_v0 = vsel %vm1183_vm4, %v1186_v23, %v1189_v19 }
 0x159   : > { %vm3183_vm1 = vcmp.lt.s32.totalorder %v3182_v10, 0  ;;  %v813_v29 = vadd.s32 %v811_v18, %v805_v5  ;;  %v882_v35 = vand.u32 2147483647, %v5902_v8  ;;  %v1191_v53 = vsel %vm1180_vm12, nan, %v1190_v0  ;;  %v5908_v0 = vld [vmem:[#allocation18_spill] sm:$0xff] }
 0x15a   : > { %v1301_v40 = vsel %vm3183_vm1, 0, %v3182_v10  ;;  %v1316_v63 = vsub.s32 4, %v4167_v24  ;;  %vm814_vm2 = vc.u32 %v812_v12, %v808_v31  ;;  %1711 = vmatpush.msra.mxu2 %v1191_v53  ;;  %vm4221_vm3 = vcmp.le.f32.partialorder %v1192_v9, 0.7853982 }
 0x15b   : > { %v1286_v15 = vadd.s32 %v4108_v2, %v4096_v41  ;;  %v1302_v28 = vsub.s32 32, %v1301_v40  ;;  %v1306_v37 = vsub.s32 4294967266, %v1301_v40  ;;  %v815_v50 = vsel %vm814_vm2, 1, %v5884_v56 }
 0x15c   : > { %v766_v42 = vsel %vm760_vm7, %v763_v57, %v765_v4  ;;  %v4230_v6 = vadd.s32 %v796_v52, %v787_v22  ;;  %v807_v51 = vshrl.u32 %v4183_v61, 16  ;;  %v817_v27 = vadd.s32 %v815_v50, %v813_v29 }
 0x15d   : > { %v1303_v9 = vshll.u32 %v4186_v13, %v1301_v40  ;;  %v1304_v7 = vshrl.u32 %v1286_v15, %v1302_v28  ;;  %v1307_v17 = vadd.s32 127, %v1306_v37  ;;  %v889_v49 = vand.u32 8388607, %v882_v35 }
 0x15e   : > { %v1317_v41 = vsel %vm1194_vm15, %v1316_v63, %v4167_v24  ;;  %v809_v2 = vshrl.u32 %v804_v59, 16  ;;  %v4239_v36 = vadd.s32 %v812_v12, %v808_v31  ;;  %v818_v25 = vadd.s32 %v817_v27, %v807_v51 }
 0x15f   : > { %v1305_v14 = vor.u32 %v1304_v7, %v1303_v9  ;;  %v1308_v32 = vshll.u32 %v1307_v17, 23  ;;  %v899_v61 = vshll.u32 %v5881_v33, %v5905_v60  ;;  %v900_v13 = vshrl.u32 %v5885_v55, %v5906_v58  ;;  %v5909_v7 = vld [vmem:[#allocation11_spill] sm:$0xff] }
 0x160   : > { %v819_v39 = vadd.s32 %v818_v25, %v809_v2  ;;  %v890_v44 = vor.u32 8388608, %v889_v49  ;;  %v902_v57 = vshll.u32 %v5885_v55, %v5905_v60  ;;  %v903_v24 = vshrl.u32 %v5886_v20, %v5906_v58 }
 0x161   : > { %v1309_v59 = vor.u32 4788187, %v1308_v32  ;;  %vm822_vm5 = vc.u32 %v4230_v6, %v4239_v36  ;;  %v905_v4 = vshll.u32 %v5886_v20, %v5905_v60  ;;  %v906_v3 = vshrl.u32 %v5880_v21, %v5906_v58  ;;  %v5910_v60 = vld [vmem:[#allocation16_spill] sm:$0xff] }
 0x162   : > { %v820_v47 = vmul.u32 %v4134_v1, %v766_v42  ;;  %v823_v62 = vadd.s32 1, %v819_v39  ;;  %v901_v22 = vor.u32 %v900_v13, %v899_v61  ;;  %v904_v19 = vor.u32 %v903_v24, %v902_v57  ;;  %v5907_v1 = vld [vmem:[#allocation15_spill] sm:$0xff] }
 0x163   : > { %v1310_v10 = vand.u32 2147483647, %v1309_v59  ;;  %v1312_v5 = vcvt.s32.f32 %v1305_v14  ;;  %v907_v31 = vor.u32 %v906_v3, %v905_v4  ;;  %vm916_vm6 = vcmp.lt.s32.totalorder %v5901_v30, 3  ;;  %v5911_v61 = vld [vmem:[#allocation19_spill] sm:$0xff] }
 0x164   : > { %v1319_v23 = vsel %vm4221_vm3, 0, %v1317_v41  ;;  %v824_v52 = vsel %vm822_vm5, %v823_v62, %v819_v39  ;;  %v928_v18 = vsel %vm916_vm6, %v4145_v45, %v4176_v11  ;;  %v4263_v12 = vshll.u32 %v890_v44, 8 }
 0x165   : > { %v4267_v29 = vor.u32 %v5908_v0, %v5907_v1  ;;  %v1313_v53 = vmul.f32 %v1312_v5, %v1310_v10  ;;  %v825_v40 = vadd.s32 %v824_v52, %v820_v47  ;;  %vm914_vm7 = vcmp.lt.s32.totalorder %v5901_v30, 1 }
 0x166   : > { %vm915_vm9 = vcmp.lt.s32.totalorder %v5901_v30, 2  ;;  %v922_v63 = vsel %vm914_vm7, %v901_v22, %v904_v19  ;;  %v924_v15 = vsel %vm916_vm6, %v907_v31, %v4172_v46  ;;  %v926_v45 = vsel %vm914_vm7, %v904_v19, %v907_v31 }
 0x167   : > { %v1314_v11 = vxor.u32 2147483648, %v1313_v53  ;;  %v1336_v28 = vadd.s32 3, %v1319_v23  ;;  %v826_v37 = vadd.s32 536870912, %v825_v40  ;;  %v929_v50 = vsel %vm915_vm9, %v926_v45, %v928_v18  ;;  %v5912_v45 = vld [vmem:[#allocation17_spill] sm:$0xff] }
 0x168   : > { %v4281_v42 = vand.u32 65535, %v4263_v12  ;;  %v4284_v51 = vshrl.u32 %v4263_v12, 16  ;;  %v933_v27 = vand.u32 65535, %v929_v50  ;;  %v934_v9 = vshrl.u32 %v929_v50, 16 }
 0x169   : > { %vm452_vm10 = vcmp.lt.s32.totalorder %v5909_v7, 4  ;;  %v1315_v46 = vsel %vm1194_vm15, %v1314_v11, %v1313_v53  ;;  %v4289_v17 = vshrl.u32 %v826_v37, 30  ;;  %v898_v49 = vshrl.u32 %v5881_v33, %v5906_v58  ;;  %v5913_v11 = vld [vmem:[#allocation21_spill] sm:$0xff] }
 0x16a   : > { %v925_v41 = vsel %vm915_vm9, %v922_v63, %v924_v15  ;;  %v4298_v2 = vsel %vm4221_vm3, %v3538_v43, %v1315_v46  ;;  %v919_v25 = vsel %vm917_vm8, %v907_v31, 2102212464  ;;  %v936_v14 = vmul.u32 %v934_v9, %v4281_v42 }
 0x16b   : > { %v4304_v32 = vmul.u32 %v933_v27, %v4284_v51  ;;  %v448_v13 = vor.u32 %v5911_v61, %v5910_v60  ;;  %v1320_v58 = vmul.f32 %v4298_v2, %v4298_v2  ;;  %v4310_v39 = vand.u32 3, %v1336_v28 }
 0x16c   : > { %v828_v48 = vshll.u32 %v4289_v17, 30  ;;  %v918_v44 = vsel %vm914_vm7, %v898_v49, %v901_v22  ;;  %v935_v57 = vmul.u32 %v933_v27, %v4281_v42  ;;  %v939_v24 = vshll.u32 %v936_v14, 16 }
 0x16d   : > { %v956_v59 = vshrl.u32 %v925_v41, 16  ;;  %v1321_v4 = vmul.f32 -0.001358992, %v1320_v58  ;;  %v1328_v3 = vmul.f32 -0.00019511016, %v1320_v58  ;;  %v920_v62 = vsel %vm916_vm6, %v904_v19, %v919_v25 }
 0x16e   : > { %v4316_v47 = vsub.s32 %v825_v40, %v828_v48  ;;  %v938_v10 = vmul.u32 %v934_v9, %v4284_v51  ;;  %v941_v5 = vshll.u32 %v4304_v32, 16  ;;  %vm943_vm8 = vc.u32 %v935_v57, %v939_v24 }
 0x16f   : > { %v945_v31 = vadd.s32 %v939_v24, %v935_v57  ;;  %v1322_v23 = vadd.f32 0.041655596, %v1321_v4  ;;  %v1329_v52 = vadd.f32 0.008332121, %v1328_v3  ;;  %v944_v18 = vsel %vm943_vm8, 1, %v5884_v56 }
 0x170   : > { %vm830_vm11 = vcmp.lt.s32.totalorder %v4316_v47, 0  ;;  %v831_v22 = vsub.s32 0, %v4316_v47  ;;  %v955_v1 = vand.u32 65535, %v925_v41  ;;  %v4326_v0 = vmul.u32 %v956_v59, %v4281_v42 }
 0x171   : > { %vm947_vm4 = vc.u32 %v945_v31, %v941_v5  ;;  %v1323_v19 = vmul.f32 %v1322_v23, %v1320_v58  ;;  %v1330_v53 = vmul.f32 %v1329_v52, %v1320_v58  ;;  %v946_v63 = vadd.s32 %v944_v18, %v938_v10 }
 0x172   : > { %v832_v40 = vsel %vm830_vm11, %v831_v22, %v4316_v47  ;;  %v4331_v15 = vsel %vm452_vm10, %v448_v13, 1326507024  ;;  %v4335_v28 = vor.u32 %v5913_v11, %v5912_v45  ;;  %v948_v50 = vsel %vm947_vm4, 1, %v5884_v56 }
 0x173   : > { %v833_v37 = vclz %v832_v40  ;;  %v1324_v27 = vadd.f32 -0.4999988, %v1323_v19  ;;  %v1331_v9 = vadd.f32 -0.16666654, %v1330_v53  ;;  %vm729_vm12 = vcmp.lt.s32.totalorder %v3530_v26, 0  ;;  %v5916_v40 = vld [vmem:[#allocation5_spill] sm:$0xff] }
 0x174   : > { %v950_v46 = vadd.s32 %v948_v50, %v946_v63  ;;  %vm1339_vm13 = vcmp.eq.s32.totalorder %v4310_v39, 0  ;;  %vm1342_vm14 = vcmp.eq.s32.totalorder %v4310_v39, 2  ;;  %v821_v49 = vadd.s32 %v4239_v36, %v4230_v6 }
 0x175   : > { %v3173_v41 = vadd.s32 4294967294, %v833_v37  ;;  %v4345_v25 = vsel %vm915_vm9, %v918_v44, %v920_v62  ;;  %v959_v60 = vmul.u32 %v955_v1, %v4284_v51  ;;  %v1325_v61 = vmul.f32 %v1324_v27, %v1320_v58 }
 0x176   : > { %v1332_v13 = vmul.f32 %v1331_v9, %v1320_v58  ;;  %vm1338_vm15 = vcmp.lt.s32.totalorder %v4310_v39, 2  ;;  %v940_v48 = vshrl.u32 %v936_v14, 16  ;;  %v961_v57 = vshll.u32 %v4326_v0, 16 }
 0x177   : > { %vm1335_vm0 = vweird.f32 %v3538_v43  ;;  %vm3174_vm1 = vcmp.lt.s32.totalorder %v3173_v41, 0  ;;  %v851_v24 = vsub.s32 4, %v4289_v17  ;;  %v957_v6 = vmul.u32 %v955_v1, %v4281_v42 }
 0x178   : > { %v960_v30 = vmul.u32 %v956_v59, %v4284_v51  ;;  %v1326_v36 = vadd.f32 1.0, %v1325_v61  ;;  %v1333_v44 = vadd.f32 1.0, %v1332_v13  ;;  %v836_v4 = vsel %vm3174_vm1, 0, %v3173_v41  ;;  %v5917_v13 = vld [vmem:[#allocation8_spill] sm:$0xff] }
 0x179   : > { %v951_v3 = vadd.s32 %v950_v46, %v940_v48  ;;  %v837_v62 = vsub.s32 32, %v836_v4  ;;  %v841_v58 = vsub.s32 4294967266, %v836_v4  ;;  %v963_v10 = vshll.u32 %v959_v60, 16  ;;  %v5918_v48 = vld [vmem:[#allocation10_spill] sm:$0xff] }
 0x17a   : > { %vm965_vm2 = vc.u32 %v957_v6, %v961_v57  ;;  %v1334_v14 = vmul.f32 %v1333_v44, %v4298_v2  ;;  %v1343_v5 = vxor.u32 2147483648, %v1326_v36  ;;  %v967_v23 = vadd.s32 %v961_v57, %v957_v6 }
 0x17b   : > { %v966_v31 = vsel %vm965_vm2, 1, %v5884_v56  ;;  %vm4358_vm3 = vcmp.le.f32.partialorder %v727_v16, 0.7853982  ;;  %v838_v51 = vshll.u32 %v4316_v47, %v836_v4  ;;  %v839_v59 = vshrl.u32 %v821_v49, %v837_v62 }
 0x17c   : > { %v842_v52 = vadd.s32 127, %v841_v58  ;;  %v968_v22 = vadd.s32 %v966_v31, %v960_v30  ;;  %v1340_v18 = vxor.u32 2147483648, %v1334_v14  ;;  %v852_v2 = vsel %vm729_vm12, %v851_v24, %v4289_v17 }
 0x17d   : > { %v942_v1 = vshrl.u32 %v4304_v32, 16  ;;  %vm969_vm5 = vc.u32 %v967_v23, %v963_v10  ;;  %v840_v19 = vor.u32 %v839_v59, %v838_v51  ;;  %v417_v63 = vand.u32 2147483647, %v5916_v40 }
 0x17e   : > { %v843_v53 = vshll.u32 %v842_v52, 23  ;;  %v970_v16 = vsel %vm969_vm5, 1, %v5884_v56  ;;  %v1341_v47 = vsel %vm1339_vm13, %v1326_v36, %v1340_v18  ;;  %v1344_v45 = vsel %vm1342_vm14, %v1343_v5, %v1334_v14 }
 0x17f   : > { %v962_v11 = vshrl.u32 %v4326_v0, 16  ;;  %v972_v37 = vadd.s32 %v970_v16, %v968_v22  ;;  %v1345_v17 = vsel %vm1338_vm15, %v1341_v47, %v1344_v45  ;;  %v4376_v50 = vadd.s32 %v951_v3, %v942_v1 }
 0x180   : > { %v844_v32 = vor.u32 4788187, %v843_v53  ;;  %v964_v27 = vshrl.u32 %v959_v60, 16  ;;  %v1346_v9 = vsel %vm1335_vm0, nan, %v1345_v17  ;;  %v4380_v46 = vadd.s32 %v967_v23, %v963_v10  ;;  %v5919_v17 = vld [vmem:[#allocation20_spill] sm:$0xff] }
 0x181   : > { %v973_v49 = vadd.s32 %v972_v37, %v962_v11  ;;  %v424_v41 = vand.u32 8388607, %v417_v63  ;;  %1740 = vmatpush.msra.mxu3 %v1346_v9  ;;  %v847_v0 = vcvt.s32.f32 %v840_v19  ;;  %v434_v39 = vshll.u32 %v5881_v33, %v5917_v13 }
 0x182   : > { %v845_v61 = vand.u32 2147483647, %v844_v32  ;;  %v435_v57 = vshrl.u32 %v5885_v55, %v5918_v48  ;;  %v437_v43 = vshll.u32 %v5885_v55, %v5917_v13  ;;  %v438_v6 = vshrl.u32 %v5886_v20, %v5918_v48 }
 0x183   : > { %v974_v24 = vadd.s32 %v973_v49, %v964_v27  ;;  %v425_v60 = vor.u32 8388608, %v424_v41  ;;  %vm977_vm6 = vc.u32 %v4376_v50, %v4380_v46  ;;  %v440_v36 = vshll.u32 %v5886_v20, %v5917_v13  ;;  %v5920_v27 = vld [vmem:[#allocation12_spill] sm:$0xff] }
 0x184   : > { %v848_v30 = vmul.f32 %v847_v0, %v845_v61  ;;  %v441_v44 = vshrl.u32 %v5880_v21, %v5918_v48  ;;  %v854_v4 = vsel %vm4358_vm3, 0, %v852_v2  ;;  %v4400_v62 = vor.u32 %v435_v57, %v434_v39 }
 0x185   : > { %v978_v3 = vadd.s32 1, %v974_v24  ;;  %v4402_v58 = vor.u32 %v438_v6, %v437_v43  ;;  %v975_v14 = vmul.u32 %v4263_v12, %v4345_v25  ;;  %vm451_vm7 = vcmp.lt.s32.totalorder %v5909_v7, 3 }
 0x186   : > { %v849_v10 = vxor.u32 2147483648, %v848_v30  ;;  %v4406_v5 = vor.u32 %v441_v44, %v440_v36  ;;  %v458_v31 = vsel %vm452_vm10, %v4267_v29, 920167782  ;;  %v463_v51 = vsel %vm451_vm7, %v4267_v29, %v4331_v15 }
 0x187   : > { %v979_v23 = vsel %vm977_vm6, %v978_v3, %v974_v24  ;;  %v4416_v59 = vshll.u32 %v425_v60, 8  ;;  %v871_v12 = vadd.s32 3, %v854_v4  ;;  %vm449_vm9 = vcmp.lt.s32.totalorder %v5909_v7, 1 }
 0x188   : > { %v850_v52 = vsel %vm729_vm12, %v849_v10, %v848_v30  ;;  %v980_v25 = vadd.s32 %v979_v23, %v975_v14  ;;  %vm450_vm8 = vcmp.lt.s32.totalorder %v5909_v7, 2  ;;  %v457_v29 = vsel %vm449_vm9, %v4400_v62, %v4402_v58 }
 0x189   : > { %v853_v22 = vsel %vm4358_vm3, %v3530_v26, %v850_v52  ;;  %v461_v15 = vsel %vm449_vm9, %v4402_v58, %v4406_v5  ;;  %v459_v1 = vsel %vm451_vm7, %v4406_v5, %v458_v31  ;;  %v466_v19 = vand.u32 65535, %v4416_v59 }
 0x18a   : > { %v855_v18 = vmul.f32 %v853_v22, %v853_v22  ;;  %v981_v2 = vadd.s32 536870912, %v980_v25  ;;  %v464_v42 = vsel %vm450_vm8, %v461_v15, %v463_v51  ;;  %v4440_v53 = vshrl.u32 %v4416_v59, 16 }
 0x18b   : > { %v468_v16 = vand.u32 65535, %v464_v42  ;;  %v469_v47 = vshrl.u32 %v464_v42, 16  ;;  %v603_v32 = vor.u32 %v4161_v34, %v5919_v17  ;;  %vm607_vm11 = vcmp.lt.s32.totalorder %v5920_v27, 4 }
 0x18c   : > { %v856_v45 = vmul.f32 -0.001358992, %v855_v18  ;;  %v863_v11 = vmul.f32 -0.00019511016, %v855_v18  ;;  %v4442_v37 = vshrl.u32 %v981_v2, 30  ;;  %v460_v13 = vsel %vm450_vm8, %v457_v29, %v459_v1 }
 0x18d   : > { %v471_v9 = vmul.u32 %v469_v47, %v466_v19  ;;  %v4448_v49 = vmul.u32 %v468_v16, %v4440_v53  ;;  %v4456_v39 = vsel %vm607_vm11, %v4335_v28, 920167782  ;;  %v872_v57 = vand.u32 3, %v871_v12 }
 0x18e   : > { %v857_v41 = vadd.f32 0.041655596, %v856_v45  ;;  %v864_v61 = vadd.f32 0.008332121, %v863_v11  ;;  %v983_v0 = vshll.u32 %v4442_v37, 30  ;;  %v470_v24 = vmul.u32 %v468_v16, %v466_v19 }
 0x18f   : > { %v474_v60 = vshll.u32 %v471_v9, 16  ;;  %v473_v36 = vmul.u32 %v469_v47, %v4440_v53  ;;  %v476_v44 = vshll.u32 %v4448_v49, 16  ;;  %v491_v3 = vshrl.u32 %v460_v13, 16 }
 0x190   : > { %v858_v43 = vmul.f32 %v857_v41, %v855_v18  ;;  %v865_v6 = vmul.f32 %v864_v61, %v855_v18  ;;  %v4458_v30 = vsub.s32 %v980_v25, %v983_v0  ;;  %v433_v23 = vshrl.u32 %v5881_v33, %v5918_v48 }
 0x191   : > { %vm478_vm4 = vc.u32 %v470_v24, %v474_v60  ;;  %v480_v4 = vadd.s32 %v474_v60, %v470_v24  ;;  %v490_v52 = vand.u32 65535, %v460_v13  ;;  %vm873_vm14 = vcmp.lt.s32.totalorder %v872_v57, 2 }
 0x192   : > { %v859_v10 = vadd.f32 -0.4999988, %v858_v43  ;;  %v866_v14 = vadd.f32 -0.16666654, %v865_v6  ;;  %vm985_vm12 = vcmp.lt.s32.totalorder %v4458_v30, 0  ;;  %v986_v31 = vsub.s32 0, %v4458_v30 }
 0x193   : > { %v479_v51 = vsel %vm478_vm4, 1, %v5884_v56  ;;  %vm482_vm13 = vc.u32 %v480_v4, %v476_v44  ;;  %vm870_vm15 = vweird.f32 %v3530_v26  ;;  %vm874_vm0 = vcmp.eq.s32.totalorder %v872_v57, 0 }
 0x194   : > { %v860_v12 = vmul.f32 %v859_v10, %v855_v18  ;;  %v867_v25 = vmul.f32 %v866_v14, %v855_v18  ;;  %v987_v29 = vsel %vm985_vm12, %v986_v31, %v4458_v30  ;;  %v481_v15 = vadd.s32 %v479_v51, %v473_v36 }
 0x195   : > { %v988_v2 = vclz %v987_v29  ;;  %v483_v1 = vsel %vm482_vm13, 1, %v5884_v56  ;;  %v493_v42 = vmul.u32 %v491_v3, %v466_v19  ;;  %v454_v48 = vsel %vm452_vm10, %v4406_v5, 2102212464 }
 0x196   : > { %v861_v16 = vadd.f32 1.0, %v860_v12  ;;  %v868_v47 = vadd.f32 1.0, %v867_v25  ;;  %v485_v45 = vadd.s32 %v483_v1, %v481_v15  ;;  %vm877_vm1 = vcmp.eq.s32.totalorder %v872_v57, 2 }
 0x197   : > { %v976_v18 = vadd.s32 %v4380_v46, %v4376_v50  ;;  %v3176_v11 = vadd.s32 4294967294, %v988_v2  ;;  %v494_v41 = vmul.u32 %v490_v52, %v4440_v53  ;;  %v453_v13 = vsel %vm449_vm9, %v433_v23, %v4400_v62 }
 0x198   : > { %v869_v61 = vmul.f32 %v868_v47, %v853_v22  ;;  %v878_v0 = vxor.u32 2147483648, %v861_v16  ;;  %v475_v24 = vshrl.u32 %v471_v9, 16  ;;  %v455_v5 = vsel %vm451_vm7, %v4402_v58, %v454_v48  ;;  %v5922_v48 = vld [vmem:[#allocation9_spill] sm:$0xff] }
 0x199   : > { %vm3177_vm2 = vcmp.lt.s32.totalorder %v3176_v11, 0  ;;  %v492_v60 = vmul.u32 %v490_v52, %v466_v19  ;;  %v496_v43 = vshll.u32 %v493_v42, 16  ;;  %v495_v46 = vmul.u32 %v491_v3, %v4440_v53 }
 0x19a   : > { %v875_v6 = vxor.u32 2147483648, %v869_v61  ;;  %v991_v36 = vsel %vm3177_vm2, 0, %v3176_v11  ;;  %v486_v50 = vadd.s32 %v485_v45, %v475_v24  ;;  %v879_v22 = vsel %vm877_vm1, %v878_v0, %v869_v61 }
 0x19b   : > { %v992_v44 = vsub.s32 32, %v991_v36  ;;  %v996_v4 = vsub.s32 4294967266, %v991_v36  ;;  %v498_v10 = vshll.u32 %v494_v41, 16  ;;  %v993_v9 = vshll.u32 %v4458_v30, %v991_v36 }
 0x19c   : > { %v876_v62 = vsel %vm874_vm0, %v861_v16, %v875_v6  ;;  %vm500_vm10 = vc.u32 %v492_v60, %v496_v43  ;;  %v502_v14 = vadd.s32 %v496_v43, %v492_v60  ;;  %v617_v53 = vsel %vm607_vm11, %v603_v32, 1326507024  ;;  %v5921_v32 = vld [vmem:[#allocation6_spill] sm:$0xff] }
 0x19d   : > { %v880_v58 = vsel %vm873_vm14, %v876_v62, %v879_v22  ;;  %v994_v19 = vshrl.u32 %v976_v18, %v992_v44  ;;  %v997_v31 = vadd.s32 127, %v996_v4  ;;  %v501_v23 = vsel %vm500_vm10, 1, %v5884_v56 }
 0x19e   : > { %v881_v3 = vsel %vm870_vm15, nan, %v880_v58  ;;  %v503_v51 = vadd.s32 %v501_v23, %v495_v46  ;;  %vm504_vm3 = vc.u32 %v502_v14, %v498_v10  ;;  %vm884_vm5 = vcmp.lt.s32.totalorder %v5902_v8, 0 }
 0x19f   : > { %1712 = vmatpush.msra.mxu2 %v881_v3  ;;  %v995_v57 = vor.u32 %v994_v19, %v993_v9  ;;  %v998_v30 = vshll.u32 %v997_v31, 23  ;;  %v477_v52 = vshrl.u32 %v4448_v49, 16  ;;  %v505_v12 = vsel %vm504_vm3, 1, %v5884_v56 }
 0x1a0   : > { %v456_v34 = vsel %vm450_vm8, %v453_v13, %v455_v5  ;;  %v497_v17 = vshrl.u32 %v493_v42, 16  ;;  %v507_v25 = vadd.s32 %v505_v12, %v503_v51  ;;  %v572_v29 = vand.u32 2147483647, %v5921_v32 }
 0x1a1   : > { %v999_v26 = vor.u32 4788187, %v998_v30  ;;  %v4501_v15 = vadd.s32 %v486_v50, %v477_v52  ;;  %v499_v2 = vshrl.u32 %v494_v41, 16  ;;  %v4503_v1 = vadd.s32 %v502_v14, %v498_v10 }
 0x1a2   : > { %v1002_v16 = vcvt.s32.f32 %v995_v57  ;;  %v508_v47 = vadd.s32 %v507_v25, %v497_v17  ;;  %v579_v49 = vand.u32 8388607, %v572_v29  ;;  %v589_v45 = vshll.u32 %v5881_v33, %v5922_v48 }
 0x1a3   : > { %v1000_v7 = vand.u32 2147483647, %v999_v26  ;;  %v590_v42 = vshrl.u32 %v5885_v55, %v5899_v54  ;;  %v592_v18 = vshll.u32 %v5885_v55, %v5922_v48  ;;  %v593_v11 = vshrl.u32 %v5886_v20, %v5899_v54 }
 0x1a4   : > { %v1006_v41 = vsub.s32 4, %v4442_v37  ;;  %v509_v61 = vadd.s32 %v508_v47, %v499_v2  ;;  %v595_v0 = vshll.u32 %v5886_v20, %v5922_v48  ;;  %v596_v13 = vshrl.u32 %v5880_v21, %v5899_v54 }
 0x1a5   : > { %v1003_v24 = vmul.f32 %v1002_v16, %v1000_v7  ;;  %vm512_vm6 = vc.u32 %v4501_v15, %v4503_v1  ;;  %v4522_v5 = vor.u32 %v590_v42, %v589_v45  ;;  %v4524_v60 = vor.u32 %v593_v11, %v592_v18 }
 0x1a6   : > { %v513_v43 = vadd.s32 1, %v509_v61  ;;  %v580_v6 = vor.u32 8388608, %v579_v49  ;;  %v4526_v36 = vor.u32 %v596_v13, %v595_v0  ;;  %vm606_vm7 = vcmp.lt.s32.totalorder %v5920_v27, 3 }
 0x1a7   : > { %v1004_v50 = vxor.u32 2147483648, %v1003_v24  ;;  %v510_v46 = vmul.u32 %v4416_v59, %v456_v34  ;;  %vm604_vm9 = vcmp.lt.s32.totalorder %v5920_v27, 1  ;;  %v618_v22 = vsel %vm606_vm7, %v4335_v28, %v617_v53 }
 0x1a8   : > { %vm4536_vm8 = vcmp.le.f32.partialorder %v882_v35, 0.7853982  ;;  %v1007_v4 = vsel %vm884_vm5, %v1006_v41, %v4442_v37  ;;  %v514_v10 = vsel %vm512_vm6, %v513_v43, %v509_v61  ;;  %v616_v59 = vsel %vm604_vm9, %v4524_v60, %v4526_v36 }
 0x1a9   : > { %v1005_v62 = vsel %vm884_vm5, %v1004_v50, %v1003_v24  ;;  %v515_v28 = vadd.s32 %v514_v10, %v510_v46  ;;  %vm605_vm4 = vcmp.lt.s32.totalorder %v5920_v27, 2  ;;  %v612_v35 = vsel %vm604_vm9, %v4522_v5, %v4524_v60 }
 0x1aa   : > { %v1008_v37 = vsel %vm4536_vm8, %v5902_v8, %v1005_v62  ;;  %v614_v9 = vsel %vm606_vm7, %v4526_v36, %v4456_v39  ;;  %v619_v14 = vsel %vm605_vm4, %v616_v59, %v618_v22  ;;  %v4563_v58 = vshll.u32 %v580_v6, 8 }
 0x1ab   : > { %v1010_v19 = vmul.f32 %v1008_v37, %v1008_v37  ;;  %v516_v31 = vadd.s32 536870912, %v515_v28  ;;  %v623_v23 = vand.u32 65535, %v619_v14  ;;  %v624_v53 = vshrl.u32 %v619_v14, 16 }
 0x1ac   : > { %v1009_v3 = vsel %vm4536_vm8, 0, %v1007_v4  ;;  %v621_v51 = vand.u32 65535, %v4563_v58  ;;  %v622_v57 = vshrl.u32 %v4563_v58, 16  ;;  %v615_v39 = vsel %vm605_vm4, %v612_v35, %v614_v9 }
 0x1ad   : > { %v1011_v30 = vmul.f32 -0.001358992, %v1010_v19  ;;  %v1018_v52 = vmul.f32 -0.00019511016, %v1010_v19  ;;  %v4569_v12 = vshrl.u32 %v516_v31, 30  ;;  %v1026_v16 = vadd.s32 3, %v1009_v3 }
 0x1ae   : > { %v626_v34 = vmul.u32 %v624_v53, %v621_v51  ;;  %v4573_v17 = vmul.u32 %v623_v23, %v622_v57  ;;  %v625_v47 = vmul.u32 %v623_v23, %v621_v51  ;;  %v646_v48 = vshrl.u32 %v615_v39, 16 }
 0x1af   : > { %v1012_v25 = vadd.f32 0.041655596, %v1011_v30  ;;  %v1019_v26 = vadd.f32 0.008332121, %v1018_v52  ;;  %v518_v2 = vshll.u32 %v4569_v12, 30  ;;  %v645_v18 = vand.u32 65535, %v615_v39 }
 0x1b0   : > { %v629_v49 = vshll.u32 %v626_v34, 16  ;;  %v628_v11 = vmul.u32 %v624_v53, %v622_v57  ;;  %v631_v41 = vshll.u32 %v4573_v17, 16  ;;  %v1027_v43 = vand.u32 3, %v1026_v16 }
 0x1b1   : > { %v1013_v45 = vmul.f32 %v1012_v25, %v1010_v19  ;;  %v1020_v7 = vmul.f32 %v1019_v26, %v1010_v19  ;;  %v519_v42 = vsub.s32 %v515_v28, %v518_v2  ;;  %v648_v50 = vmul.u32 %v646_v48, %v621_v51 }
 0x1b2   : > { %vm633_vm12 = vc.u32 %v625_v47, %v629_v49  ;;  %v635_v61 = vadd.s32 %v629_v49, %v625_v47  ;;  %vm1025_vm15 = vweird.f32 %v5902_v8  ;;  %v649_v9 = vmul.u32 %v645_v18, %v622_v57 }
 0x1b3   : > { %v1014_v0 = vadd.f32 -0.4999988, %v1013_v45  ;;  %v1021_v13 = vadd.f32 -0.16666654, %v1020_v7  ;;  %vm520_vm13 = vcmp.lt.s32.totalorder %v519_v42, 0  ;;  %v521_v24 = vsub.s32 0, %v519_v42 }
 0x1b4   : > { %v634_v6 = vsel %vm633_vm12, 1, %v5884_v56  ;;  %vm637_vm14 = vc.u32 %v635_v61, %v631_v41  ;;  %vm1028_vm0 = vcmp.lt.s32.totalorder %v1027_v43, 2  ;;  %vm1029_vm1 = vcmp.eq.s32.totalorder %v1027_v43, 0 }
 0x1b5   : > { %v1015_v46 = vmul.f32 %v1014_v0, %v1010_v19  ;;  %v1022_v22 = vmul.f32 %v1021_v13, %v1010_v19  ;;  %v522_v44 = vsel %vm520_vm13, %v521_v24, %v519_v42  ;;  %v636_v4 = vadd.s32 %v634_v6, %v628_v11 }
 0x1b6   : > { %v523_v10 = vclz %v522_v44  ;;  %v638_v59 = vsel %vm637_vm14, 1, %v5884_v56  ;;  %vm1032_vm2 = vcmp.eq.s32.totalorder %v1027_v43, 2  ;;  %v630_v53 = vshrl.u32 %v626_v34, 16 }
 0x1b7   : > { %v1016_v62 = vadd.f32 1.0, %v1015_v46  ;;  %v1023_v28 = vadd.f32 1.0, %v1022_v22  ;;  %v640_v35 = vadd.s32 %v638_v59, %v636_v4  ;;  %v651_v3 = vshll.u32 %v648_v50, 16 }
 0x1b8   : > { %v3167_v14 = vadd.s32 4294967294, %v523_v10  ;;  %v511_v19 = vadd.s32 %v4503_v1, %v4501_v15  ;;  %v647_v30 = vmul.u32 %v645_v18, %v621_v51  ;;  %v650_v52 = vmul.u32 %v646_v48, %v622_v57 }
 0x1b9   : > { %v1024_v31 = vmul.f32 %v1023_v28, %v1008_v37  ;;  %v1033_v23 = vxor.u32 2147483648, %v1016_v62  ;;  %v641_v26 = vadd.s32 %v640_v35, %v630_v53  ;;  %v653_v2 = vshll.u32 %v649_v9, 16 }
 0x1ba   : > { %vm3168_vm10 = vcmp.lt.s32.totalorder %v3167_v14, 0  ;;  %vm655_vm3 = vc.u32 %v647_v30, %v651_v3  ;;  %v657_v7 = vadd.s32 %v651_v3, %v647_v30  ;;  %v588_v48 = vshrl.u32 %v5881_v33, %v5899_v54 }
 0x1bb   : > { %v1030_v39 = vxor.u32 2147483648, %v1024_v31  ;;  %v526_v25 = vsel %vm3168_vm10, 0, %v3167_v14  ;;  %v1034_v16 = vsel %vm1032_vm2, %v1033_v23, %v1024_v31  ;;  %v656_v34 = vsel %vm655_vm3, 1, %v5884_v56 }
 0x1bc   : > { %v527_v47 = vsub.s32 32, %v526_v25  ;;  %v531_v49 = vsub.s32 4294967266, %v526_v25  ;;  %v528_v37 = vshll.u32 %v519_v42, %v526_v25  ;;  %v658_v51 = vadd.s32 %v656_v34, %v650_v52 }
 0x1bd   : > { %v1031_v45 = vsel %vm1029_vm1, %v1016_v62, %v1030_v39  ;;  %v609_v18 = vsel %vm607_vm11, %v4526_v36, 2102212464  ;;  %vm659_vm5 = vc.u32 %v657_v7, %v653_v2  ;;  %v632_v61 = vshrl.u32 %v4573_v17, 16 }
 0x1be   : > { %v1035_v11 = vsel %vm1028_vm0, %v1031_v45, %v1034_v16  ;;  %v529_v15 = vshrl.u32 %v511_v19, %v527_v47  ;;  %v532_v1 = vadd.s32 127, %v531_v49  ;;  %v660_v0 = vsel %vm659_vm5, 1, %v5884_v56 }
 0x1bf   : > { %v1036_v57 = vsel %vm1025_vm15, nan, %v1035_v11  ;;  %v652_v13 = vshrl.u32 %v648_v50, 16  ;;  %v662_v24 = vadd.s32 %v660_v0, %v658_v51  ;;  %v608_v8 = vsel %vm604_vm9, %v588_v48, %v4522_v5 }
 0x1c0   : > { %1741 = vmatpush.msra.mxu3 %v1036_v57  ;;  %v530_v42 = vor.u32 %v529_v15, %v528_v37  ;;  %v533_v41 = vshll.u32 %v532_v1, 23  ;;  %v610_v54 = vsel %vm606_vm7, %v4524_v60, %v609_v18  ;;  %v642_v36 = vadd.s32 %v641_v26, %v632_v61 }
 0x1c1   : > { %v654_v6 = vshrl.u32 %v649_v9, 16  ;;  %v663_v46 = vadd.s32 %v662_v24, %v652_v13  ;;  %v661_v4 = vadd.s32 %v657_v7, %v653_v2  ;;  %v611_v17 = vsel %vm605_vm4, %v608_v8, %v610_v54 }
 0x1c2   : > { %v534_v43 = vor.u32 4788187, %v533_v41  ;;  %v537_v44 = vcvt.s32.f32 %v530_v42  ;;  %v665_v5 = vmul.u32 %v4563_v58, %v611_v17  ;;  %vm419_vm6 = vcmp.lt.s32.totalorder %v5916_v40, 0  ;;  %v1657_v17 = vld [vmem:[%s5783_s3] sm:$0xff] }
 0x1c3   : > { %v664_v50 = vadd.s32 %v663_v46, %v654_v6  ;;  %vm667_vm11 = vc.u32 %v642_v36, %v661_v4  ;;  %v541_v60 = vsub.s32 4, %v4569_v12  ;;  %vm4607_vm7 = vcmp.le.f32.partialorder %v417_v63, 0.7853982 }
 0x1c4   : > { %v535_v22 = vand.u32 2147483647, %v534_v43  ;;  %v666_v41 = vadd.s32 %v661_v4, %v642_v36  ;;  %vm560_vm13 = vweird.f32 %v5916_v40  ;;  %vm1685_vm15 = vcmask 261120  }
 0x1c5   : > { %v668_v59 = vadd.s32 1, %v664_v50  ;;  %v542_v58 = vsel %vm419_vm6, %v541_v60, %v4569_v12  ;;  %vm574_vm0 = vcmp.lt.s32.totalorder %v5921_v32, 0  ;;  %vm4628_vm1 = vcmp.le.f32.partialorder %v572_v29, 0.7853982 }
 0x1c6   : > { %v538_v10 = vmul.f32 %v537_v44, %v535_v22  ;;  %v544_v30 = vsel %vm4607_vm7, 0, %v542_v58  ;;  %vm715_vm5 = vweird.f32 %v5921_v32 }
 0x1c7   : > { %v669_v28 = vsel %vm667_vm11, %v668_v59, %v664_v50  ;;  %v561_v16 = vadd.s32 3, %v544_v30 }
 0x1c8   : > { %v539_v62 = vxor.u32 2147483648, %v538_v10  ;;  %v670_v9 = vadd.s32 %v669_v28, %v665_v5 }
 0x1c9   : > { %v562_v1 = vand.u32 3, %v561_v16 }
 0x1ca   : > { %v540_v27 = vsel %vm419_vm6, %v539_v62, %v538_v10  ;;  %v671_v23 = vadd.s32 536870912, %v670_v9  ;;  %v1658_v10 = vld [vmem:[%s5783_s3 + $0x8] sm:$0xff] }
 0x1cb   : > { %v543_v14 = vsel %vm4607_vm7, %v5916_v40, %v540_v27  ;;  %vm564_vm4 = vcmp.eq.s32.totalorder %v562_v1, 0  ;;  %vm567_vm12 = vcmp.eq.s32.totalorder %v562_v1, 2  ;;  %vm563_vm14 = vcmp.lt.s32.totalorder %v562_v1, 2  ;;  %v2997_v1 = vld [vmem:[%s5786_s6] sm:$0xf] }
 0x1cc   : > { %v545_v31 = vmul.f32 %v543_v14, %v543_v14  ;;  %v672_v19 = vshrl.u32 %v671_v23, 30 }
 0x1ce   : > { %v546_v53 = vmul.f32 -0.001358992, %v545_v31  ;;  %v553_v3 = vmul.f32 -0.00019511016, %v545_v31  ;;  %v673_v39 = vshll.u32 %v672_v19, 30  ;;  %v696_v60 = vsub.s32 4, %v672_v19 }
 0x1d0   : > { %v547_v63 = vadd.f32 0.041655596, %v546_v53  ;;  %v554_v52 = vadd.f32 0.008332121, %v553_v3  ;;  %v674_v2 = vsub.s32 %v670_v9, %v673_v39 }
 0x1d2   : > { %v548_v25 = vmul.f32 %v547_v63, %v545_v31  ;;  %v555_v26 = vmul.f32 %v554_v52, %v545_v31  ;;  %vm675_vm9 = vcmp.lt.s32.totalorder %v674_v2, 0  ;;  %v676_v45 = vsub.s32 0, %v674_v2 }
 0x1d4   : > { %v549_v47 = vadd.f32 -0.4999988, %v548_v25  ;;  %v556_v49 = vadd.f32 -0.16666654, %v555_v26  ;;  %v677_v12 = vsel %vm675_vm9, %v676_v45, %v674_v2  ;;  %v1664_v45 = vld [vmem:[%s5784_s4 + $0x18] sm:$0xff] }
 0x1d5   : > { %v678_v7 = vclz %v677_v12  ;;  %1682 = vperm.xlu2 %3295, %v1664_v45  }
 0x1d6   : > { %v550_v37 = vmul.f32 %v549_v47, %v545_v31  ;;  %v557_v34 = vmul.f32 %v556_v49, %v545_v31  ;;  %v1659_v31 = vld [vmem:[%s5783_s3 + $0x10] sm:$0xff] }
 0x1d7   : > { %v3170_v51 = vadd.s32 4294967294, %v678_v7 }
 0x1d8   : > { %v551_v11 = vadd.f32 1.0, %v550_v37  ;;  %v558_v15 = vadd.f32 1.0, %v557_v34 }
 0x1d9   : > { %vm3171_vm8 = vcmp.lt.s32.totalorder %v3170_v51, 0 }
 0x1da   : > { %v559_v57 = vmul.f32 %v558_v15, %v543_v14  ;;  %v568_v48 = vxor.u32 2147483648, %v551_v11  ;;  %v681_v42 = vsel %vm3171_vm8, 0, %v3170_v51  ;;  %v697_v14 = vsel %vm574_vm0, %v696_v60, %v672_v19  ;;  %v1660_v19 = vld [vmem:[%s5783_s3 + $0x18] sm:$0xff]  ;;  %v1663_v15 = vld [vmem:[%s5784_s4 + $0x10] sm:$0xff]  ;;  %v1668_v51 = vpop.permute.xlu1 %1667 }
 0x1db   : > { %v682_v61 = vsub.s32 32, %v681_v42  ;;  %v686_v0 = vsub.s32 4294967266, %v681_v42  ;;  %v683_v8 = vshll.u32 %v674_v2, %v681_v42  ;;  %v699_v58 = vsel %vm4628_vm1, 0, %v697_v14 }
 0x1dc   : > { %v565_v18 = vxor.u32 2147483648, %v559_v57  ;;  %v569_v24 = vsel %vm567_vm12, %v568_v48, %v559_v57  ;;  %v716_v52 = vadd.s32 3, %v699_v58 }
 0x1dd   : > { %v684_v54 = vshrl.u32 %v666_v41, %v682_v61  ;;  %v687_v6 = vadd.s32 127, %v686_v0  ;;  %1677 = vperm.xlu2 %3295, %v1663_v15  }
 0x1de   : > { %v566_v13 = vsel %vm564_vm4, %v551_v11, %v565_v18  ;;  %v717_v16 = vand.u32 3, %v716_v52  ;;  %v1673_v18 = vpop.permute.xlu0 %1672 }
 0x1df   : > { %v570_v43 = vsel %vm563_vm14, %v566_v13, %v569_v24  ;;  %v685_v22 = vor.u32 %v684_v54, %v683_v8  ;;  %v688_v44 = vshll.u32 %v687_v6, 23 }
 0x1e0   : > { %v571_v46 = vsel %vm560_vm13, nan, %v570_v43  ;;  %vm719_vm2 = vcmp.eq.s32.totalorder %v717_v16, 0  ;;  %vm722_vm10 = vcmp.eq.s32.totalorder %v717_v16, 2  ;;  %vm718_vm3 = vcmp.lt.s32.totalorder %v717_v16, 2 }
 0x1e1   : > { %1713 = vmatpush.msra.mxu2 %v571_v46  ;;  %v689_v36 = vor.u32 4788187, %v688_v44  ;;  %v692_v4 = vcvt.s32.f32 %v685_v22 }
 0x1e2   : > { %3190 = vmatmul.msk.f32.vlgmr.msra.gmra.mxu2 %vm1685_vm15, %v1657_v17 }
 0x1e3   : > { %v690_v40 = vand.u32 2147483647, %v689_v36 }
 0x1e5   : > { %v693_v50 = vmul.f32 %v692_v4, %v690_v40  ;;  %3000 = vperm.xlu2 %3295, %v2997_v1  }
 0x1e7   : > { %v694_v59 = vxor.u32 2147483648, %v693_v50 }
 0x1e9   : > { %v695_v5 = vsel %vm574_vm0, %v694_v59, %v693_v50 }
 0x1ea   : > { %3191 = vmatmul.msk.f32.gmra.mxu2 %vm1685_vm15, %v1658_v10  ;;  %v698_v28 = vsel %vm4628_vm1, %v5921_v32, %v695_v5 }
 0x1eb   : > { %v700_v35 = vmul.f32 %v698_v28, %v698_v28 }
 0x1ed   : > { %v701_v27 = vmul.f32 -0.001358992, %v700_v35  ;;  %v708_v9 = vmul.f32 -0.00019511016, %v700_v35 }
 0x1ef   : > { %v702_v29 = vadd.f32 0.041655596, %v701_v27  ;;  %v709_v23 = vadd.f32 0.008332121, %v708_v9 }
 0x1f1   : > { %v703_v53 = vmul.f32 %v702_v29, %v700_v35  ;;  %v710_v3 = vmul.f32 %v709_v23, %v700_v35 }
 0x1f2   : > { %3192 = vmatmul.msk.f32.gmra.mxu2 %vm1685_vm15, %v1659_v31 }
 0x1f3   : > { %v704_v30 = vadd.f32 -0.4999988, %v703_v53  ;;  %v711_v63 = vadd.f32 -0.16666654, %v710_v3 }
 0x1f5   : > { %v705_v39 = vmul.f32 %v704_v30, %v700_v35  ;;  %v712_v25 = vmul.f32 %v711_v63, %v700_v35  ;;  %v5936_v63 = vmov 920167782  }
 0x1f7   : > { %v706_v26 = vadd.f32 1.0, %v705_v39  ;;  %v713_v2 = vadd.f32 1.0, %v712_v25 }
 0x1f9   : > { %v714_v47 = vmul.f32 %v713_v2, %v698_v28  ;;  %v723_v49 = vxor.u32 2147483648, %v706_v26 }
 0x1fa   : > { %3193 = vmatmul.msk.f32.gmra.mxu2 %vm1685_vm15, %v1660_v19 }
 0x1fb   : > { %v720_v37 = vxor.u32 2147483648, %v714_v47  ;;  %v724_v12 = vsel %vm722_vm10, %v723_v49, %v714_v47 }
 0x1fd   : > { %v721_v34 = vsel %vm719_vm2, %v706_v26, %v720_v37 }
 0x1fe   : > { %v725_v7 = vsel %vm718_vm3, %v721_v34, %v724_v12 }
 0x1ff   : > { %v726_v11 = vsel %vm715_vm5, nan, %v725_v7 }
 0x200   : > { %1742 = vmatpush.msra.mxu3 %v726_v11 }
 0x201   : > { %3194 = vmatmul.msk.f32.vlgmr.msra.gmra.mxu3 %vm1685_vm15, %v1657_v17 }
 0x209   : > { %3195 = vmatmul.msk.f32.gmra.mxu3 %vm1685_vm15, %v1658_v10 }
 0x211   : > { %3196 = vmatmul.msk.f32.gmra.mxu3 %vm1685_vm15, %v1659_v31 }
 0x219   : > { %3197 = vmatmul.msk.f32.gmra.mxu3 %vm1685_vm15, %v1660_v19 }
 0x22f   : > { %v4663_v42 = vpop.permute.xlu2 %1682 }
 0x237   : > { %v1678_v6 = vpop.permute.xlu2 %1677 }
 0x265   : > { %v1715_v32 = vpop.f32.mrf.mxu2 }
 0x266   : > { %v4660_v57 = vadd.f32 %v1715_v32, %v1668_v51 }
 0x268   : > { %5929 = vst [vmem:[#allocation24_spill] sm:$0xff] %v4660_v57  ;;  %v1759_v48 = vand.u32 2139095040, %v4660_v57 }
 0x26a   : > { %v1760_v61 = vshrl.u32 %v1759_v48, 23 }
 0x26c   : > { %v3198_v24 = vadd.s32 4294967169, %v1760_v61 }
 0x26d   : > { %v1718_v41 = vpop.f32.mrf.mxu2 }
 0x26e   : > { %v4665_v0 = vadd.f32 %v1718_v41, %v1673_v18  ;;  %v1766_v54 = vadd.s32 1, %v3198_v24 }
 0x270   : > { %v2069_v13 = vand.u32 2139095040, %v4665_v0  ;;  %vm1767_vm11 = vcmp.gt.s32.totalorder %v1766_v54, 0 }
 0x271   : > { %v1768_v4 = vsel %vm1767_vm11, %v1766_v54, 0 }
 0x272   : > { %v2070_v43 = vshrl.u32 %v2069_v13, 23  ;;  %v4676_v5 = vand.u32 31, %v1768_v4  ;;  %v4693_v19 = vshrl.u32 %v1768_v4, 5 }
 0x274   : > { %v3204_v8 = vadd.s32 4294967169, %v2070_v43  ;;  %5931 = vst [vmem:[#allocation13_spill] sm:$0xff] %v4676_v5  ;;  %v4685_v31 = vsub.s32 32, %v4676_v5  ;;  %v1782_v26 = vshll.u32 %v5880_v21, %v4676_v5  ;;  %v1785_v15 = vshll.u32 %v5936_v63, %v4676_v5 }
 0x275   : > { %v1721_v46 = vpop.f32.mrf.mxu2  ;;  %5937 = vst [vmem:[#allocation15_spill] sm:$0xff] %v4693_v19  ;;  %vm1791_vm8 = vcmp.lt.s32.totalorder %v4693_v19, 4 }
 0x276   : > { %v4668_v22 = vadd.f32 %v1721_v46, %v1678_v6  ;;  %v2076_v17 = vadd.s32 1, %v3204_v8  ;;  %5934 = vst [vmem:[#allocation14_spill] sm:$0xff] %v4685_v31  ;;  %v1783_v52 = vshrl.u32 %v5936_v63, %v4685_v31  ;;  %v1786_v47 = vshrl.u32 %v5900_v38, %v4685_v31 }
 0x278   : > { %v2379_v36 = vand.u32 2139095040, %v4668_v22  ;;  %vm2077_vm6 = vcmp.gt.s32.totalorder %v2076_v17, 0  ;;  %v4706_v11 = vor.u32 %v1783_v52, %v1782_v26  ;;  %v1787_v41 = vor.u32 %v1786_v47, %v1785_v15 }
 0x279   : > { %v2078_v59 = vsel %vm2077_vm6, %v2076_v17, 0 }
 0x27a   : > { %v2380_v40 = vshrl.u32 %v2379_v36, 23  ;;  %v4680_v9 = vand.u32 31, %v2078_v59  ;;  %5938 = vst [vmem:[#allocation18_spill] sm:$0xff] %v4706_v11  ;;  %v4731_v36 = vsel %vm1791_vm8, %v1787_v41, 1326507024 }
 0x27b   : > { %5942 = vst [vmem:[#allocation17_spill] sm:$0xff] %v4731_v36 }
 0x27c   : > { %v3210_v28 = vadd.s32 4294967169, %v2380_v40  ;;  %5932 = vst [vmem:[#allocation23_spill] sm:$0xff] %v4680_v9  ;;  %v4688_v53 = vsub.s32 32, %v4680_v9  ;;  %v2092_v1 = vshll.u32 %v5880_v21, %v4680_v9  ;;  %v2095_v48 = vshll.u32 %v5936_v63, %v4680_v9 }
 0x27d   : > { %v1724_v10 = vpop.f32.mrf.mxu2 }
 0x27e   : > { %v4674_v62 = vadd.f32 %v1724_v10, %v4663_v42  ;;  %v2386_v29 = vadd.s32 1, %v3210_v28  ;;  %5935 = vst [vmem:[#allocation22_spill] sm:$0xff] %v4688_v53  ;;  %v2093_v49 = vshrl.u32 %v5936_v63, %v4688_v53  ;;  %v2096_v45 = vshrl.u32 %v5900_v38, %v4688_v53 }
 0x280   : > { %v2689_v27 = vand.u32 2139095040, %v4674_v62  ;;  %vm2387_vm7 = vcmp.gt.s32.totalorder %v2386_v29, 0  ;;  %v4716_v61 = vor.u32 %v2093_v49, %v2092_v1  ;;  %v2097_v43 = vor.u32 %v2096_v45, %v2095_v48 }
 0x281   : > { %v2388_v34 = vsel %vm2387_vm7, %v2386_v29, 0 }
 0x282   : > { %v2690_v23 = vshrl.u32 %v2689_v27, 23  ;;  %5940 = vst [vmem:[#allocation16_spill] sm:$0xff] %v4716_v61  ;;  %v4718_v13 = vand.u32 31, %v2388_v34  ;;  %v4750_v27 = vshrl.u32 %v2388_v34, 5 }
 0x284   : > { %v1744_v44 = vpop.f32.mrf.mxu3  ;;  %v3216_v3 = vadd.s32 4294967169, %v2690_v23  ;;  %v4739_v4 = vsub.s32 32, %v4718_v13  ;;  %vm2411_vm1 = vcmp.lt.s32.totalorder %v4750_v27, 4 }
 0x285   : > { %v4671_v50 = vadd.f32 %v1744_v44, %v1668_v51  ;;  %v4712_v51 = vshrl.u32 %v2078_v59, 5 }
 0x286   : > { %v2696_v25 = vadd.s32 1, %v3216_v3  ;;  %v2403_v52 = vshrl.u32 %v5936_v63, %v4739_v4 }
 0x287   : > { %5930 = vst [vmem:[#allocation25_spill] sm:$0xff] %v4671_v50  ;;  %v1914_v35 = vand.u32 2139095040, %v4671_v50  ;;  %vm2101_vm12 = vcmp.lt.s32.totalorder %v4712_v51, 4 }
 0x288   : > { %vm2697_vm9 = vcmp.gt.s32.totalorder %v2696_v25, 0  ;;  %5939 = vst [vmem:[#allocation11_spill] sm:$0xff] %v4712_v51  ;;  %v4736_v40 = vsel %vm2101_vm12, %v4716_v61, 920167782  ;;  %v4746_v59 = vsel %vm2101_vm12, %v2097_v43, 1326507024 }
 0x289   : > { %v1915_v58 = vshrl.u32 %v1914_v35, 23  ;;  %v2698_v7 = vsel %vm2697_vm9, %v2696_v25, 0  ;;  %5943 = vst [vmem:[#allocation21_spill] sm:$0xff] %v4736_v40 }
 0x28a   : > { %v2700_v24 = vand.u32 31, %v2698_v7  ;;  %5944 = vst [vmem:[#allocation5_spill] sm:$0xff] %v4746_v59  ;;  %v4766_v47 = vshrl.u32 %v2698_v7, 5 }
 0x28b   : > { %v3201_v2 = vadd.s32 4294967169, %v1915_v58  ;;  %v2405_v58 = vshll.u32 %v5936_v63, %v4718_v13 }
 0x28c   : > { %v1747_v60 = vpop.f32.mrf.mxu3  ;;  %v4727_v17 = vsub.s32 32, %v2700_v24  ;;  %v2712_v3 = vshll.u32 %v5880_v21, %v2700_v24  ;;  %v2715_v25 = vshll.u32 %v5936_v63, %v2700_v24  ;;  %v2703_v34 = vshll.u32 %v5881_v33, %v2700_v24 }
 0x28d   : > { %v4682_v14 = vadd.f32 %v1747_v60, %v1673_v18  ;;  %v1921_v32 = vadd.s32 1, %v3201_v2  ;;  %v2406_v2 = vshrl.u32 %v5900_v38, %v4739_v4  ;;  %v2709_v41 = vshll.u32 %v5886_v20, %v2700_v24 }
 0x28e   : > { %v2713_v28 = vshrl.u32 %v5936_v63, %v4727_v17  ;;  %v2716_v29 = vshrl.u32 %v5900_v38, %v4727_v17  ;;  %v2707_v48 = vshrl.u32 %v5886_v20, %v4727_v17  ;;  %v2710_v43 = vshrl.u32 %v5880_v21, %v4727_v17 }
 0x28f   : > { %5933 = vst [vmem:[#allocation7_spill] sm:$0xff] %v4682_v14  ;;  %v2224_v30 = vand.u32 2139095040, %v4682_v14  ;;  %vm1922_vm4 = vcmp.gt.s32.totalorder %v1921_v32, 0  ;;  %vm2721_vm0 = vcmp.lt.s32.totalorder %v4766_v47, 4  ;;  %vm2718_vm2 = vcmp.lt.s32.totalorder %v4766_v47, 1 }
 0x290   : > { %v1923_v35 = vsel %vm1922_vm4, %v1921_v32, 0  ;;  %v2714_v49 = vor.u32 %v2713_v28, %v2712_v3  ;;  %v2717_v45 = vor.u32 %v2716_v29, %v2715_v25  ;;  %v2706_v32 = vshll.u32 %v5885_v55, %v2700_v24 }
 0x291   : > { %v2225_v37 = vshrl.u32 %v2224_v30, 23  ;;  %v5827_v30 = vand.u32 2147483647, %v4674_v62  ;;  %v2711_v29 = vor.u32 %v2710_v43, %v2709_v41  ;;  %vm2720_vm3 = vcmp.lt.s32.totalorder %v4766_v47, 3 }
 0x292   : > { %v2727_v28 = vsel %vm2721_vm0, %v2714_v49, 920167782  ;;  %v2731_v24 = vsel %vm2721_vm0, %v2717_v45, 1326507024  ;;  %vm2719_vm5 = vcmp.lt.s32.totalorder %v4766_v47, 2  ;;  %v2396_v47 = vshll.u32 %v5885_v55, %v4718_v13 }
 0x293   : > { %v3207_v8 = vadd.s32 4294967169, %v2225_v37  ;;  %v2693_v1 = vand.u32 8388607, %v5827_v30 }
 0x294   : > { %v1750_v39 = vpop.f32.mrf.mxu3 }
 0x295   : > { %v4697_v16 = vadd.f32 %v1750_v39, %v1678_v6  ;;  %v4724_v6 = vsel %vm1791_vm8, %v4706_v11, 920167782  ;;  %v2231_v60 = vadd.s32 1, %v3207_v8  ;;  %v4781_v8 = vand.u32 31, %v1923_v35 }
 0x296   : > { %5941 = vst [vmem:[#allocation19_spill] sm:$0xff] %v4724_v6  ;;  %v2694_v3 = vor.u32 8388608, %v2693_v1 }
 0x297   : > { %v2534_v12 = vand.u32 2139095040, %v4697_v16  ;;  %vm2232_vm14 = vcmp.gt.s32.totalorder %v2231_v60, 0  ;;  %5945 = vst [vmem:[#allocation8_spill] sm:$0xff] %v4781_v8  ;;  %v4817_v45 = vsub.s32 32, %v4781_v8 }
 0x299   : > { %v2535_v18 = vshrl.u32 %v2534_v12, 23  ;;  %v2704_v12 = vshrl.u32 %v5885_v55, %v4727_v17  ;;  %5949 = vst [vmem:[#allocation6_spill] sm:$0xff] %v4817_v45 }
 0x29b   : > { %v3213_v54 = vadd.s32 4294967169, %v2535_v18  ;;  %v2705_v18 = vor.u32 %v2704_v12, %v2703_v34 }
 0x29c   : > { %v1753_v46 = vpop.f32.mrf.mxu3 }
 0x29d   : > { %v2541_v44 = vadd.s32 1, %v3213_v54  ;;  %v4742_v10 = vadd.f32 %v1753_v46, %v4663_v42  ;;  %v2402_v42 = vshll.u32 %v5880_v21, %v4718_v13  ;;  %v4786_v46 = vor.u32 %v2707_v48, %v2706_v32 }
 0x29f   : > { %vm2542_vm13 = vcmp.gt.s32.totalorder %v2541_v44, 0  ;;  %v2844_v23 = vand.u32 2139095040, %v4742_v10  ;;  %v4783_v54 = vor.u32 %v2403_v52, %v2402_v42  ;;  %v2730_v25 = vsel %vm2718_vm2, %v4786_v46, %v2711_v29 }
 0x2a0   : > { %v2543_v39 = vsel %vm2542_vm13, %v2541_v44, 0  ;;  %v4789_v44 = vsel %vm2232_vm14, %v2231_v60, 0  ;;  %v2726_v60 = vsel %vm2718_vm2, %v2705_v18, %v4786_v46 }
 0x2a1   : > { %v2845_v26 = vshrl.u32 %v2844_v23, 23  ;;  %v4771_v15 = vand.u32 31, %v2543_v39  ;;  %5946 = vst [vmem:[#allocation10_spill] sm:$0xff] %v4789_v44  ;;  %v2407_v23 = vor.u32 %v2406_v2, %v2405_v58  ;;  %v4805_v52 = vand.u32 31, %v4789_v44 }
 0x2a2   : > { %v2728_v58 = vsel %vm2720_vm3, %v2711_v29, %v2727_v28  ;;  %v4814_v2 = vshrl.u32 %v1923_v35, 5 }
 0x2a3   : > { %v3219_v37 = vadd.s32 4294967169, %v2845_v26  ;;  %v4798_v42 = vsub.s32 32, %v4771_v15  ;;  %5947 = vst [vmem:[#allocation20_spill] sm:$0xff] %v4805_v52  ;;  %v2732_v26 = vsel %vm2720_vm3, %v2714_v49, %v2731_v24  ;;  %v2729_v12 = vsel %vm2719_vm5, %v2726_v60, %v2728_v58 }
 0x2a4   : > { %5948 = vst [vmem:[#allocation12_spill] sm:$0xff] %v4814_v2  ;;  %v2733_v1 = vsel %vm2719_vm5, %v2730_v25, %v2732_v26  ;;  %v4829_v49 = vshll.u32 %v2694_v3, 8  ;;  %v4833_v35 = vsel %vm2411_vm1, %v2407_v23, 1326507024  ;;  %v4838_v43 = vsub.s32 32, %v4805_v52 }
 0x2a5   : > { %v2851_v7 = vadd.s32 1, %v3219_v37  ;;  %v4822_v37 = vsel %vm2411_vm1, %v4783_v54, 920167782  ;;  %v2558_v32 = vshrl.u32 %v5936_v63, %v4798_v42  ;;  %v2737_v48 = vand.u32 65535, %v2733_v1 }
 0x2a6   : > { %v2738_v41 = vshrl.u32 %v2733_v1, 16  ;;  %v2736_v28 = vshrl.u32 %v4829_v49, 16  ;;  %v2760_v24 = vshrl.u32 %v2729_v12, 16  ;;  %v4844_v3 = vshll.u32 %v5880_v21, %v4805_v52 }
 0x2a7   : > { %vm2852_vm10 = vcmp.gt.s32.totalorder %v2851_v7, 0  ;;  %v2557_v23 = vshll.u32 %v5880_v21, %v4771_v15  ;;  %v2759_v58 = vand.u32 65535, %v2729_v12  ;;  %v4850_v25 = vshrl.u32 %v2543_v39, 5 }
 0x2a8   : > { %v2853_v34 = vsel %vm2852_vm10, %v2851_v7, 0  ;;  %v2735_v7 = vand.u32 65535, %v4829_v49  ;;  %5950 = vst [vmem:[#allocation9_spill] sm:$0xff] %v4844_v3  ;;  %v2702_v26 = vshrl.u32 %v5881_v33, %v4727_v17  ;;  %v2741_v30 = vmul.u32 %v2737_v48, %v2736_v28 }
 0x2a9   : > { %v4848_v60 = vand.u32 31, %v2853_v34  ;;  %v4854_v50 = vor.u32 %v2558_v32, %v2557_v23  ;;  %v4858_v2 = vshll.u32 %v5936_v63, %v4771_v15  ;;  %v4862_v8 = vshrl.u32 %v5900_v38, %v4798_v42 }
 0x2aa   : > { %v2740_v1 = vmul.u32 %v2738_v41, %v2735_v7  ;;  %v2762_v45 = vmul.u32 %v2760_v24, %v2735_v7  ;;  %v4864_v6 = vshrl.u32 %v2853_v34, 5  ;;  %v2722_v39 = vsel %vm2718_vm2, %v2702_v26, %v2705_v18 }
 0x2ab   : > { %v2739_v12 = vmul.u32 %v2737_v48, %v2735_v7  ;;  %v4869_v11 = vsub.s32 32, %v4848_v60  ;;  %v2761_v32 = vmul.u32 %v2759_v58, %v2735_v7  ;;  %v2763_v23 = vmul.u32 %v2759_v58, %v2736_v28 }
 0x2ac   : > { %v2743_v17 = vshll.u32 %v2740_v1, 16  ;;  %v2765_v36 = vshll.u32 %v2762_v45, 16  ;;  %v2742_v19 = vmul.u32 %v2738_v41, %v2736_v28  ;;  %v2745_v31 = vshll.u32 %v2741_v30, 16 }
 0x2ad   : > { %v2764_v14 = vmul.u32 %v2760_v24, %v2736_v28  ;;  %v2767_v34 = vshll.u32 %v2763_v23, 16  ;;  %v2723_v26 = vsel %vm2721_vm0, %v2711_v29, 2102212464  ;;  %v5845_v41 = vand.u32 2147483647, %v4742_v10 }
 0x2ae   : > { %vm2747_vm11 = vc.u32 %v2739_v12, %v2743_v17  ;;  %v2749_v5 = vadd.s32 %v2743_v17, %v2739_v12  ;;  %vm2769_vm6 = vc.u32 %v2761_v32, %v2765_v36  ;;  %v2771_v48 = vadd.s32 %v2765_v36, %v2761_v32 }
 0x2af   : > { %v2748_v57 = vsel %vm2747_vm11, 1, %v5884_v56  ;;  %v2770_v18 = vsel %vm2769_vm6, 1, %v5884_v56  ;;  %v2868_v12 = vshrl.u32 %v5936_v63, %v4869_v11  ;;  %v2744_v17 = vshrl.u32 %v2740_v1, 16 }
 0x2b0   : > { %v2750_v40 = vadd.s32 %v2748_v57, %v2742_v19  ;;  %vm2751_vm7 = vc.u32 %v2749_v5, %v2745_v31  ;;  %v2772_v58 = vadd.s32 %v2770_v18, %v2764_v14  ;;  %vm2773_vm9 = vc.u32 %v2771_v48, %v2767_v34 }
 0x2b1   : > { %v2752_v7 = vsel %vm2751_vm7, 1, %v5884_v56  ;;  %v2871_v57 = vshrl.u32 %v5900_v38, %v4869_v11  ;;  %v2746_v5 = vshrl.u32 %v2741_v30, 16  ;;  %v2774_v31 = vsel %vm2773_vm9, 1, %v5884_v56 }
 0x2b2   : > { %v2754_v28 = vadd.s32 %v2752_v7, %v2750_v40  ;;  %v2848_v19 = vand.u32 8388607, %v5845_v41  ;;  %v2766_v29 = vshrl.u32 %v2762_v45, 16  ;;  %v2776_v14 = vadd.s32 %v2774_v31, %v2772_v58 }
 0x2b3   : > { %v5846_v24 = vand.u32 2147483647, %v4668_v22  ;;  %v2867_v32 = vshll.u32 %v5880_v21, %v4848_v60  ;;  %v2870_v40 = vshll.u32 %v5936_v63, %v4848_v60  ;;  %v2724_v30 = vsel %vm2720_vm3, %v4786_v46, %v2723_v26 }
 0x2b4   : > { %v2755_v36 = vadd.s32 %v2754_v28, %v2744_v17  ;;  %v2849_v1 = vor.u32 8388608, %v2848_v19  ;;  %vm2566_vm4 = vcmp.lt.s32.totalorder %v4850_v25, 4  ;;  %v2768_v7 = vshrl.u32 %v2763_v23, 16 }
 0x2b5   : > { %v2777_v17 = vadd.s32 %v2776_v14, %v2766_v29  ;;  %v2562_v45 = vor.u32 %v4862_v8, %v4858_v2  ;;  %v2869_v58 = vor.u32 %v2868_v12, %v2867_v32  ;;  %v2872_v28 = vor.u32 %v2871_v57, %v2870_v40 }
 0x2b6   : > { %v2756_v18 = vadd.s32 %v2755_v36, %v2746_v5  ;;  %v2775_v31 = vadd.s32 %v2771_v48, %v2767_v34  ;;  %v4898_v41 = vsel %vm2566_vm4, %v4854_v50, 920167782  ;;  %v2725_v46 = vsel %vm2719_vm5, %v2722_v39, %v2724_v30 }
 0x2b7   : > { %v2778_v26 = vadd.s32 %v2777_v17, %v2768_v7  ;;  %v2383_v5 = vand.u32 8388607, %v5846_v24  ;;  %vm2876_vm13 = vcmp.lt.s32.totalorder %v4864_v6, 4  ;;  %v4905_v23 = vshll.u32 %v2849_v1, 8 }
 0x2b8   : > { %vm2781_vm14 = vc.u32 %v2756_v18, %v2775_v31  ;;  %v2393_v8 = vshll.u32 %v5881_v33, %v4718_v13  ;;  %v2394_v34 = vshrl.u32 %v5885_v55, %v4739_v4  ;;  %v2397_v39 = vshrl.u32 %v5886_v20, %v4739_v4 }
 0x2b9   : > { %v2782_v2 = vadd.s32 1, %v2778_v26  ;;  %v4917_v48 = vsel %vm2566_vm4, %v2562_v45, 1326507024  ;;  %v2882_v12 = vsel %vm2876_vm13, %v2869_v58, 920167782  ;;  %v2779_v19 = vmul.u32 %v4829_v49, %v2725_v46 }
 0x2ba   : > { %v2886_v57 = vsel %vm2876_vm13, %v2872_v28, 1326507024  ;;  %v4924_v36 = vadd.s32 %v2775_v31, %v2756_v18  ;;  %v2384_v14 = vor.u32 8388608, %v2383_v5  ;;  %v4928_v32 = vshrl.u32 %v5881_v33, %v4739_v4 }
 0x2bb   : > { %v2783_v29 = vsel %vm2781_vm14, %v2782_v2, %v2778_v26  ;;  %v2890_v30 = vand.u32 65535, %v4905_v23  ;;  %v2399_v1 = vshll.u32 %v5886_v20, %v4718_v13  ;;  %v2400_v7 = vshrl.u32 %v5880_v21, %v4739_v4 }
 0x2bc   : > { %v2784_v40 = vadd.s32 %v2783_v29, %v2779_v19  ;;  %v2858_v49 = vshll.u32 %v5881_v33, %v4848_v60  ;;  %v4938_v18 = vshrl.u32 %v4905_v23, 16  ;;  %v4940_v17 = vor.u32 %v2394_v34, %v2393_v8 }
 0x2bd   : > { %v4942_v45 = vor.u32 %v2397_v39, %v2396_v47  ;;  %v2859_v31 = vshrl.u32 %v5885_v55, %v4869_v11  ;;  %v2861_v13 = vshll.u32 %v5885_v55, %v4848_v60  ;;  %v2862_v4 = vshrl.u32 %v5886_v20, %v4869_v11 }
 0x2be   : > { %v2785_v28 = vadd.s32 536870912, %v2784_v40  ;;  %v2864_v46 = vshll.u32 %v5886_v20, %v4848_v60  ;;  %v2865_v26 = vshrl.u32 %v5880_v21, %v4869_v11  ;;  %vm2408_vm0 = vcmp.lt.s32.totalorder %v4750_v27, 1 }
 0x2bf   : > { %vm2409_vm2 = vcmp.lt.s32.totalorder %v4750_v27, 2  ;;  %v2860_v8 = vor.u32 %v2859_v31, %v2858_v49  ;;  %v2863_v2 = vor.u32 %v2862_v4, %v2861_v13  ;;  %v4956_v34 = vor.u32 %v2400_v7, %v2399_v1 }
 0x2c0   : > { %v2786_v5 = vshrl.u32 %v2785_v28, 30  ;;  %vm2688_vm10 = vcmp.lt.s32.totalorder %v4674_v62, 0  ;;  %v2866_v47 = vor.u32 %v2865_v26, %v2864_v46  ;;  %vm2873_vm3 = vcmp.lt.s32.totalorder %v4864_v6, 1 }
 0x2c1   : > { %vm2410_vm5 = vcmp.lt.s32.totalorder %v4750_v27, 3  ;;  %v2416_v60 = vsel %vm2408_vm0, %v4940_v17, %v4942_v45  ;;  %vm2875_vm11 = vcmp.lt.s32.totalorder %v4864_v6, 3  ;;  %v2881_v19 = vsel %vm2873_vm3, %v2860_v8, %v2863_v2 }
 0x2c2   : > { %v2787_v39 = vshll.u32 %v2786_v5, 30  ;;  %v2422_v29 = vsel %vm2410_vm5, %v4783_v54, %v4833_v35  ;;  %vm2874_vm6 = vcmp.lt.s32.totalorder %v4864_v6, 2  ;;  %v2883_v1 = vsel %vm2875_vm11, %v2866_v47, %v2882_v12 }
 0x2c3   : > { %v2885_v7 = vsel %vm2873_vm3, %v2863_v2, %v2866_v47  ;;  %v2887_v49 = vsel %vm2875_vm11, %v2869_v58, %v2886_v57  ;;  %v2884_v31 = vsel %vm2874_vm6, %v2881_v19, %v2883_v1  ;;  %v2418_v54 = vsel %vm2410_vm5, %v4956_v34, %v4822_v37 }
 0x2c4   : > { %v2788_v28 = vsub.s32 %v2784_v40, %v2787_v39  ;;  %v4985_v35 = vshll.u32 %v2384_v14, 8  ;;  %v2810_v13 = vsub.s32 4, %v2786_v5  ;;  %v2857_v12 = vshrl.u32 %v5881_v33, %v4869_v11 }
 0x2c5   : > { %v2888_v4 = vsel %vm2874_vm6, %v2885_v7, %v2887_v49  ;;  %v2420_v58 = vsel %vm2408_vm0, %v4942_v45, %v4956_v34  ;;  %v5951_v57 = vand.u32 2147483647, %v4674_v62  ;;  %v2878_v11 = vsel %vm2876_vm13, %v2866_v47, 2102212464 }
 0x2c6   : > { %vm2789_vm9 = vcmp.lt.s32.totalorder %v2788_v28, 0  ;;  %v2790_v37 = vsub.s32 0, %v2788_v28  ;;  %v2892_v14 = vand.u32 65535, %v2888_v4  ;;  %v2893_v46 = vshrl.u32 %v2888_v4, 16 }
 0x2c7   : > { %vm4997_vm7 = vcmp.le.f32.partialorder %v5951_v57, 0.7853982  ;;  %v2914_v26 = vand.u32 65535, %v2884_v31  ;;  %v2915_v39 = vshrl.u32 %v2884_v31, 16  ;;  %v5005_v19 = vsel %vm2409_vm2, %v2416_v60, %v2418_v54 }
 0x2c8   : > { %v2791_v1 = vsel %vm2789_vm9, %v2790_v37, %v2788_v28  ;;  %v2895_v7 = vmul.u32 %v2893_v46, %v2890_v30  ;;  %v2896_v49 = vmul.u32 %v2892_v14, %v4938_v18  ;;  %v5010_v57 = vsel %vm2409_vm2, %v2420_v58, %v2422_v29 }
 0x2c9   : > { %v2792_v24 = vclz %v2791_v1  ;;  %v2877_v4 = vsel %vm2873_vm3, %v2857_v12, %v2860_v8  ;;  %v2917_v61 = vmul.u32 %v2915_v39, %v2890_v30  ;;  %v5015_v47 = vand.u32 65535, %v4985_v35 }
 0x2ca   : > { %v5019_v60 = vsel %vm2688_vm10, %v2810_v13, %v2786_v5  ;;  %v2879_v31 = vsel %vm2875_vm11, %v2863_v2, %v2878_v11  ;;  %v2894_v54 = vmul.u32 %v2892_v14, %v2890_v30  ;;  %v2898_v37 = vshll.u32 %v2895_v7, 16 }
 0x2cb   : > { %v3217_v59 = vadd.s32 4294967294, %v2792_v24  ;;  %v2916_v29 = vmul.u32 %v2914_v26, %v2890_v30  ;;  %v2918_v58 = vmul.u32 %v2914_v26, %v4938_v18  ;;  %v2920_v1 = vshll.u32 %v2917_v61, 16 }
 0x2cc   : > { %v2897_v8 = vmul.u32 %v2893_v46, %v4938_v18  ;;  %v2900_v12 = vshll.u32 %v2896_v49, 16  ;;  %vm2902_vm13 = vc.u32 %v2894_v54, %v2898_v37  ;;  %v2904_v51 = vadd.s32 %v2898_v37, %v2894_v54 }
 0x2cd   : > { %vm3218_vm14 = vcmp.lt.s32.totalorder %v3217_v59, 0  ;;  %v2903_v3 = vsel %vm2902_vm13, 1, %v5884_v56  ;;  %v2919_v5 = vmul.u32 %v2915_v39, %v4938_v18  ;;  %vm2924_vm3 = vc.u32 %v2916_v29, %v2920_v1 }
 0x2ce   : > { %v2795_v13 = vsel %vm3218_vm14, 0, %v3217_v59  ;;  %v2905_v2 = vadd.s32 %v2903_v3, %v2897_v8  ;;  %vm2906_vm11 = vc.u32 %v2904_v51, %v2900_v12  ;;  %v2925_v24 = vsel %vm2924_vm3, 1, %v5884_v56 }
 0x2cf   : > { %v2796_v30 = vsub.s32 32, %v2795_v13  ;;  %v2800_v14 = vsub.s32 4294967266, %v2795_v13  ;;  %v2922_v11 = vshll.u32 %v2918_v58, 16  ;;  %v2907_v26 = vsel %vm2906_vm11, 1, %v5884_v56 }
 0x2d0   : > { %v2926_v54 = vadd.s32 %v2920_v1, %v2916_v29  ;;  %v2927_v37 = vadd.s32 %v2925_v24, %v2919_v5  ;;  %v2427_v52 = vand.u32 65535, %v5010_v57  ;;  %v2797_v18 = vshll.u32 %v2788_v28, %v2795_v13 }
 0x2d1   : > { %v2798_v59 = vshrl.u32 %v4924_v36, %v2796_v30  ;;  %v2801_v3 = vadd.s32 127, %v2800_v14  ;;  %v2899_v51 = vshrl.u32 %v2895_v7, 16  ;;  %v2901_v39 = vshrl.u32 %v2896_v49, 16 }
 0x2d2   : > { %v2909_v8 = vadd.s32 %v2907_v26, %v2905_v2  ;;  %vm2928_vm9 = vc.u32 %v2926_v54, %v2922_v11  ;;  %v2426_v12 = vshrl.u32 %v4985_v35, 16  ;;  %v2428_v9 = vshrl.u32 %v5010_v57, 16 }
 0x2d3   : > { %v2799_v44 = vor.u32 %v2798_v59, %v2797_v18  ;;  %v2802_v53 = vshll.u32 %v2801_v3, 23  ;;  %v2929_v46 = vsel %vm2928_vm9, 1, %v5884_v56  ;;  %v2921_v1 = vshrl.u32 %v2917_v61, 16 }
 0x2d4   : > { %v2910_v29 = vadd.s32 %v2909_v8, %v2899_v51  ;;  %v2931_v5 = vadd.s32 %v2929_v46, %v2927_v37  ;;  %v5037_v24 = vmul.u32 %v2427_v52, %v2426_v12  ;;  %v2880_v36 = vsel %vm2874_vm6, %v2877_v4, %v2879_v31 }
 0x2d5   : > { %v2803_v28 = vor.u32 4788187, %v2802_v53  ;;  %v2923_v7 = vshrl.u32 %v2918_v58, 16  ;;  %v2430_v49 = vmul.u32 %v2428_v9, %v5015_v47  ;;  %v5044_v2 = vadd.s32 %v2926_v54, %v2922_v11 }
 0x2d6   : > { %v5042_v13 = vadd.s32 %v2910_v29, %v2901_v39  ;;  %v2932_v30 = vadd.s32 %v2931_v5, %v2921_v1  ;;  %v2429_v14 = vmul.u32 %v2427_v52, %v5015_v47  ;;  %v2806_v26 = vcvt.s32.f32 %v2799_v44 }
 0x2d7   : > { %v2804_v57 = vand.u32 2147483647, %v2803_v28  ;;  %v2433_v61 = vshll.u32 %v2430_v49, 16  ;;  %v2449_v46 = vand.u32 65535, %v5005_v19  ;;  %v2432_v53 = vmul.u32 %v2428_v9, %v2426_v12 }
 0x2d8   : > { %v2933_v37 = vadd.s32 %v2932_v30, %v2923_v7  ;;  %v2435_v6 = vshll.u32 %v5037_v24, 16  ;;  %v2450_v4 = vshrl.u32 %v5005_v19, 16  ;;  %vm2936_vm6 = vc.u32 %v5042_v13, %v5044_v2 }
 0x2d9   : > { %v2807_v31 = vmul.f32 %v2806_v26, %v2804_v57  ;;  %vm2437_vm13 = vc.u32 %v2429_v14, %v2433_v61  ;;  %v2439_v58 = vadd.s32 %v2433_v61, %v2429_v14  ;;  %v2453_v54 = vmul.u32 %v2449_v46, %v2426_v12 }
 0x2da   : > { %v2937_v11 = vadd.s32 1, %v2933_v37  ;;  %v2438_v52 = vsel %vm2437_vm13, 1, %v5884_v56  ;;  %v2452_v44 = vmul.u32 %v2450_v4, %v5015_v47  ;;  %v2934_v59 = vmul.u32 %v4905_v23, %v2880_v36 }
 0x2db   : > { %v2808_v18 = vxor.u32 2147483648, %v2807_v31  ;;  %v2440_v9 = vadd.s32 %v2438_v52, %v2432_v53  ;;  %vm2441_vm14 = vc.u32 %v2439_v58, %v2435_v6  ;;  %v2451_v51 = vmul.u32 %v2449_v46, %v5015_v47 }
 0x2dc   : > { %v2938_v3 = vsel %vm2936_vm6, %v2937_v11, %v2933_v37  ;;  %v2442_v19 = vsel %vm2441_vm14, 1, %v5884_v56  ;;  %v2455_v39 = vshll.u32 %v2452_v44, 16  ;;  %v2454_v5 = vmul.u32 %v2450_v4, %v2426_v12 }
 0x2dd   : > { %v2809_v8 = vsel %vm2688_vm10, %v2808_v18, %v2807_v31  ;;  %v2939_v29 = vadd.s32 %v2938_v3, %v2934_v59  ;;  %v2444_v1 = vadd.s32 %v2442_v19, %v2440_v9  ;;  %v2457_v23 = vshll.u32 %v2453_v54, 16 }
 0x2de   : > { %v5062_v28 = vsel %vm4997_vm7, %v4674_v62, %v2809_v8  ;;  %vm2459_vm3 = vc.u32 %v2451_v51, %v2455_v39  ;;  %v2461_v36 = vadd.s32 %v2455_v39, %v2451_v51  ;;  %v2413_v47 = vsel %vm2411_vm1, %v4956_v34, 2102212464 }
 0x2df   : > { %v2814_v7 = vmul.f32 %v5062_v28, %v5062_v28  ;;  %v2940_v30 = vadd.s32 536870912, %v2939_v29  ;;  %v2460_v14 = vsel %vm2459_vm3, 1, %v5884_v56  ;;  %v5954_v12 = vsel %vm4997_vm7, 0, %v5019_v60 }
 0x2e0   : > { %v2830_v57 = vadd.s32 3, %v5954_v12  ;;  %v2434_v26 = vshrl.u32 %v2430_v49, 16  ;;  %v2462_v61 = vadd.s32 %v2460_v14, %v2454_v5  ;;  %vm2463_vm10 = vc.u32 %v2461_v36, %v2457_v23 }
 0x2e1   : > { %v5076_v46 = vshrl.u32 %v5936_v63, %v4838_v43  ;;  %v2815_v37 = vmul.f32 -0.001358992, %v2814_v7  ;;  %v2822_v53 = vmul.f32 -0.00019511016, %v2814_v7  ;;  %v2941_v6 = vshrl.u32 %v2940_v30, 30 }
 0x2e2   : > { %v2412_v34 = vsel %vm2408_vm0, %v4928_v32, %v4940_v17  ;;  %v2445_v4 = vadd.s32 %v2444_v1, %v2434_v26  ;;  %v2464_v40 = vsel %vm2463_vm10, 1, %v5884_v56  ;;  %v2531_v60 = vand.u32 2147483647, %v4697_v16 }
 0x2e3   : > { %v2816_v49 = vadd.f32 0.041655596, %v2815_v37  ;;  %v2823_v31 = vadd.f32 0.008332121, %v2822_v53  ;;  %v2942_v58 = vshll.u32 %v2941_v6, 30  ;;  %v2414_v11 = vsel %vm2410_vm5, %v4942_v45, %v2413_v47 }
 0x2e4   : > { %v5087_v52 = vand.u32 3, %v2830_v57  ;;  %v2436_v18 = vshrl.u32 %v5037_v24, 16  ;;  %v2456_v59 = vshrl.u32 %v2452_v44, 16  ;;  %v2466_v9 = vadd.s32 %v2464_v40, %v2462_v61 }
 0x2e5   : > { %v2817_v3 = vmul.f32 %v2816_v49, %v2814_v7  ;;  %v2824_v32 = vmul.f32 %v2823_v31, %v2814_v7  ;;  %vm2843_vm1 = vcmp.lt.s32.totalorder %v4742_v10, 0  ;;  %v5091_v17 = vsub.s32 %v2939_v29, %v2942_v58 }
 0x2e6   : > { %v2415_v19 = vsel %vm2409_vm2, %v2412_v34, %v2414_v11  ;;  %v5095_v51 = vadd.s32 %v2445_v4, %v2436_v18  ;;  %v2458_v39 = vshrl.u32 %v2453_v54, 16  ;;  %v2467_v8 = vadd.s32 %v2466_v9, %v2456_v59 }
 0x2e7   : > { %v2818_v45 = vadd.f32 -0.4999988, %v2817_v3  ;;  %v2825_v1 = vadd.f32 -0.16666654, %v2824_v32  ;;  %vm2944_vm0 = vcmp.lt.s32.totalorder %v5091_v17, 0  ;;  %v2945_v24 = vsub.s32 0, %v5091_v17 }
 0x2e8   : > { %vm2833_vm5 = vcmp.eq.s32.totalorder %v5087_v52, 0  ;;  %vm2836_vm7 = vcmp.eq.s32.totalorder %v5087_v52, 2  ;;  %v2935_v44 = vadd.s32 %v5044_v2, %v5042_v13  ;;  %v5103_v29 = vadd.s32 %v2461_v36, %v2457_v23 }
 0x2e9   : > { %v2468_v27 = vadd.s32 %v2467_v8, %v2458_v39  ;;  %v5107_v54 = vand.u32 8388607, %v2531_v60  ;;  %v2819_v5 = vmul.f32 %v2818_v45, %v2814_v7  ;;  %v2826_v30 = vmul.f32 %v2825_v1, %v2814_v7 }
 0x2ea   : > { %vm2832_vm2 = vcmp.lt.s32.totalorder %v5087_v52, 2  ;;  %v2946_v47 = vsel %vm2944_vm0, %v2945_v24, %v5091_v17  ;;  %v2469_v14 = vmul.u32 %v4985_v35, %v2415_v19  ;;  %vm2829_vm11 = vweird.f32 %v4674_v62 }
 0x2eb   : > { %v5955_v12 = vand.u32 2147483647, %v4742_v10  ;;  %v2947_v2 = vclz %v2946_v47  ;;  %v2965_v23 = vsub.s32 4, %v2941_v6  ;;  %vm2471_vm6 = vc.u32 %v5095_v51, %v5103_v29 }
 0x2ec   : > { %v2472_v36 = vadd.s32 1, %v2468_v27  ;;  %v2820_v7 = vadd.f32 1.0, %v2819_v5  ;;  %v2827_v57 = vadd.f32 1.0, %v2826_v30  ;;  %v2549_v26 = vshrl.u32 %v5885_v55, %v4798_v42 }
 0x2ed   : > { %vm5115_vm9 = vcmp.le.f32.partialorder %v5955_v12, 0.7853982  ;;  %v2552_v35 = vshrl.u32 %v5886_v20, %v4798_v42  ;;  %v3220_v61 = vadd.s32 4294967294, %v2947_v2  ;;  %v2539_v37 = vor.u32 8388608, %v5107_v54 }
 0x2ee   : > { %v2548_v53 = vshll.u32 %v5881_v33, %v4771_v15  ;;  %v2551_v34 = vshll.u32 %v5885_v55, %v4771_v15  ;;  %v2828_v4 = vmul.f32 %v2827_v57, %v5062_v28  ;;  %v2837_v40 = vxor.u32 2147483648, %v2820_v7 }
 0x2ef   : > { %v2473_v49 = vsel %vm2471_vm6, %v2472_v36, %v2468_v27  ;;  %v2555_v31 = vshrl.u32 %v5880_v21, %v4798_v42  ;;  %vm3221_vm13 = vcmp.lt.s32.totalorder %v3220_v61, 0  ;;  %v2966_v58 = vsel %vm2843_vm1, %v2965_v23, %v2941_v6 }
 0x2f0   : > { %v2474_v11 = vadd.s32 %v2473_v49, %v2469_v14  ;;  %v2554_v18 = vshll.u32 %v5886_v20, %v4771_v15  ;;  %v2834_v59 = vxor.u32 2147483648, %v2828_v4  ;;  %v2950_v9 = vsel %vm3221_vm13, 0, %v3220_v61 }
 0x2f1   : > { %v2550_v3 = vor.u32 %v2549_v26, %v2548_v53  ;;  %v2553_v32 = vor.u32 %v2552_v35, %v2551_v34  ;;  %v2951_v19 = vsub.s32 32, %v2950_v9  ;;  %v2955_v39 = vsub.s32 4294967266, %v2950_v9 }
 0x2f2   : > { %v2475_v28 = vadd.s32 536870912, %v2474_v11  ;;  %v2556_v8 = vor.u32 %v2555_v31, %v2554_v18  ;;  %v2835_v45 = vsel %vm2833_vm5, %v2820_v7, %v2834_v59  ;;  %v2838_v1 = vsel %vm2836_vm7, %v2837_v40, %v2828_v4 }
 0x2f3   : > { %v2952_v6 = vshll.u32 %v5091_v17, %v2950_v9  ;;  %vm2563_vm14 = vcmp.lt.s32.totalorder %v4850_v25, 1  ;;  %v2839_v15 = vsel %vm2832_vm2, %v2835_v45, %v2838_v1  ;;  %v2953_v24 = vshrl.u32 %v2935_v44, %v2951_v19 }
 0x2f4   : > { %v2956_v27 = vadd.s32 127, %v2955_v39  ;;  %v5145_v54 = vshrl.u32 %v2475_v28, 30  ;;  %v2840_v5 = vsel %vm2829_vm11, nan, %v2839_v15  ;;  %v2968_v30 = vsel %vm5115_vm9, 0, %v2966_v58 }
 0x2f5   : > { %vm2565_vm3 = vcmp.lt.s32.totalorder %v4850_v25, 3  ;;  %v2571_v17 = vsel %vm2563_vm14, %v2550_v3, %v2553_v32  ;;  %3018 = vmatpush.msrb.mxu0 %v2840_v5  ;;  %v2954_v47 = vor.u32 %v2953_v24, %v2952_v6  ;;  %v5160_v62 = vshrl.u32 %v5900_v38, %v4838_v43 }
 0x2f6   : > { %v2957_v14 = vshll.u32 %v2956_v27, 23  ;;  %v2477_v52 = vshll.u32 %v5145_v54, 30  ;;  %v2573_v44 = vsel %vm2565_vm3, %v2556_v8, %v4898_v41  ;;  %v2547_v12 = vshrl.u32 %v5881_v33, %v4798_v42 }
 0x2f7   : > { %v2575_v2 = vsel %vm2563_vm14, %v2553_v32, %v2556_v8  ;;  %v2577_v23 = vsel %vm2565_vm3, %v4854_v50, %v4917_v48  ;;  %v2985_v7 = vadd.s32 3, %v2968_v30  ;;  %vm2564_vm10 = vcmp.lt.s32.totalorder %v4850_v25, 2 }
 0x2f8   : > { %v2958_v36 = vor.u32 4788187, %v2957_v14  ;;  %v2478_v57 = vsub.s32 %v2474_v11, %v2477_v52  ;;  %v2568_v41 = vsel %vm2566_vm4, %v2556_v8, 2102212464  ;;  %v5175_v26 = vsel %vm2564_vm10, %v2571_v17, %v2573_v44 }
 0x2f9   : > { %v2578_v42 = vsel %vm2564_vm10, %v2575_v2, %v2577_v23  ;;  %v5179_v35 = vshll.u32 %v2539_v37, 8  ;;  %v2961_v53 = vcvt.s32.f32 %v2954_v47  ;;  %vm2378_vm0 = vcmp.lt.s32.totalorder %v4668_v22, 0 }
 0x2fa   : > { %v2959_v61 = vand.u32 2147483647, %v2958_v36  ;;  %vm2479_vm5 = vcmp.lt.s32.totalorder %v2478_v57, 0  ;;  %v2480_v50 = vsub.s32 0, %v2478_v57  ;;  %v2582_v4 = vand.u32 65535, %v2578_v42 }
 0x2fb   : > { %v2580_v48 = vand.u32 65535, %v5179_v35  ;;  %v2581_v34 = vshrl.u32 %v5179_v35, 16  ;;  %v2583_v40 = vshrl.u32 %v2578_v42, 16  ;;  %v2567_v58 = vsel %vm2563_vm14, %v2547_v12, %v2550_v3 }
 0x2fc   : > { %v2962_v49 = vmul.f32 %v2961_v53, %v2959_v61  ;;  %v2481_v31 = vsel %vm2479_vm5, %v2480_v50, %v2478_v57  ;;  %v2569_v37 = vsel %vm2565_vm3, %v2553_v32, %v2568_v41  ;;  %v2470_v11 = vadd.s32 %v5103_v29, %v5095_v51 }
 0x2fd   : > { %v2482_v18 = vclz %v2481_v31  ;;  %v2585_v59 = vmul.u32 %v2583_v40, %v2580_v48  ;;  %v5190_v9 = vmul.u32 %v2582_v4, %v2581_v34  ;;  %v5192_v39 = vand.u32 3, %v2985_v7 }
 0x2fe   : > { %v2963_v19 = vxor.u32 2147483648, %v2962_v49  ;;  %v2500_v28 = vsub.s32 4, %v5145_v54  ;;  %v2605_v8 = vshrl.u32 %v5175_v26, 16  ;;  %v5198_v3 = vsel %vm2564_vm10, %v2567_v58, %v2569_v37 }
 0x2ff   : > { %v3211_v45 = vadd.s32 4294967294, %v2482_v18  ;;  %v2584_v32 = vmul.u32 %v2582_v4, %v2580_v48  ;;  %v2588_v1 = vshll.u32 %v2585_v59, 16  ;;  %v2587_v29 = vmul.u32 %v2583_v40, %v2581_v34 }
 0x300   : > { %v2964_v51 = vsel %vm2843_vm1, %v2963_v19, %v2962_v49  ;;  %v2590_v6 = vshll.u32 %v5190_v9, 16  ;;  %v2604_v15 = vand.u32 65535, %v5175_v26  ;;  %v2607_v17 = vmul.u32 %v2605_v8, %v2580_v48 }
 0x301   : > { %v5207_v24 = vsel %vm5115_vm9, %v4742_v10, %v2964_v51  ;;  %vm3212_vm4 = vcmp.lt.s32.totalorder %v3211_v45, 0  ;;  %vm2592_vm7 = vc.u32 %v2584_v32, %v2588_v1  ;;  %v2594_v25 = vadd.s32 %v2588_v1, %v2584_v32 }
 0x302   : > { %v2969_v27 = vmul.f32 %v5207_v24, %v5207_v24  ;;  %v2485_v5 = vsel %vm3212_vm4, 0, %v3211_v45  ;;  %v2593_v30 = vsel %vm2592_vm7, 1, %v5884_v56  ;;  %v5958_v47 = vand.u32 2147483647, %v4668_v22 }
 0x303   : > { %v2486_v52 = vsub.s32 32, %v2485_v5  ;;  %v2490_v13 = vsub.s32 4294967266, %v2485_v5  ;;  %v2501_v44 = vsel %vm2378_vm0, %v2500_v28, %v5145_v54  ;;  %v2595_v12 = vadd.s32 %v2593_v30, %v2587_v29 }
 0x304   : > { %vm5214_vm1 = vcmp.le.f32.partialorder %v5958_v47, 0.7853982  ;;  %v2970_v2 = vmul.f32 -0.001358992, %v2969_v27  ;;  %v2977_v23 = vmul.f32 -0.00019511016, %v2969_v27  ;;  %vm2596_vm2 = vc.u32 %v2594_v25, %v2590_v6 }
 0x305   : > { %v2608_v36 = vmul.u32 %v2604_v15, %v2581_v34  ;;  %v2487_v7 = vshll.u32 %v2478_v57, %v2485_v5  ;;  %v2488_v41 = vshrl.u32 %v2470_v11, %v2486_v52  ;;  %v2491_v26 = vadd.s32 127, %v2490_v13 }
 0x306   : > { %v2597_v42 = vsel %vm2596_vm2, 1, %v5884_v56  ;;  %v2971_v61 = vadd.f32 0.041655596, %v2970_v2  ;;  %v2978_v53 = vadd.f32 0.008332121, %v2977_v23  ;;  %v2610_v4 = vshll.u32 %v2607_v17, 16 }
 0x307   : > { %v2599_v50 = vadd.s32 %v2597_v42, %v2595_v12  ;;  %v2489_v40 = vor.u32 %v2488_v41, %v2487_v7  ;;  %v2492_v49 = vshll.u32 %v2491_v26, 23  ;;  %v2589_v31 = vshrl.u32 %v2585_v59, 16 }
 0x308   : > { %v2606_v58 = vmul.u32 %v2604_v15, %v2580_v48  ;;  %v2972_v37 = vmul.f32 %v2971_v61, %v2969_v27  ;;  %v2979_v54 = vmul.f32 %v2978_v53, %v2969_v27  ;;  %v2609_v18 = vmul.u32 %v2605_v8, %v2581_v34  ;;  %v5961_v53 = vld [vmem:[#allocation23_spill] sm:$0xff] }
 0x309   : > { %v2612_v19 = vshll.u32 %v2608_v36, 16  ;;  %v2493_v28 = vor.u32 4788187, %v2492_v49  ;;  %v2600_v45 = vadd.s32 %v2599_v50, %v2589_v31  ;;  %v2591_v1 = vshrl.u32 %v5190_v9, 16 }
 0x30a   : > { %vm2614_vm11 = vc.u32 %v2606_v58, %v2610_v4  ;;  %v2616_v57 = vadd.s32 %v2610_v4, %v2606_v58  ;;  %v2973_v11 = vadd.f32 -0.4999988, %v2972_v37  ;;  %v2980_v32 = vadd.f32 -0.16666654, %v2979_v54  ;;  %v5962_v4 = vld [vmem:[#allocation22_spill] sm:$0xff] }
 0x30b   : > { %v2615_v51 = vsel %vm2614_vm11, 1, %v5884_v56  ;;  %vm2988_vm9 = vcmp.eq.s32.totalorder %v5192_v39, 0  ;;  %v2494_v29 = vand.u32 2147483647, %v2493_v28  ;;  %v2496_v6 = vcvt.s32.f32 %v2489_v40 }
 0x30c   : > { %v2617_v59 = vadd.s32 %v2615_v51, %v2609_v18  ;;  %vm2618_vm6 = vc.u32 %v2616_v57, %v2612_v19  ;;  %v2974_v48 = vmul.f32 %v2973_v11, %v2969_v27  ;;  %v2981_v15 = vmul.f32 %v2980_v32, %v2969_v27  ;;  %v5963_v51 = vld [vmem:[#allocation10_spill] sm:$0xff] }
 0x30d   : > { %vm2987_vm13 = vcmp.lt.s32.totalorder %v5192_v39, 2  ;;  %v2503_v34 = vsel %vm5214_vm1, 0, %v2501_v44  ;;  %v2619_v8 = vsel %vm2618_vm6, 1, %v5884_v56  ;;  %vm2984_vm14 = vweird.f32 %v4742_v10 }
 0x30e   : > { %v2497_v9 = vmul.f32 %v2496_v6, %v2494_v29  ;;  %v5230_v25 = vadd.s32 %v2600_v45, %v2591_v1  ;;  %v2611_v5 = vshrl.u32 %v2607_v17, 16  ;;  %v2621_v30 = vadd.s32 %v2619_v8, %v2617_v59  ;;  %v5964_v6 = vld [vmem:[#allocation20_spill] sm:$0xff] }
 0x30f   : > { %v2975_v47 = vadd.f32 1.0, %v2974_v48  ;;  %v2982_v52 = vadd.f32 1.0, %v2981_v15  ;;  %vm2991_vm3 = vcmp.eq.s32.totalorder %v5192_v39, 2  ;;  %v2066_v27 = vand.u32 2147483647, %v4665_v0  ;;  %v5965_v15 = vld [vmem:[#allocation9_spill] sm:$0xff] }
 0x310   : > { %v2498_v13 = vxor.u32 2147483648, %v2497_v9  ;;  %v2613_v12 = vshrl.u32 %v2608_v36, 16  ;;  %v5234_v2 = vadd.s32 %v2616_v57, %v2612_v19  ;;  %v2622_v44 = vadd.s32 %v2621_v30, %v2611_v5 }
 0x311   : > { %v2983_v23 = vmul.f32 %v2982_v52, %v5207_v24  ;;  %v2992_v7 = vxor.u32 2147483648, %v2975_v47  ;;  %v2520_v41 = vadd.s32 3, %v2503_v34  ;;  %v2624_v26 = vmul.u32 %v5179_v35, %v5198_v3  ;;  %v5966_v52 = vld [vmem:[#allocation11_spill] sm:$0xff] }
 0x312   : > { %v2499_v17 = vsel %vm2378_vm0, %v2498_v13, %v2497_v9  ;;  %v2623_v42 = vadd.s32 %v2622_v44, %v2613_v12  ;;  %vm2626_vm10 = vc.u32 %v5230_v25, %v5234_v2  ;;  %v2073_v36 = vand.u32 8388607, %v2066_v27 }
 0x313   : > { %v2989_v61 = vxor.u32 2147483648, %v2983_v23  ;;  %v2502_v24 = vsel %vm5214_vm1, %v4668_v22, %v2499_v17  ;;  %v2083_v50 = vshll.u32 %v5881_v33, %v5961_v53  ;;  %v2084_v35 = vshrl.u32 %v5885_v55, %v5962_v4 }
 0x314   : > { %v2993_v3 = vsel %vm2991_vm3, %v2992_v7, %v2983_v23  ;;  %v2504_v40 = vmul.f32 %v2502_v24, %v2502_v24  ;;  %v2627_v49 = vadd.s32 1, %v2623_v42  ;;  %v2086_v31 = vshll.u32 %v5885_v55, %v5961_v53  ;;  %v5967_v7 = vld [vmem:[#allocation5_spill] sm:$0xff] }
 0x315   : > { %v2990_v58 = vsel %vm2988_vm9, %v2975_v47, %v2989_v61  ;;  %v2087_v14 = vshrl.u32 %v5886_v20, %v5962_v4  ;;  %v2089_v37 = vshll.u32 %v5886_v20, %v5961_v53  ;;  %v2090_v54 = vshrl.u32 %v5880_v21, %v5962_v4 }
 0x316   : > { %v2994_v18 = vsel %vm2987_vm13, %v2990_v58, %v2993_v3  ;;  %v2505_v19 = vmul.f32 -0.001358992, %v2504_v40  ;;  %v2512_v28 = vmul.f32 -0.00019511016, %v2504_v40  ;;  %v2628_v45 = vsel %vm2626_vm10, %v2627_v49, %v2623_v42 }
 0x317   : > { %v2995_v57 = vsel %vm2984_vm14, nan, %v2994_v18  ;;  %v2629_v11 = vadd.s32 %v2628_v45, %v2624_v26  ;;  %v5271_v32 = vor.u32 %v2087_v14, %v2086_v31  ;;  %v2091_v1 = vor.u32 %v2090_v54, %v2089_v37  ;;  %v5968_v26 = vld [vmem:[#allocation16_spill] sm:$0xff] }
 0x318   : > { %v5274_v29 = vshrl.u32 %v5963_v51, 5  ;;  %v5278_v39 = vshll.u32 %v5936_v63, %v5964_v6  ;;  %3038 = vmatpush.msrb.mxu1 %v2995_v57  ;;  %v2506_v59 = vadd.f32 0.041655596, %v2505_v19  ;;  %v2513_v48 = vadd.f32 0.008332121, %v2512_v28 }
 0x319   : > { %v5282_v34 = vor.u32 %v5076_v46, %v5965_v15  ;;  %v2630_v10 = vadd.s32 536870912, %v2629_v11  ;;  %v2074_v8 = vor.u32 8388608, %v2073_v36  ;;  %v2085_v9 = vor.u32 %v2084_v35, %v2083_v50  ;;  %v5969_v35 = vld [vmem:[#allocation21_spill] sm:$0xff] }
 0x31a   : > { %v2252_v5 = vor.u32 %v5160_v62, %v5278_v39  ;;  %v2507_v30 = vmul.f32 %v2506_v59, %v2504_v40  ;;  %v2514_v47 = vmul.f32 %v2513_v48, %v2504_v40  ;;  %vm2098_vm0 = vcmp.lt.s32.totalorder %v5966_v52, 1 }
 0x31b   : > { %v2521_v13 = vand.u32 3, %v2520_v41  ;;  %v5287_v12 = vshrl.u32 %v2630_v10, 30  ;;  %vm2100_vm5 = vcmp.lt.s32.totalorder %v5966_v52, 3  ;;  %v2110_v46 = vsel %vm2098_vm0, %v5271_v32, %v2091_v1 }
 0x31c   : > { %v2508_v44 = vadd.f32 -0.4999988, %v2507_v30  ;;  %v2515_v23 = vadd.f32 -0.16666654, %v2514_v47  ;;  %vm2099_vm4 = vcmp.lt.s32.totalorder %v5966_v52, 2  ;;  %v2112_v17 = vsel %vm2100_vm5, %v5968_v26, %v5967_v7 }
 0x31d   : > { %v2632_v42 = vshll.u32 %v5287_v12, 30  ;;  %v2106_v41 = vsel %vm2098_vm0, %v2085_v9, %v5271_v32  ;;  %v2113_v36 = vsel %vm2099_vm4, %v2110_v46, %v2112_v17  ;;  %v5304_v61 = vshll.u32 %v2074_v8, 8 }
 0x31e   : > { %v2509_v53 = vmul.f32 %v2508_v44, %v2504_v40  ;;  %v2516_v50 = vmul.f32 %v2515_v23, %v2504_v40  ;;  %v2108_v3 = vsel %vm2100_vm5, %v2091_v1, %v5969_v35  ;;  %v2118_v49 = vshrl.u32 %v2113_v36, 16 }
 0x31f   : > { %vm2519_vm7 = vweird.f32 %v4668_v22  ;;  %vm2522_vm1 = vcmp.lt.s32.totalorder %v2521_v13, 2  ;;  %v2633_v31 = vsub.s32 %v2629_v11, %v2632_v42  ;;  %v2117_v58 = vand.u32 65535, %v2113_v36 }
 0x320   : > { %v2510_v14 = vadd.f32 1.0, %v2509_v53  ;;  %v2517_v37 = vadd.f32 1.0, %v2516_v50  ;;  %vm2523_vm2 = vcmp.eq.s32.totalorder %v2521_v13, 0  ;;  %v2115_v54 = vand.u32 65535, %v5304_v61 }
 0x321   : > { %vm2634_vm11 = vcmp.lt.s32.totalorder %v2633_v31, 0  ;;  %v2635_v18 = vsub.s32 0, %v2633_v31  ;;  %v2109_v40 = vsel %vm2099_vm4, %v2106_v41, %v2108_v3  ;;  %v2116_v19 = vshrl.u32 %v5304_v61, 16 }
 0x322   : > { %v2518_v28 = vmul.f32 %v2517_v37, %v2502_v24  ;;  %vm2526_vm9 = vcmp.eq.s32.totalorder %v2521_v13, 2  ;;  %v2527_v45 = vxor.u32 2147483648, %v2510_v14  ;;  %v2120_v57 = vmul.u32 %v2118_v49, %v2115_v54 }
 0x323   : > { %v2625_v11 = vadd.s32 %v5234_v2, %v5230_v25  ;;  %v2636_v51 = vsel %vm2634_vm11, %v2635_v18, %v2633_v31  ;;  %v2082_v59 = vshrl.u32 %v5881_v33, %v5962_v4  ;;  %v2121_v48 = vmul.u32 %v2117_v58, %v2116_v19 }
 0x324   : > { %v2524_v15 = vxor.u32 2147483648, %v2518_v28  ;;  %v2637_v10 = vclz %v2636_v51  ;;  %v2123_v8 = vshll.u32 %v2120_v57, 16  ;;  %v2140_v30 = vshrl.u32 %v2109_v40, 16 }
 0x325   : > { %v2102_v47 = vsel %vm2098_vm0, %v2082_v59, %v2085_v9  ;;  %v2103_v24 = vsel %vm2101_vm12, %v2091_v1, 2102212464  ;;  %v2119_v46 = vmul.u32 %v2117_v58, %v2115_v54  ;;  %v2139_v44 = vand.u32 65535, %v2109_v40 }
 0x326   : > { %v2525_v23 = vsel %vm2523_vm2, %v2510_v14, %v2524_v15  ;;  %v2528_v25 = vsel %vm2526_vm9, %v2527_v45, %v2518_v28  ;;  %v3214_v2 = vadd.s32 4294967294, %v2637_v10  ;;  %v2122_v7 = vmul.u32 %v2118_v49, %v2116_v19 }
 0x327   : > { %v2529_v4 = vsel %vm2522_vm1, %v2525_v23, %v2528_v25  ;;  %v2125_v26 = vshll.u32 %v2121_v48, 16  ;;  %vm2127_vm6 = vc.u32 %v2119_v46, %v2123_v8  ;;  %v2129_v17 = vadd.s32 %v2123_v8, %v2119_v46 }
 0x328   : > { %v2530_v42 = vsel %vm2519_vm7, nan, %v2529_v4  ;;  %vm3215_vm13 = vcmp.lt.s32.totalorder %v3214_v2, 0  ;;  %v2128_v9 = vsel %vm2127_vm6, 1, %v5884_v56  ;;  %v2142_v1 = vmul.u32 %v2140_v30, %v2115_v54 }
 0x329   : > { %3019 = vmatpush.msrb.mxu0 %v2530_v42  ;;  %v2640_v41 = vsel %vm3215_vm13, 0, %v3214_v2  ;;  %v2130_v36 = vadd.s32 %v2128_v9, %v2122_v7  ;;  %vm2131_vm12 = vc.u32 %v2129_v17, %v2125_v26  ;;  %v2143_v53 = vmul.u32 %v2139_v44, %v2116_v19 }
 0x32a   : > { %v2641_v50 = vsub.s32 32, %v2640_v41  ;;  %v2645_v35 = vsub.s32 4294967266, %v2640_v41  ;;  %v2104_v13 = vsel %vm2100_vm5, %v5271_v32, %v2103_v24  ;;  %v2132_v3 = vsel %vm2131_vm12, 1, %v5884_v56 }
 0x32b   : > { %v2655_v22 = vsub.s32 4, %v5287_v12  ;;  %v2134_v49 = vadd.s32 %v2132_v3, %v2130_v36  ;;  %v2141_v58 = vmul.u32 %v2139_v44, %v2115_v54  ;;  %v2145_v14 = vshll.u32 %v2142_v1, 16 }
 0x32c   : > { %v2642_v37 = vshll.u32 %v2633_v31, %v2640_v41  ;;  %v2643_v18 = vshrl.u32 %v2625_v11, %v2641_v50  ;;  %v2646_v40 = vadd.s32 127, %v2645_v35  ;;  %v2124_v28 = vshrl.u32 %v2120_v57, 16 }
 0x32d   : > { %vm2256_vm14 = vcmp.lt.s32.totalorder %v5274_v29, 4  ;;  %v2144_v45 = vmul.u32 %v2140_v30, %v2116_v19  ;;  %v2147_v51 = vshll.u32 %v2143_v53, 16  ;;  %vm2149_vm3 = vc.u32 %v2141_v58, %v2145_v14  ;;  %v5972_v30 = vld [vmem:[#allocation7_spill] sm:$0xff] }
 0x32e   : > { %v2151_v59 = vadd.s32 %v2145_v14, %v2141_v58  ;;  %v2644_v15 = vor.u32 %v2643_v18, %v2642_v37  ;;  %v2647_v10 = vshll.u32 %v2646_v40, 23  ;;  %v2135_v32 = vadd.s32 %v2134_v49, %v2124_v28 }
 0x32f   : > { %v2150_v8 = vsel %vm2149_vm3, 1, %v5884_v56  ;;  %vm5337_vm10 = vcmp.le.f32.partialorder %v2531_v60, 0.7853982  ;;  %vm2533_vm0 = vcmp.lt.s32.totalorder %v4697_v16, 0  ;;  %v2126_v19 = vshrl.u32 %v2121_v48, 16 }
 0x330   : > { %v2152_v31 = vadd.s32 %v2150_v8, %v2144_v45  ;;  %vm2153_vm5 = vc.u32 %v2151_v59, %v2147_v51  ;;  %v2648_v57 = vor.u32 4788187, %v2647_v10  ;;  %v2221_v24 = vand.u32 2147483647, %v5972_v30 }
 0x331   : > { %v2154_v11 = vsel %vm2153_vm5, 1, %v5884_v56  ;;  %v2656_v46 = vsel %vm2533_vm0, %v2655_v22, %v5287_v12  ;;  %v2105_v60 = vsel %vm2099_vm4, %v2102_v47, %v2104_v13  ;;  %v2146_v44 = vshrl.u32 %v2142_v1, 16 }
 0x332   : > { %v2156_v23 = vadd.s32 %v2154_v11, %v2152_v31  ;;  %v2649_v25 = vand.u32 2147483647, %v2648_v57  ;;  %v2651_v2 = vcvt.s32.f32 %v2644_v15  ;;  %v5349_v7 = vadd.s32 %v2135_v32, %v2126_v19 }
 0x333   : > { %v2228_v48 = vand.u32 8388607, %v2221_v24  ;;  %v2148_v4 = vshrl.u32 %v2143_v53, 16  ;;  %v5353_v26 = vadd.s32 %v2151_v59, %v2147_v51  ;;  %v2239_v42 = vshrl.u32 %v5885_v55, %v4838_v43 }
 0x334   : > { %v2157_v17 = vadd.s32 %v2156_v23, %v2146_v44  ;;  %v2652_v12 = vmul.f32 %v2651_v2, %v2649_v25  ;;  %v2238_v52 = vshll.u32 %v5881_v33, %v5964_v6  ;;  %v2241_v47 = vshll.u32 %v5885_v55, %v5964_v6 }
 0x335   : > { %v2242_v9 = vshrl.u32 %v5886_v20, %v4838_v43  ;;  %v2229_v41 = vor.u32 8388608, %v2228_v48  ;;  %v2244_v36 = vshll.u32 %v5886_v20, %v5964_v6  ;;  %v2245_v53 = vshrl.u32 %v5880_v21, %v4838_v43 }
 0x336   : > { %v2158_v1 = vadd.s32 %v2157_v17, %v2148_v4  ;;  %v2266_v50 = vsel %vm2256_vm14, %v2252_v5, 1326507024  ;;  %v2653_v35 = vxor.u32 2147483648, %v2652_v12  ;;  %v2658_v13 = vsel %vm5337_vm10, 0, %v2656_v46 }
 0x337   : > { %vm2161_vm4 = vc.u32 %v5349_v7, %v5353_v26  ;;  %v2240_v22 = vor.u32 %v2239_v42, %v2238_v52  ;;  %v2243_v49 = vor.u32 %v2242_v9, %v2241_v47  ;;  %v2246_v6 = vor.u32 %v2245_v53, %v2244_v36 }
 0x338   : > { %v2162_v3 = vadd.s32 1, %v2158_v1  ;;  %v2262_v58 = vsel %vm2256_vm14, %v5282_v34, 920167782  ;;  %v2654_v62 = vsel %vm2533_vm0, %v2653_v35, %v2652_v12  ;;  %v2159_v39 = vmul.u32 %v5304_v61, %v2105_v60 }
 0x339   : > { %vm2255_vm7 = vcmp.lt.s32.totalorder %v5274_v29, 3  ;;  %v5386_v5 = vsel %vm5337_vm10, %v4697_v16, %v2654_v62  ;;  %v5391_v18 = vshll.u32 %v2229_v41, 8  ;;  %v2675_v28 = vadd.s32 3, %v2658_v13 }
 0x33a   : > { %v2163_v14 = vsel %vm2161_vm4, %v2162_v3, %v2158_v1  ;;  %v2267_v37 = vsel %vm2255_vm7, %v5282_v34, %v2266_v50  ;;  %v2659_v40 = vmul.f32 %v5386_v5, %v5386_v5  ;;  %vm2253_vm1 = vcmp.lt.s32.totalorder %v5274_v29, 1 }
 0x33b   : > { %v2164_v45 = vadd.s32 %v2163_v14, %v2159_v39  ;;  %vm2254_vm2 = vcmp.lt.s32.totalorder %v5274_v29, 2  ;;  %v2261_v61 = vsel %vm2253_vm1, %v2240_v22, %v2243_v49  ;;  %v2263_v51 = vsel %vm2255_vm7, %v2246_v6, %v2262_v58 }
 0x33c   : > { %v2265_v34 = vsel %vm2253_vm1, %v2243_v49, %v2246_v6  ;;  %v2660_v59 = vmul.f32 -0.001358992, %v2659_v40  ;;  %v2667_v15 = vmul.f32 -0.00019511016, %v2659_v40  ;;  %v2270_v8 = vand.u32 65535, %v5391_v18 }
 0x33d   : > { %v2165_v10 = vadd.s32 536870912, %v2164_v45  ;;  %v2268_v32 = vsel %vm2254_vm2, %v2265_v34, %v2267_v37  ;;  %v5407_v54 = vshrl.u32 %v5391_v18, 16  ;;  %v2264_v60 = vsel %vm2254_vm2, %v2261_v61, %v2263_v51 }
 0x33e   : > { %v2272_v31 = vand.u32 65535, %v2268_v32  ;;  %v2273_v57 = vshrl.u32 %v2268_v32, 16  ;;  %v2661_v19 = vadd.f32 0.041655596, %v2660_v59  ;;  %v2668_v11 = vadd.f32 0.008332121, %v2667_v15 }
 0x33f   : > { %v2166_v46 = vshrl.u32 %v2165_v10, 30  ;;  %v2237_v44 = vshrl.u32 %v5881_v33, %v4838_v43  ;;  %v2258_v23 = vsel %vm2256_vm14, %v2246_v6, 2102212464  ;;  %v2676_v17 = vand.u32 3, %v2675_v28 }
 0x340   : > { %v2275_v25 = vmul.u32 %v2273_v57, %v2270_v8  ;;  %v5416_v2 = vmul.u32 %v2272_v31, %v5407_v54  ;;  %v2662_v48 = vmul.f32 %v2661_v19, %v2659_v40  ;;  %v2669_v4 = vmul.f32 %v2668_v11, %v2659_v40 }
 0x341   : > { %v2167_v42 = vshll.u32 %v2166_v46, 30  ;;  %v2257_v12 = vsel %vm2253_vm1, %v2237_v44, %v2240_v22  ;;  %v2274_v52 = vmul.u32 %v2272_v31, %v2270_v8  ;;  %v2295_v9 = vshrl.u32 %v2264_v60, 16 }
 0x342   : > { %v2278_v47 = vshll.u32 %v2275_v25, 16  ;;  %v2663_v1 = vadd.f32 -0.4999988, %v2662_v48  ;;  %v2670_v41 = vadd.f32 -0.16666654, %v2669_v4  ;;  %vm2068_vm11 = vcmp.lt.s32.totalorder %v4665_v0, 0 }
 0x343   : > { %v5421_v43 = vsub.s32 %v2164_v45, %v2167_v42  ;;  %v2259_v36 = vsel %vm2255_vm7, %v2243_v49, %v2258_v23  ;;  %v2277_v53 = vmul.u32 %v2273_v57, %v5407_v54  ;;  %v2280_v50 = vshll.u32 %v5416_v2, 16 }
 0x344   : > { %vm2282_vm9 = vc.u32 %v2274_v52, %v2278_v47  ;;  %v2284_v35 = vadd.s32 %v2278_v47, %v2274_v52  ;;  %v2664_v13 = vmul.f32 %v2663_v1, %v2659_v40  ;;  %v2671_v3 = vmul.f32 %v2670_v41, %v2659_v40  ;;  %v5975_v52 = vld [vmem:[#allocation24_spill] sm:$0xff] }
 0x345   : > { %vm2677_vm6 = vcmp.lt.s32.totalorder %v2676_v17, 2  ;;  %vm2169_vm13 = vcmp.lt.s32.totalorder %v5421_v43, 0  ;;  %v2170_v22 = vsub.s32 0, %v5421_v43  ;;  %vm2674_vm12 = vweird.f32 %v4697_v16 }
 0x346   : > { %v2283_v6 = vsel %vm2282_vm9, 1, %v5884_v56  ;;  %vm2286_vm14 = vc.u32 %v2284_v35, %v2280_v50  ;;  %v2294_v58 = vand.u32 65535, %v2264_v60  ;;  %v2297_v49 = vmul.u32 %v2295_v9, %v2270_v8 }
 0x347   : > { %v2665_v62 = vadd.f32 1.0, %v2664_v13  ;;  %v2672_v39 = vadd.f32 1.0, %v2671_v3  ;;  %v2171_v14 = vsel %vm2169_vm13, %v2170_v22, %v5421_v43  ;;  %v2285_v37 = vadd.s32 %v2283_v6, %v2277_v53 }
 0x348   : > { %vm2678_vm3 = vcmp.eq.s32.totalorder %v2676_v17, 0  ;;  %vm5434_vm10 = vcmp.le.f32.partialorder %v2066_v27, 0.7853982  ;;  %v2172_v28 = vclz %v2171_v14  ;;  %v2190_v45 = vsub.s32 4, %v2166_v46  ;;  %v5977_v14 = vld [vmem:[#allocation14_spill] sm:$0xff] }
 0x349   : > { %v2287_v61 = vsel %vm2286_vm14, 1, %v5884_v56  ;;  %v2673_v51 = vmul.f32 %v2672_v39, %v5386_v5  ;;  %vm2681_vm0 = vcmp.eq.s32.totalorder %v2676_v17, 2  ;;  %v2682_v34 = vxor.u32 2147483648, %v2665_v62 }
 0x34a   : > { %v2289_v59 = vadd.s32 %v2287_v61, %v2285_v37  ;;  %v2160_v15 = vadd.s32 %v5353_v26, %v5349_v7  ;;  %v3205_v10 = vadd.s32 4294967294, %v2172_v28  ;;  %v5444_v32 = vsel %vm2254_vm2, %v2257_v12, %v2259_v36 }
 0x34b   : > { %v2298_v27 = vmul.u32 %v2294_v58, %v5407_v54  ;;  %v2679_v31 = vxor.u32 2147483648, %v2673_v51  ;;  %v2279_v57 = vshrl.u32 %v2275_v25, 16  ;;  %v2296_v19 = vmul.u32 %v2294_v58, %v2270_v8 }
 0x34c   : > { %v2300_v11 = vshll.u32 %v2297_v49, 16  ;;  %v2683_v60 = vsel %vm2681_vm0, %v2682_v34, %v2673_v51  ;;  %vm3206_vm5 = vcmp.lt.s32.totalorder %v3205_v10, 0  ;;  %v2191_v5 = vsel %vm2068_vm11, %v2190_v45, %v2166_v46 }
 0x34d   : > { %v2299_v44 = vmul.u32 %v2295_v9, %v5407_v54  ;;  %v2680_v7 = vsel %vm2678_vm3, %v2665_v62, %v2679_v31  ;;  %v2175_v26 = vsel %vm3206_vm5, 0, %v3205_v10  ;;  %v2290_v23 = vadd.s32 %v2289_v59, %v2279_v57  ;;  %v5976_v62 = vld [vmem:[#allocation13_spill] sm:$0xff] }
 0x34e   : > { %vm2304_vm4 = vc.u32 %v2296_v19, %v2300_v11  ;;  %v2684_v29 = vsel %vm2677_vm6, %v2680_v7, %v2683_v60  ;;  %v2176_v48 = vsub.s32 32, %v2175_v26  ;;  %v2180_v4 = vsub.s32 4294967266, %v2175_v26 }
 0x34f   : > { %v2302_v42 = vshll.u32 %v2298_v27, 16  ;;  %v2685_v8 = vsel %vm2674_vm12, nan, %v2684_v29  ;;  %v2305_v25 = vsel %vm2304_vm4, 1, %v5884_v56  ;;  %v2306_v12 = vadd.s32 %v2300_v11, %v2296_v19  ;;  %v5979_v19 = vld [vmem:[#allocation17_spill] sm:$0xff]  ;;  %v5980_v11 = vld [vmem:[#allocation18_spill] sm:$0xff]  ;;  %v5981_v29 = vld [vmem:[#allocation19_spill] sm:$0xff] }
 0x350   : > { %v1756_v46 = vand.u32 2147483647, %v5975_v52  ;;  %3039 = vmatpush.msrb.mxu1 %v2685_v8  ;;  %v2177_v54 = vshll.u32 %v5421_v43, %v2175_v26  ;;  %v2178_v47 = vshrl.u32 %v2160_v15, %v2176_v48  ;;  %v2181_v9 = vadd.s32 127, %v2180_v4 }
 0x351   : > { %v2307_v1 = vadd.s32 %v2305_v25, %v2299_v44  ;;  %v2193_v17 = vsel %vm5434_vm10, 0, %v2191_v5  ;;  %v2281_v41 = vshrl.u32 %v5416_v2, 16  ;;  %vm2308_vm7 = vc.u32 %v2306_v12, %v2302_v42 }
 0x352   : > { %v1763_v16 = vand.u32 8388607, %v1756_v46  ;;  %v2179_v36 = vor.u32 %v2178_v47, %v2177_v54  ;;  %v2182_v53 = vshll.u32 %v2181_v9, 23  ;;  %v2301_v50 = vshrl.u32 %v2297_v49, 16 }
 0x353   : > { %v2309_v35 = vsel %vm2308_vm7, 1, %v5884_v56  ;;  %v2291_v13 = vadd.s32 %v2290_v23, %v2281_v41  ;;  %v2303_v3 = vshrl.u32 %v2298_v27, 16  ;;  %v2310_v43 = vadd.s32 %v2306_v12, %v2302_v42  ;;  %v5978_v27 = vld [vmem:[#allocation15_spill] sm:$0xff] }
 0x354   : > { %v2311_v22 = vadd.s32 %v2309_v35, %v2307_v1  ;;  %v2183_v6 = vor.u32 4788187, %v2182_v53  ;;  %v1764_v58 = vor.u32 8388608, %v1763_v16  ;;  %v1773_v39 = vshll.u32 %v5881_v33, %v5976_v62  ;;  %v5983_v16 = vld [vmem:[#allocation8_spill] sm:$0xff] }
 0x355   : > { %v1774_v2 = vshrl.u32 %v5885_v55, %v5977_v14  ;;  %v2186_v37 = vcvt.s32.f32 %v2179_v36  ;;  %v1776_v45 = vshll.u32 %v5885_v55, %v5976_v62  ;;  %v1777_v49 = vshrl.u32 %v5886_v20, %v5977_v14 }
 0x356   : > { %v2312_v28 = vadd.s32 %v2311_v22, %v2301_v50  ;;  %v2184_v61 = vand.u32 2147483647, %v2183_v6  ;;  %v1779_v34 = vshll.u32 %v5886_v20, %v5976_v62  ;;  %v1780_v59 = vshrl.u32 %v5880_v21, %v5977_v14 }
 0x357   : > { %v5471_v51 = vor.u32 %v1774_v2, %v1773_v39  ;;  %vm2316_vm1 = vc.u32 %v2291_v13, %v2310_v43  ;;  %v5477_v10 = vor.u32 %v1777_v49, %v1776_v45  ;;  %vm1790_vm2 = vcmp.lt.s32.totalorder %v5978_v27, 3 }
 0x358   : > { %v2313_v15 = vadd.s32 %v2312_v28, %v2303_v3  ;;  %v2187_v31 = vmul.f32 %v2186_v37, %v2184_v61  ;;  %v1781_v57 = vor.u32 %v1780_v59, %v1779_v34  ;;  %vm1788_vm9 = vcmp.lt.s32.totalorder %v5978_v27, 1 }
 0x359   : > { %v1802_v60 = vsel %vm1790_vm2, %v5980_v11, %v5979_v19  ;;  %v2314_v5 = vmul.u32 %v5391_v18, %v5444_v32  ;;  %v1796_v7 = vsel %vm1788_vm9, %v5471_v51, %v5477_v10  ;;  %v5491_v26 = vshll.u32 %v1764_v58, 8  ;;  %v5982_v18 = vld [vmem:[#allocation6_spill] sm:$0xff] }
 0x35a   : > { %v2317_v44 = vadd.s32 1, %v2313_v15  ;;  %v2188_v23 = vxor.u32 2147483648, %v2187_v31  ;;  %vm1789_vm6 = vcmp.lt.s32.totalorder %v5978_v27, 2  ;;  %v1798_v48 = vsel %vm1790_vm2, %v1781_v57, %v5981_v29 }
 0x35b   : > { %v1800_v4 = vsel %vm1788_vm9, %v5477_v10, %v1781_v57  ;;  %v5502_v32 = vshrl.u32 %v5900_v38, %v5982_v18  ;;  %v2210_v42 = vadd.s32 3, %v2193_v17  ;;  %v5511_v47 = vsel %vm1789_vm6, %v1796_v7, %v1798_v48 }
 0x35c   : > { %v2318_v8 = vsel %vm2316_vm1, %v2317_v44, %v2313_v15  ;;  %v1803_v25 = vsel %vm1789_vm6, %v1800_v4, %v1802_v60  ;;  %v2189_v12 = vsel %vm2068_vm11, %v2188_v23, %v2187_v31  ;;  %v1805_v9 = vand.u32 65535, %v5491_v26 }
 0x35d   : > { %v2319_v54 = vadd.s32 %v2318_v8, %v2314_v5  ;;  %v5517_v38 = vsel %vm5434_vm10, %v4665_v0, %v2189_v12  ;;  %v5520_v1 = vshrl.u32 %v5491_v26, 16  ;;  %v1807_v17 = vand.u32 65535, %v1803_v25 }
 0x35e   : > { %v1808_v41 = vshrl.u32 %v1803_v25, 16  ;;  %v5524_v36 = vshll.u32 %v5880_v21, %v5983_v16  ;;  %v5528_v53 = vshll.u32 %v5936_v63, %v5983_v16  ;;  %v2194_v50 = vmul.f32 %v5517_v38, %v5517_v38 }
 0x35f   : > { %v2320_v35 = vadd.s32 536870912, %v2319_v54  ;;  %v5534_v40 = vshrl.u32 %v5936_v63, %v5982_v18  ;;  %v5537_v22 = vmul.u32 %v1807_v17, %v5520_v1  ;;  %v1830_v6 = vshrl.u32 %v5511_v47, 16 }
 0x360   : > { %v1810_v3 = vmul.u32 %v1808_v41, %v1805_v9  ;;  %v1942_v58 = vor.u32 %v5502_v32, %v5528_v53  ;;  %v2195_v62 = vmul.f32 -0.001358992, %v2194_v50  ;;  %v2202_v39 = vmul.f32 -0.00019511016, %v2194_v50 }
 0x361   : > { %v5542_v2 = vshrl.u32 %v2320_v35, 30  ;;  %v5544_v37 = vand.u32 3, %v2210_v42  ;;  %v1772_v28 = vshrl.u32 %v5881_v33, %v5977_v14  ;;  %v1809_v63 = vmul.u32 %v1807_v17, %v1805_v9 }
 0x362   : > { %v1813_v45 = vshll.u32 %v1810_v3, 16  ;;  %v2196_v49 = vadd.f32 0.041655596, %v2195_v62  ;;  %v2203_v61 = vadd.f32 0.008332121, %v2202_v39  ;;  %v5548_v34 = vadd.s32 %v2310_v43, %v2291_v13 }
 0x363   : > { %v2322_v59 = vshll.u32 %v5542_v2, 30  ;;  %v1815_v15 = vshll.u32 %v5537_v22, 16  ;;  %v5552_v19 = vmul.u32 %v1830_v6, %v1805_v9  ;;  %v1829_v14 = vand.u32 65535, %v5511_v47 }
 0x364   : > { %vm1817_vm11 = vc.u32 %v1809_v63, %v1813_v45  ;;  %v1819_v31 = vadd.s32 %v1813_v45, %v1809_v63  ;;  %v2197_v11 = vmul.f32 %v2196_v49, %v2194_v50  ;;  %v2204_v60 = vmul.f32 %v2203_v61, %v2194_v50 }
 0x365   : > { %v5554_v5 = vsub.s32 %v2319_v54, %v2322_v59  ;;  %vm2216_vm13 = vcmp.eq.s32.totalorder %v5544_v37, 2  ;;  %v1793_v13 = vsel %vm1791_vm8, %v1781_v57, 2102212464  ;;  %v1812_v43 = vmul.u32 %v1808_v41, %v5520_v1 }
 0x366   : > { %v1818_v44 = vsel %vm1817_vm11, 1, %v5884_v56  ;;  %vm1821_vm12 = vc.u32 %v1819_v31, %v1815_v15  ;;  %v2198_v7 = vadd.f32 -0.4999988, %v2197_v11  ;;  %v2205_v23 = vadd.f32 -0.16666654, %v2204_v60 }
 0x367   : > { %vm2324_vm14 = vcmp.lt.s32.totalorder %v5554_v5, 0  ;;  %v2325_v29 = vsub.s32 0, %v5554_v5  ;;  %vm2213_vm3 = vcmp.eq.s32.totalorder %v5544_v37, 0  ;;  %v1792_v48 = vsel %vm1788_vm9, %v1772_v28, %v5471_v51 }
 0x368   : > { %v1820_v4 = vadd.s32 %v1818_v44, %v1812_v43  ;;  %v1822_v57 = vsel %vm1821_vm12, 1, %v5884_v56  ;;  %v1835_v42 = vshll.u32 %v5552_v19, 16  ;;  %v2199_v8 = vmul.f32 %v2198_v7, %v2194_v50  ;;  %v5985_v7 = vld [vmem:[#allocation25_spill] sm:$0xff] }
 0x369   : > { %v2206_v25 = vmul.f32 %v2205_v23, %v2194_v50  ;;  %vm2212_vm8 = vcmp.lt.s32.totalorder %v5544_v37, 2  ;;  %v2326_v12 = vsel %vm2324_vm14, %v2325_v29, %v5554_v5  ;;  %v1831_v54 = vmul.u32 %v1829_v14, %v1805_v9  ;;  %v5984_v50 = vld [vmem:[#allocation12_spill] sm:$0xff] }
 0x36a   : > { %vm2209_vm10 = vweird.f32 %v4665_v0  ;;  %v2327_v47 = vclz %v2326_v12  ;;  %v1794_v17 = vsel %vm1790_vm2, %v5477_v10, %v1793_v13  ;;  %v1824_v51 = vadd.s32 %v1822_v57, %v1820_v4 }
 0x36b   : > { %v1833_v41 = vmul.u32 %v1829_v14, %v5520_v1  ;;  %v2200_v35 = vadd.f32 1.0, %v2199_v8  ;;  %v2207_v62 = vadd.f32 1.0, %v2206_v25  ;;  %v1814_v39 = vshrl.u32 %v1810_v3, 16 }
 0x36c   : > { %vm1839_vm0 = vc.u32 %v1831_v54, %v1835_v42  ;;  %vm1946_vm5 = vcmp.lt.s32.totalorder %v5984_v50, 4  ;;  %v3208_v28 = vadd.s32 4294967294, %v2327_v47  ;;  %v2345_v63 = vsub.s32 4, %v5542_v2 }
 0x36d   : > { %v1816_v9 = vshrl.u32 %v5537_v22, 16  ;;  %v1834_v45 = vmul.u32 %v1830_v6, %v5520_v1  ;;  %v2208_v49 = vmul.f32 %v2207_v62, %v5517_v38  ;;  %v2217_v61 = vxor.u32 2147483648, %v2200_v35 }
 0x36e   : > { %v1825_v10 = vadd.s32 %v1824_v51, %v1814_v39  ;;  %v1840_v59 = vsel %vm1839_vm0, 1, %v5884_v56  ;;  %vm3209_vm4 = vcmp.lt.s32.totalorder %v3208_v28, 0  ;;  %v1837_v15 = vshll.u32 %v1833_v41, 16 }
 0x36f   : > { %v1841_v31 = vadd.s32 %v1835_v42, %v1831_v54  ;;  %v1842_v3 = vadd.s32 %v1840_v59, %v1834_v45  ;;  %v2214_v11 = vxor.u32 2147483648, %v2208_v49  ;;  %v2218_v60 = vsel %vm2216_vm13, %v2217_v61, %v2208_v49 }
 0x370   : > { %v2330_v14 = vsel %vm3209_vm4, 0, %v3208_v28  ;;  %v1836_v13 = vshrl.u32 %v5552_v19, 16  ;;  %v5586_v1 = vadd.s32 %v1825_v10, %v1816_v9  ;;  %v1911_v23 = vand.u32 2147483647, %v5985_v7 }
 0x371   : > { %v2331_v22 = vsub.s32 32, %v2330_v14  ;;  %v2335_v43 = vsub.s32 4294967266, %v2330_v14  ;;  %vm1843_vm7 = vc.u32 %v1841_v31, %v1837_v15  ;;  %v2215_v38 = vsel %vm2213_vm3, %v2200_v35, %v2214_v11 }
 0x372   : > { %v2332_v6 = vshll.u32 %v5554_v5, %v2330_v14  ;;  %v1844_v44 = vsel %vm1843_vm7, 1, %v5884_v56  ;;  %v2219_v29 = vsel %vm2212_vm8, %v2215_v38, %v2218_v60  ;;  %v1939_v42 = vor.u32 %v5534_v40, %v5524_v36 }
 0x373   : > { %v2333_v4 = vshrl.u32 %v5548_v34, %v2331_v22  ;;  %v2336_v19 = vadd.s32 127, %v2335_v43  ;;  %v1846_v57 = vadd.s32 %v1844_v44, %v1842_v3  ;;  %v2220_v8 = vsel %vm2209_vm10, nan, %v2219_v29 }
 0x374   : > { %vm2223_vm1 = vcmp.lt.s32.totalorder %v5972_v30, 0  ;;  %v1838_v5 = vshrl.u32 %v1833_v41, 16  ;;  %3020 = vmatpush.msrb.mxu0 %v2220_v8  ;;  %v5601_v54 = vadd.s32 %v1841_v31, %v1837_v15  ;;  %v1956_v34 = vsel %vm1946_vm5, %v1942_v58, 1326507024 }
 0x375   : > { %v2334_v25 = vor.u32 %v2333_v4, %v2332_v6  ;;  %v2337_v12 = vshll.u32 %v2336_v19, 23  ;;  %v1847_v37 = vadd.s32 %v1846_v57, %v1836_v13  ;;  %v2346_v0 = vsel %vm2223_vm1, %v2345_v63, %v5542_v2 }
 0x376   : > { %v1795_v36 = vsel %vm1789_vm6, %v1792_v48, %v1794_v17  ;;  %v1918_v40 = vand.u32 8388607, %v1911_v23  ;;  %vm1851_vm2 = vc.u32 %v5586_v1, %v5601_v54  ;;  %v1929_v32 = vshrl.u32 %v5885_v55, %v5982_v18 }
 0x377   : > { %v2338_v47 = vor.u32 4788187, %v2337_v12  ;;  %v1848_v51 = vadd.s32 %v1847_v37, %v1838_v5  ;;  %v2341_v53 = vcvt.s32.f32 %v2334_v25  ;;  %v1931_v41 = vshll.u32 %v5885_v55, %v5983_v16 }
 0x378   : > { %v1919_v58 = vor.u32 8388608, %v1918_v40  ;;  %v1932_v27 = vshrl.u32 %v5886_v20, %v5982_v18  ;;  %v1934_v17 = vshll.u32 %v5886_v20, %v5983_v16  ;;  %v1935_v35 = vshrl.u32 %v5880_v21, %v5982_v18 }
 0x379   : > { %v2339_v2 = vand.u32 2147483647, %v2338_v47  ;;  %v1852_v48 = vadd.s32 1, %v1848_v51  ;;  %v1849_v62 = vmul.u32 %v5491_v26, %v1795_v36  ;;  %v1928_v39 = vshll.u32 %v5881_v33, %v5983_v16 }
 0x37a   : > { %v5630_v28 = vor.u32 %v1932_v27, %v1931_v41  ;;  %vm1945_vm9 = vcmp.lt.s32.totalorder %v5984_v50, 3  ;;  %v5633_v9 = vor.u32 %v1935_v35, %v1934_v17  ;;  %vm5639_vm6 = vcmp.le.f32.partialorder %v2221_v24, 0.7853982 }
 0x37b   : > { %v2342_v55 = vmul.f32 %v2341_v53, %v2339_v2  ;;  %v1853_v63 = vsel %vm1851_vm2, %v1852_v48, %v1848_v51  ;;  %v1957_v45 = vsel %vm1945_vm9, %v1939_v42, %v1956_v34  ;;  %vm1943_vm11 = vcmp.lt.s32.totalorder %v5984_v50, 1 }
 0x37c   : > { %v1854_v20 = vadd.s32 %v1853_v63, %v1849_v62  ;;  %v5644_v26 = vshll.u32 %v1919_v58, 8  ;;  %v5646_v49 = vor.u32 %v1929_v32, %v1928_v39  ;;  %vm1944_vm13 = vcmp.lt.s32.totalorder %v5984_v50, 2 }
 0x37d   : > { %v2343_v16 = vxor.u32 2147483648, %v2342_v55  ;;  %v1955_v61 = vsel %vm1943_vm11, %v5630_v28, %v5633_v9  ;;  %v2348_v24 = vsel %vm5639_vm6, 0, %v2346_v0  ;;  %v1952_v15 = vsel %vm1946_vm5, %v1939_v42, 920167782 }
 0x37e   : > { %v1855_v10 = vadd.s32 536870912, %v1854_v20  ;;  %v1958_v59 = vsel %vm1944_vm13, %v1955_v61, %v1957_v45  ;;  %v1960_v3 = vand.u32 65535, %v5644_v26  ;;  %v2365_v43 = vadd.s32 3, %v2348_v24 }
 0x37f   : > { %v2344_v31 = vsel %vm2223_vm1, %v2343_v16, %v2342_v55  ;;  %v1962_v14 = vand.u32 65535, %v1958_v59  ;;  %v1963_v13 = vshrl.u32 %v1958_v59, 16  ;;  %v1951_v38 = vsel %vm1943_vm11, %v5646_v49, %v5630_v28 }
 0x380   : > { %v2347_v11 = vsel %vm5639_vm6, %v5972_v30, %v2344_v31  ;;  %v5665_v60 = vshrl.u32 %v1855_v10, 30  ;;  %v1953_v44 = vsel %vm1945_vm9, %v5633_v9, %v1952_v15  ;;  %v1961_v29 = vshrl.u32 %v5644_v26, 16 }
 0x381   : > { %v2349_v22 = vmul.f32 %v2347_v11, %v2347_v11  ;;  %v5676_v4 = vmul.u32 %v1963_v13, %v1960_v3  ;;  %v1954_v37 = vsel %vm1944_vm13, %v1951_v38, %v1953_v44  ;;  %v1964_v34 = vmul.u32 %v1962_v14, %v1960_v3 }
 0x382   : > { %v1857_v6 = vshll.u32 %v5665_v60, 30  ;;  %v5680_v8 = vmul.u32 %v1962_v14, %v1961_v29  ;;  %v2366_v0 = vand.u32 3, %v2365_v43  ;;  %v1985_v41 = vshrl.u32 %v1954_v37, 16 }
 0x383   : > { %v2350_v19 = vmul.f32 -0.001358992, %v2349_v22  ;;  %v2357_v57 = vmul.f32 -0.00019511016, %v2349_v22  ;;  %v1968_v5 = vshll.u32 %v5676_v4, 16  ;;  %v1967_v17 = vmul.u32 %v1963_v13, %v1961_v29 }
 0x384   : > { %v5678_v42 = vsub.s32 %v1854_v20, %v1857_v6  ;;  %v1970_v53 = vshll.u32 %v5680_v8, 16  ;;  %v1984_v35 = vand.u32 65535, %v1954_v37  ;;  %vm2367_vm8 = vcmp.lt.s32.totalorder %v2366_v0, 2 }
 0x385   : > { %v2351_v25 = vadd.f32 0.041655596, %v2350_v19  ;;  %v2358_v12 = vadd.f32 0.008332121, %v2357_v57  ;;  %vm1972_vm14 = vc.u32 %v1964_v34, %v1968_v5  ;;  %v1974_v51 = vadd.s32 %v1968_v5, %v1964_v34 }
 0x386   : > { %vm1859_vm12 = vcmp.lt.s32.totalorder %v5678_v42, 0  ;;  %v1860_v36 = vsub.s32 0, %v5678_v42  ;;  %v1973_v58 = vsel %vm1972_vm14, 1, %v5884_v56  ;;  %vm2364_vm10 = vweird.f32 %v5972_v30 }
 0x387   : > { %v2352_v40 = vmul.f32 %v2351_v25, %v2349_v22  ;;  %v2359_v47 = vmul.f32 %v2358_v12, %v2349_v22  ;;  %vm1976_vm3 = vc.u32 %v1974_v51, %v1970_v53  ;;  %v1975_v63 = vadd.s32 %v1973_v58, %v1967_v17 }
 0x388   : > { %v1861_v32 = vsel %vm1859_vm12, %v1860_v36, %v5678_v42  ;;  %vm2368_vm0 = vcmp.eq.s32.totalorder %v2366_v0, 0  ;;  %vm2371_vm4 = vcmp.eq.s32.totalorder %v2366_v0, 2  ;;  %v1977_v45 = vsel %vm1976_vm3, 1, %v5884_v56 }
 0x389   : > { %v2353_v27 = vadd.f32 -0.4999988, %v2352_v40  ;;  %v2360_v2 = vadd.f32 -0.16666654, %v2359_v47  ;;  %v1862_v48 = vclz %v1861_v32  ;;  %v1987_v21 = vmul.u32 %v1985_v41, %v1960_v3 }
 0x38a   : > { %v1850_v61 = vadd.s32 %v5601_v54, %v5586_v1  ;;  %v1986_v10 = vmul.u32 %v1984_v35, %v1960_v3  ;;  %v1988_v59 = vmul.u32 %v1984_v35, %v1961_v29  ;;  %v1948_v38 = vsel %vm1946_vm5, %v5633_v9, 2102212464 }
 0x38b   : > { %v2354_v62 = vmul.f32 %v2353_v27, %v2349_v22  ;;  %v2361_v39 = vmul.f32 %v2360_v2, %v2349_v22  ;;  %v3199_v55 = vadd.s32 4294967294, %v1862_v48  ;;  %v1990_v15 = vshll.u32 %v1987_v21, 16 }
 0x38c   : > { %v1979_v22 = vadd.s32 %v1977_v45, %v1975_v63  ;;  %v1969_v6 = vshrl.u32 %v5676_v4, 16  ;;  %v1989_v44 = vmul.u32 %v1985_v41, %v1961_v29  ;;  %v1992_v57 = vshll.u32 %v1988_v59, 16 }
 0x38d   : > { %v2355_v20 = vadd.f32 1.0, %v2354_v62  ;;  %v2362_v16 = vadd.f32 1.0, %v2361_v39  ;;  %vm3200_vm7 = vcmp.lt.s32.totalorder %v3199_v55, 0  ;;  %vm1994_vm1 = vc.u32 %v1986_v10, %v1990_v15 }
 0x38e   : > { %v1865_v24 = vsel %vm3200_vm7, 0, %v3199_v55  ;;  %v1996_v5 = vadd.s32 %v1990_v15, %v1986_v10  ;;  %v1980_v37 = vadd.s32 %v1979_v22, %v1969_v6  ;;  %v1927_v36 = vshrl.u32 %v5881_v33, %v5982_v18 }
 0x38f   : > { %v2363_v31 = vmul.f32 %v2362_v16, %v2347_v11  ;;  %v2372_v14 = vxor.u32 2147483648, %v2355_v20  ;;  %v1866_v13 = vsub.s32 32, %v1865_v24  ;;  %v1870_v43 = vsub.s32 4294967266, %v1865_v24 }
 0x390   : > { %v1867_v1 = vshll.u32 %v5678_v42, %v1865_v24  ;;  %v1995_v11 = vsel %vm1994_vm1, 1, %v5884_v56  ;;  %vm1998_vm5 = vc.u32 %v1996_v5, %v1992_v57  ;;  %v1971_v40 = vshrl.u32 %v5680_v8, 16 }
 0x391   : > { %v2369_v19 = vxor.u32 2147483648, %v2363_v31  ;;  %v1868_v54 = vshrl.u32 %v1850_v61, %v1866_v13  ;;  %v1871_v3 = vadd.s32 127, %v1870_v43  ;;  %v2373_v12 = vsel %vm2371_vm4, %v2372_v14, %v2363_v31 }
 0x392   : > { %v1997_v34 = vadd.s32 %v1995_v11, %v1989_v44  ;;  %v1999_v47 = vsel %vm1998_vm5, 1, %v5884_v56  ;;  %v1991_v32 = vshrl.u32 %v1987_v21, 16  ;;  %v1947_v0 = vsel %vm1943_vm11, %v1927_v36, %v5646_v49 }
 0x393   : > { %v2370_v25 = vsel %vm2368_vm0, %v2355_v20, %v2369_v19  ;;  %v1869_v4 = vor.u32 %v1868_v54, %v1867_v1  ;;  %v1872_v29 = vshll.u32 %v1871_v3, 23  ;;  %v1949_v30 = vsel %vm1945_vm9, %v5630_v28, %v1948_v38 }
 0x394   : > { %v2374_v9 = vsel %vm2367_vm8, %v2370_v25, %v2373_v12  ;;  %v2001_v53 = vadd.s32 %v1999_v47, %v1997_v34  ;;  %v1981_v58 = vadd.s32 %v1980_v37, %v1971_v40  ;;  %v1993_v33 = vshrl.u32 %v1988_v59, 16 }
 0x395   : > { %v2375_v42 = vsel %vm2364_vm10, nan, %v2374_v9  ;;  %v1873_v51 = vor.u32 4788187, %v1872_v29  ;;  %v1876_v27 = vcvt.s32.f32 %v1869_v4  ;;  %v2000_v8 = vadd.s32 %v1996_v5, %v1992_v57 }
 0x396   : > { %3040 = vmatpush.msrb.mxu1 %v2375_v42  ;;  %v2002_v18 = vadd.s32 %v2001_v53, %v1991_v32  ;;  %v1950_v56 = vsel %vm1944_vm13, %v1947_v0, %v1949_v30  ;;  %vm1758_vm6 = vcmp.lt.s32.totalorder %v5975_v52, 0  ;;  %vm5721_vm9 = vcmp.le.f32.partialorder %v1756_v46, 0.7853982  ;;  %v2996_v0 = vld [vmem:[%s5785_s5] sm:$0xf] }
 0x397   : > { %v1874_v41 = vand.u32 2147483647, %v1873_v51  ;;  %vm2006_vm2 = vc.u32 %v1981_v58, %v2000_v8  ;;  %v2004_v49 = vmul.u32 %v5644_v26, %v1950_v56  ;;  %v1880_v39 = vsub.s32 4, %v5665_v60 }
 0x398   : > { %v2003_v48 = vadd.s32 %v2002_v18, %v1993_v33  ;;  %v2005_v12 = vadd.s32 %v2000_v8, %v1981_v58  ;;  %vm1899_vm8 = vweird.f32 %v5975_v52  ;;  %vm1913_vm10 = vcmp.lt.s32.totalorder %v5985_v7, 0 }
 0x399   : > { %v1877_v2 = vmul.f32 %v1876_v27, %v1874_v41  ;;  %v1881_v20 = vsel %vm1758_vm6, %v1880_v39, %v5665_v60  ;;  %vm1912_vm0 = vcmp.le.f32.partialorder %v1911_v23, 0.7853982  ;;  %vm2054_vm5 = vweird.f32 %v5985_v7 }
 0x39a   : > { %v2007_v35 = vadd.s32 1, %v2003_v48  ;;  %v1883_v10 = vsel %vm5721_vm9, 0, %v1881_v20 }
 0x39b   : > { %v1878_v17 = vxor.u32 2147483648, %v1877_v2  ;;  %v1900_v43 = vadd.s32 3, %v1883_v10 }
 0x39c   : > { %v2008_v55 = vsel %vm2006_vm2, %v2007_v35, %v2003_v48  ;;  %vm3049_vm2 = vcmask 1043456  }
 0x39d   : > { %v1879_v62 = vsel %vm1758_vm6, %v1878_v17, %v1877_v2  ;;  %v2009_v63 = vadd.s32 %v2008_v55, %v2004_v49  ;;  %v1901_v54 = vand.u32 3, %v1900_v43 }
 0x39e   : > { %v1882_v50 = vsel %vm5721_vm9, %v5975_v52, %v1879_v62 }
 0x39f   : > { %v1884_v45 = vmul.f32 %v1882_v50, %v1882_v50  ;;  %v2010_v21 = vadd.s32 536870912, %v2009_v63  ;;  %vm1902_vm13 = vcmp.lt.s32.totalorder %v1901_v54, 2  ;;  %vm1903_vm14 = vcmp.eq.s32.totalorder %v1901_v54, 0 }
 0x3a0   : > { %vm1906_vm3 = vcmp.eq.s32.totalorder %v1901_v54, 2 }
 0x3a1   : > { %v1885_v26 = vmul.f32 -0.001358992, %v1884_v45  ;;  %v1892_v16 = vmul.f32 -0.00019511016, %v1884_v45  ;;  %v2011_v61 = vshrl.u32 %v2010_v21, 30 }
 0x3a3   : > { %v1886_v46 = vadd.f32 0.041655596, %v1885_v26  ;;  %v1893_v24 = vadd.f32 0.008332121, %v1892_v16  ;;  %v2012_v59 = vshll.u32 %v2011_v61, 30  ;;  %v2035_v18 = vsub.s32 4, %v2011_v61 }
 0x3a5   : > { %v1887_v15 = vmul.f32 %v1886_v46, %v1884_v45  ;;  %v1894_v31 = vmul.f32 %v1893_v24, %v1884_v45  ;;  %v2013_v14 = vsub.s32 %v2009_v63, %v2012_v59  ;;  %v2036_v17 = vsel %vm1913_vm10, %v2035_v18, %v2011_v61 }
 0x3a6   : > { %v2038_v28 = vsel %vm1912_vm0, 0, %v2036_v17 }
 0x3a7   : > { %v1888_v13 = vadd.f32 -0.4999988, %v1887_v15  ;;  %v1895_v22 = vadd.f32 -0.16666654, %v1894_v31  ;;  %vm2014_vm11 = vcmp.lt.s32.totalorder %v2013_v14, 0  ;;  %v2015_v38 = vsub.s32 0, %v2013_v14  ;;  %v3001_v31 = vpop.permute.xlu2 %3000 }
 0x3a8   : > { %v2055_v63 = vadd.s32 3, %v2038_v28 }
 0x3a9   : > { %v1889_v6 = vmul.f32 %v1888_v13, %v1884_v45  ;;  %v1896_v44 = vmul.f32 %v1895_v22, %v1884_v45  ;;  %v2016_v60 = vsel %vm2014_vm11, %v2015_v38, %v2013_v14 }
 0x3aa   : > { %v2017_v3 = vclz %v2016_v60  ;;  %v2056_v26 = vand.u32 3, %v2055_v63 }
 0x3ab   : > { %v1890_v19 = vadd.f32 1.0, %v1889_v6  ;;  %v1897_v1 = vadd.f32 1.0, %v1896_v44 }
 0x3ac   : > { %v3202_v5 = vadd.s32 4294967294, %v2017_v3  ;;  %vm2058_vm4 = vcmp.eq.s32.totalorder %v2056_v26, 0  ;;  %vm2061_vm7 = vcmp.eq.s32.totalorder %v2056_v26, 2  ;;  %vm2057_vm1 = vcmp.lt.s32.totalorder %v2056_v26, 2 }
 0x3ad   : > { %v1898_v57 = vmul.f32 %v1897_v1, %v1882_v50  ;;  %v1907_v11 = vxor.u32 2147483648, %v1890_v19 }
 0x3ae   : > { %vm3203_vm12 = vcmp.lt.s32.totalorder %v3202_v5, 0 }
 0x3af   : > { %v1904_v25 = vxor.u32 2147483648, %v1898_v57  ;;  %v2020_v37 = vsel %vm3203_vm12, 0, %v3202_v5  ;;  %v1908_v9 = vsel %vm1906_vm3, %v1907_v11, %v1898_v57 }
 0x3b0   : > { %v2021_v4 = vsub.s32 32, %v2020_v37  ;;  %v2025_v29 = vsub.s32 4294967266, %v2020_v37  ;;  %v2022_v40 = vshll.u32 %v2013_v14, %v2020_v37 }
 0x3b1   : > { %v1905_v34 = vsel %vm1903_vm14, %v1890_v19, %v1904_v25 }
 0x3b2   : > { %v1909_v42 = vsel %vm1902_vm13, %v1905_v34, %v1908_v9  ;;  %v2023_v47 = vshrl.u32 %v2005_v12, %v2021_v4  ;;  %v2026_v51 = vadd.s32 127, %v2025_v29 }
 0x3b3   : > { %v1910_v36 = vsel %vm1899_vm8, nan, %v1909_v42 }
 0x3b4   : > { %3021 = vmatpush.msrb.mxu0 %v1910_v36  ;;  %v2024_v32 = vor.u32 %v2023_v47, %v2022_v40  ;;  %v2027_v53 = vshll.u32 %v2026_v51, 23 }
 0x3b5   : > { %3222 = vmatmul.msk.f32.vlgmr.msrb.gmra.mxu0 %vm1685_vm15, %v2996_v0 }
 0x3b6   : > { %v2028_v30 = vor.u32 4788187, %v2027_v53  ;;  %v2031_v41 = vcvt.s32.f32 %v2024_v32 }
 0x3b8   : > { %v2029_v58 = vand.u32 2147483647, %v2028_v30 }
 0x3ba   : > { %v2032_v27 = vmul.f32 %v2031_v41, %v2029_v58 }
 0x3bc   : > { %v2033_v33 = vxor.u32 2147483648, %v2032_v27 }
 0x3be   : > { %v2034_v52 = vsel %vm1913_vm10, %v2033_v33, %v2032_v27 }
 0x3bf   : > { %v2037_v8 = vsel %vm1912_vm0, %v5985_v7, %v2034_v52 }
 0x3c0   : > { %v2039_v2 = vmul.f32 %v2037_v8, %v2037_v8 }
 0x3c2   : > { %v2040_v56 = vmul.f32 -0.001358992, %v2039_v2  ;;  %v2047_v48 = vmul.f32 -0.00019511016, %v2039_v2 }
 0x3c4   : > { %v2041_v35 = vadd.f32 0.041655596, %v2040_v56  ;;  %v2048_v49 = vadd.f32 0.008332121, %v2047_v48 }
 0x3c6   : > { %v2042_v62 = vmul.f32 %v2041_v35, %v2039_v2  ;;  %v2049_v39 = vmul.f32 %v2048_v49, %v2039_v2 }
 0x3c8   : > { %v2043_v55 = vadd.f32 -0.4999988, %v2042_v62  ;;  %v2050_v50 = vadd.f32 -0.16666654, %v2049_v39 }
 0x3ca   : > { %v2044_v45 = vmul.f32 %v2043_v55, %v2039_v2  ;;  %v2051_v21 = vmul.f32 %v2050_v50, %v2039_v2 }
 0x3cc   : > { %v2045_v20 = vadd.f32 1.0, %v2044_v45  ;;  %v2052_v23 = vadd.f32 1.0, %v2051_v21 }
 0x3ce   : > { %v2053_v16 = vmul.f32 %v2052_v23, %v2037_v8  ;;  %v2062_v46 = vxor.u32 2147483648, %v2045_v20 }
 0x3d0   : > { %v2059_v24 = vxor.u32 2147483648, %v2053_v16  ;;  %v2063_v10 = vsel %vm2061_vm7, %v2062_v46, %v2053_v16 }
 0x3d2   : > { %v2060_v61 = vsel %vm2058_vm4, %v2045_v20, %v2059_v24 }
 0x3d3   : > { %v2064_v59 = vsel %vm2057_vm1, %v2060_v61, %v2063_v10 }
 0x3d4   : > { %v2065_v15 = vsel %vm2054_vm5, nan, %v2064_v59 }
 0x3d5   : > { %3041 = vmatpush.msrb.mxu1 %v2065_v15 }
 0x3d6   : > { %3223 = vmatmul.msk.f32.vlgmr.msrb.gmra.mxu1 %vm1685_vm15, %v2996_v0 }
 0x432   : > { %v3023_v14 = vpop.f32.mrf.mxu0 }
 0x433   : > { %v3024_v7 = vadd.f32 %v3023_v14, %v3001_v31 }
 0x453   : > { %v3043_v13 = vpop.f32.mrf.mxu1 }
 0x454   : > { %v3044_v22 = vadd.f32 %v3043_v13, %v3001_v31 }
 0x456   : > { %v3048_v43 = vrot.slane %v3044_v22, 4 }
 0x458   : > { %v3050_v38 = vsel %vm3049_vm2, %v3024_v7, %v3048_v43 }
 0x459   : > { %3052 = vst [vmem:[%s296_s23] sm:$0xff] %v3050_v38 }
 0x45a   : > { %3323 = shalt.err (!%p3320_p5)
}
 0x45b   : > { %3231 = dma.vmem_to_hbm [thread:$0]  (%p3463_p4), %s3070_s30, 128, %s3072_s8, %s3054_s27  }
 0x45c PF: > { %p3237_p6 = scmp.ge.s32.totalorder %s3374_s29, 2  ;;  %s3083_s17 = sand.u32 1, %s3354_s24  }
 0x45d   : > { %s3084_s21 = scalar_lea.sflag [#allocation3], %s3083_s17 }
 0x45e   : > { %p3234_p7 = pnand %p3237_p6, %p3470_p8 }
 0x460   : > { %p3235_p9 = pneg %p3234_p7 }
 0x462   : > { %3349 = dma.done.wait (%p3235_p9), %s3084_s21, 128  }
 0x463   : > { %3351 = vsyncadd (%p3235_p9), %s3084_s21, 4294967168  ;;  %s20_s29 = sadd.s32 1, %s3374_s29   ;;  %s5990_s24 = smov %s3358_s25 }
 0x464   : > { %p17_p10 = scmp.ge.s32.totalorder %s20_s29, 4   ;;  %s5991_s25 = smov %s3362_s26 }
 0x465   : > { %s5992_s26 = smov %s3476_s14  ;;  %s5993_s27 = smov %s3370_s28 }
 0x466   : > { %s5994_s28 = smov %s5996_s9  ;;  %19 = sbr.rel (!%p17_p10) target bundleno = 4 (0x4), region = 83 }
 0x46b   :  { %3090 = vsyncpa [#allocation3], 1 }
 0x46c   :  { %3092 = vsyncpa [#allocation3 + $0x1], 1 }

</bundles_post_ra>
